<compile_context>
chip_gen: v7x
topology: tpu7x:2x2x1
jax: 0.10.0
libtpu: 0.0.40
codegen_flags: <defaults>
</compile_context>

<pallas_src>
import numpy as np
import jax
import jax.numpy as jnp
from jax.experimental import pallas as pl
from jax.experimental.pallas import tpu as pltpu


# ----------------------------- Pallas kernel ------------------------------- #

def _conv3x3_im2col(src, w_bf16, out_h, out_w):
    """3x3 'valid' conv over src (out_h+2, out_w+2, Cin) as ONE im2col matmul.

    w_bf16: (9*Cin, Cout), K ordered tap-major / Cin-minor.
    Returns (out_h*out_w, Cout) float32 (f32 MXU accumulation).
    """
    cin = src.shape[-1]
    cols = [src[dy:dy + out_h, dx:dx + out_w, :]
            for dy in range(3) for dx in range(3)]
    patches = jnp.concatenate(cols, axis=-1).astype(jnp.bfloat16)   # (oh, ow, 9*Cin)
    patches = patches.reshape(out_h * out_w, 9 * cin)
    return jax.lax.dot_general(
        patches, w_bf16,
        dimension_numbers=(((1,), (0,)), ((), ())),
        preferred_element_type=jnp.float32)


def csff_kernel(xy_ref, edge_ref,
                w_cat_ref, norm_ref,
                w_sh_ref, b_sh_ref,
                w_gb_ref, b_gb_ref,
                out_ref):
    # Block shapes:
    #   xy_ref   : (1, 1, TH+2, W+2, 2*Ch) f32  (1-px halo, zero padded)
    #   edge_ref : (1, 1, TH+4, W+4, 1)    f32  (2-px halo, zero padded)
    #   norm_ref : (2, Cout)  row0 = pfn_scale, row1 = folded bias
    #   out_ref  : (1, 1, Cout, TH*W)      f32  (lane-dense, channel-major)
    th = xy_ref.shape[2] - 2
    w = xy_ref.shape[3] - 2
    c2 = xy_ref.shape[4]
    ch = c2 // 2
    cout = out_ref.shape[2]

    row_tile = pl.program_id(1)
    n_row_tiles = pl.num_programs(1)

    xy_halo = xy_ref[0, 0]                                          # (TH+2, W+2, 2Ch)

    # --- cat2 conv (BN scale pre-folded into weight) + residual + pfn norm -- #
    conv_cat = _conv3x3_im2col(xy_halo, w_cat_ref[...], th, w)      # (TH*W, Cout)
    interior = xy_halo[1:th + 1, 1:w + 1, :].reshape(th * w, c2)
    resid = interior[:, :ch] + interior[:, ch:]                     # x + y (Ch == Cout)
    norm = norm_ref[...]
    normalized = conv_cat + resid * norm[0:1, :] + norm[1:2, :]     # (TH*W, Cout)

    # --- mlp_shared: conv3x3(edge, Cin=1) + bias, ReLU (VPU path) ---------- #
    # Computed over a 1-px halo so the gamma/beta conv below has its
    # neighbouring activations available inside this tile.
    edge_halo = edge_ref[0, 0]                                      # (TH+4, W+4, 1)
    actv = jnp.zeros((th + 2, w + 2, ch), jnp.float32)
    for tap in range(9):
        dy, dx = tap // 3, tap % 3
        win = edge_halo[dy:dy + th + 2, dx:dx + w + 2, :]           # (TH+2, W+2, 1)
        actv = actv + win * w_sh_ref[tap]                           # bcast (1,1,Ch)
    actv = jnp.maximum(actv + b_sh_ref[...], 0.0)

    # Zero halo positions outside the true HxW domain (= zero-padding of the
    # gamma/beta conv).
    row_idx = jax.lax.broadcasted_iota(jnp.int32, (th + 2, w + 2, 1), 0)
    col_idx = jax.lax.broadcasted_iota(jnp.int32, (th + 2, w + 2, 1), 1)
    row_ok = jnp.logical_and(
        jnp.logical_or(row_idx >= 1, row_tile > 0),
        jnp.logical_or(row_idx <= th, row_tile < n_row_tiles - 1))
    col_ok = jnp.logical_and(col_idx >= 1, col_idx <= w)
    actv = jnp.where(jnp.logical_and(row_ok, col_ok), actv, 0.0)

    # --- fused gamma / beta conv (single matmul, 2*Cout output lanes) ------ #
    # The "+1" of (1 + gamma) is folded into b_gamma wrapper-side.
    gb = _conv3x3_im2col(actv, w_gb_ref[...], th, w) + b_gb_ref[...]  # (TH*W, 2Cout)
    out = normalized * gb[:, :cout] + gb[:, cout:]                    # (TH*W, Cout)
    out_ref[0, 0] = out.T                                             # (Cout, TH*W)


# ------------------------------ JAX wrapper -------------------------------- #

def _nearest_resize_nchw(edge, H, W):
    """PyTorch F.interpolate(mode='nearest'): src = floor(dst * in / out)."""
    B, C, He, We = edge.shape
    ih = jnp.minimum(jnp.arange(H) * He // H, He - 1)
    iw = jnp.minimum(jnp.arange(W) * We // W, We - 1)
    return edge[:, :, ih[:, None], iw[None, :]]


def _row_tiles(a_nhwc, tile_h, halo):
    """(B, H, W, C) -> (B, NT, tile_h + 2*halo, W + 2*halo, C) zero-padded tiles."""
    b, h, w, c = a_nhwc.shape
    nt = h // tile_h
    p = jnp.pad(a_nhwc, ((0, 0), (halo, halo), (halo, halo), (0, 0)))
    tiles = [p[:, i * tile_h: i * tile_h + tile_h + 2 * halo] for i in range(nt)]
    return jnp.stack(tiles, axis=1)


def _im2col_weight_f32(w_oihw):
    """(Cout, Cin, 3, 3) OIHW -> (9*Cin, Cout) f32, K = tap*Cin + cin."""
    cout, cin = w_oihw.shape[0], w_oihw.shape[1]
    return jnp.transpose(w_oihw, (2, 3, 1, 0)).reshape(9 * cin, cout)


def csff_forward(params, x, y, edge, eps=1e-5, tile_h=8):
    """x, y: (B, Ch, H, W) NCHW; edge: (B, 1, He, We) NCHW -> (B, Cout, H, W)."""
    B, Ch, H, W = x.shape
    Cout = params['w_cat2'].shape[0]
    assert Ch == Cout, "CSFF residual '+ y + x' requires hidden_channels == out_channels"

    th = tile_h if H % tile_h == 0 else H
    nt = H // th

    # ---- NCHW -> NHWC glue + nearest upsample of edge ---------------------- #
    x_n = jnp.transpose(x, (0, 2, 3, 1))
    y_n = jnp.transpose(y, (0, 2, 3, 1))
    xy_cat = jnp.concatenate([x_n, y_n], axis=-1)                   # torch.cat dim=1
    edge_up = _nearest_resize_nchw(edge, H, W)
    edge_n = jnp.transpose(edge_up, (0, 2, 3, 1))                   # (B, H, W, 1)

    # ---- halo'd row tiles (non-overlapping blocks -> pipelined BlockSpec) -- #
    xy_tiles = _row_tiles(xy_cat, th, halo=1)                       # (B, NT, th+2, W+2, 2Ch)
    edge_tiles = _row_tiles(edge_n, th, halo=2)                     # (B, NT, th+4, W+4, 1)

    # ---- fold both inference-mode BatchNorms + residual scaling ------------ #
    cat_scale = params['bn_cat2_gamma'] / jnp.sqrt(params['bn_cat2_var'] + eps)
    cat_bias = params['bn_cat2_beta'] - params['bn_cat2_mean'] * cat_scale
    pfn_scale = 1.0 / jnp.sqrt(params['pfn_var'] + eps)
    pfn_bias = -params['pfn_mean'] * pfn_scale
    comb_bias = cat_bias * pfn_scale + pfn_bias                     # (Cout,)
    norm_packed = jnp.stack([pfn_scale, comb_bias], axis=0)         # (2, Cout)

    # ---- repack weights for the in-kernel matmuls --------------------------- #
    # cat2 conv weight with (cat_scale * pfn_scale) folded per output channel.
    w_cat = (_im2col_weight_f32(params['w_cat2'])
             * (cat_scale * pfn_scale)[None, :]).astype(jnp.bfloat16)   # (9*2Ch, Cout)
    w_gb = jnp.concatenate(
        [_im2col_weight_f32(params['w_gamma']),
         _im2col_weight_f32(params['w_beta'])], axis=1).astype(jnp.bfloat16)  # (9*Ch, 2Cout)
    # "+1" of (1 + gamma) folded into the gamma bias.
    b_gb = jnp.concatenate([params['b_gamma'] + 1.0,
                            params['b_beta']]).reshape(1, 2 * Cout)
    w_sh = jnp.transpose(params['w_shared'], (2, 3, 1, 0)).reshape(9, 1, 1, Ch)  # f32 (VPU)
    b_sh = params['b_shared'].reshape(1, 1, Ch)

    def full_spec(a):
        nd = a.ndim
        return pl.BlockSpec(a.shape, lambda b, t: (0,) * nd)

    out_tiles = pl.pallas_call(
        csff_kernel,
        out_shape=jax.ShapeDtypeStruct((B, nt, Cout, th * W), jnp.float32),
        grid=(B, nt),
        in_specs=[
            pl.BlockSpec((1, 1, th + 2, W + 2, 2 * Ch), lambda b, t: (b, t, 0, 0, 0)),
            pl.BlockSpec((1, 1, th + 4, W + 4, 1), lambda b, t: (b, t, 0, 0, 0)),
            full_spec(w_cat), full_spec(norm_packed),
            full_spec(w_sh), full_spec(b_sh),
            full_spec(w_gb), full_spec(b_gb),
        ],
        out_specs=pl.BlockSpec((1, 1, Cout, th * W), lambda b, t: (b, t, 0, 0)),
        compiler_params=pltpu.CompilerParams(
            dimension_semantics=("parallel", "parallel"),
            vmem_limit_bytes=32 * 1024 * 1024),
    )(xy_tiles, edge_tiles, w_cat, norm_packed, w_sh, b_sh, w_gb, b_gb)

    # (B, NT, Cout, th*W) -> (B, Cout, H, W)
    out = out_tiles.reshape(B, nt, Cout, th, W)
    out = jnp.transpose(out, (0, 2, 1, 3, 4)).reshape(B, Cout, H, W)
    return out


# --------------------------- pure-JAX reference ----------------------------- #

def csff_reference(params, x, y, edge, eps=1e-5):
    def conv(inp, w, bias=None):
        out = jax.lax.conv_general_dilated(
            inp, w, (1, 1), ((1, 1), (1, 1)),
            dimension_numbers=('NCHW', 'OIHW', 'NCHW'))
        if bias is not None:
            out = out + bias.reshape(1, -1, 1, 1)
        return out

    def bn(v, mean, var, gamma=None, beta=None):
        out = (v - mean.reshape(1, -1, 1, 1)) / jnp.sqrt(var.reshape(1, -1, 1, 1) + eps)
        if gamma is not None:
            out = out * gamma.reshape(1, -1, 1, 1) + beta.reshape(1, -1, 1, 1)
        return out

    xy = bn(conv(jnp.concatenate([x, y], axis=1), params['w_cat2']),
            params['bn_cat2_mean'], params['bn_cat2_var'],
            params['bn_cat2_gamma'], params['bn_cat2_beta']) + y + x
    normalized = bn(xy, params['pfn_mean'], params['pfn_var'])
    H, W = x.shape[2:]
    edge_up = _nearest_resize_nchw(edge, H, W)
    actv = jax.nn.relu(conv(edge_up, params['w_shared'], params['b_shared']))
    gamma = conv(actv, params['w_gamma'], params['b_gamma'])
    beta = conv(actv, params['w_beta'], params['b_beta'])
    return normalized * (1.0 + gamma) + beta


# ------------------------------ param init ---------------------------------- #

def init_params(key, hidden, out_ch):
    ks = jax.random.split(key, 13)
    p = {}
    p['w_cat2'] = jax.random.normal(ks[0], (out_ch, hidden * 2, 3, 3), jnp.float32) * 0.1
    p['bn_cat2_gamma'] = 1.0 + 0.1 * jax.random.normal(ks[1], (out_ch,), jnp.float32)
    p['bn_cat2_beta'] = 0.1 * jax.random.normal(ks[2], (out_ch,), jnp.float32)
    p['bn_cat2_mean'] = 0.1 * jax.random.normal(ks[3], (out_ch,), jnp.float32)
    p['bn_cat2_var'] = jax.random.uniform(ks[4], (out_ch,), jnp.float32, 0.5, 1.5)
    p['pfn_mean'] = 0.1 * jax.random.normal(ks[5], (out_ch,), jnp.float32)
    p['pfn_var'] = jax.random.uniform(ks[6], (out_ch,), jnp.float32, 0.5, 1.5)
    p['w_shared'] = jax.random.normal(ks[7], (hidden, 1, 3, 3), jnp.float32) * 0.1
    p['b_shared'] = 0.1 * jax.random.normal(ks[8], (hidden,), jnp.float32)
    p['w_gamma'] = jax.random.normal(ks[9], (out_ch, hidden, 3, 3), jnp.float32) * 0.1
    p['b_gamma'] = 0.1 * jax.random.normal(ks[10], (out_ch,), jnp.float32)
    p['w_beta'] = jax.random.normal(ks[11], (out_ch, hidden, 3, 3), jnp.float32) * 0.1
    p['b_beta'] = 0.1 * jax.random.normal(ks[12], (out_ch,), jnp.float32)
    return p


# --------------------------------- main -------------------------------------- #

if __name__ == "__main__":
    key = jax.random.PRNGKey(0)
    kx, ky, ke, kp = jax.random.split(key, 4)

    # hidden_channels must equal out_channels for the "+ y + x" residual to typecheck
    B, Ch, Cout, H, W = 2, 4, 4, 16, 16
    x = jax.random.normal(kx, (B, Ch, H, W), jnp.float32)
    y = jax.random.normal(ky, (B, Ch, H, W), jnp.float32)
    edge = jax.random.normal(ke, (B, 1, 8, 8), jnp.float32)   # lower-res edge map
    params = init_params(kp, Ch, Cout)

    fwd = jax.jit(lambda p, a, b, e: csff_forward(p, a, b, e))
    out = fwd(params, x, y, edge)
    out = jax.block_until_ready(out)

    ref = csff_reference(params, x, y, edge)
    assert out.shape == (B, Cout, H, W)
    np.testing.assert_allclose(np.asarray(out), np.asarray(ref), rtol=2e-2, atol=3e-2)

    print("KERNEL_OK")
</pallas_src>

<mosaic_0001>
module attributes {stable_mosaic.version = 11 : i64} {
  func.func @csff_kernel(%arg0: i32, %arg1: i32, %arg2: memref<1x1x10x18x8xf32, #tpu.memory_space<vmem>>, %arg3: memref<1x1x12x20x1xf32, #tpu.memory_space<vmem>>, %arg4: memref<72x4xbf16, #tpu.memory_space<vmem>>, %arg5: memref<2x4xf32, #tpu.memory_space<vmem>>, %arg6: memref<9x1x1x4xf32, #tpu.memory_space<vmem>>, %arg7: memref<1x1x4xf32, #tpu.memory_space<vmem>>, %arg8: memref<36x8xbf16, #tpu.memory_space<vmem>>, %arg9: memref<1x8xf32, #tpu.memory_space<vmem>>, %arg10: memref<1x1x4x128xf32, #tpu.memory_space<vmem>>) attributes {dimension_semantics = [#tpu.dimension_semantics<parallel>, #tpu.dimension_semantics<parallel>], iteration_bounds = array<i64: 2, 2>, scalar_prefetch = 0 : i64, scratch_operands = 0 : i64, tpu.core_type = #tpu.core_type<tc>, window_params = [{transform_indices = @transform_0, window_bounds = array<i64: 1, 1, 10, 18, 8>}, {transform_indices = @transform_1, window_bounds = array<i64: 1, 1, 12, 20, 1>}, {pipeline_mode = #tpu.pipeline_mode<synchronous>, transform_indices = @transform_2, window_bounds = array<i64: 72, 4>}, {pipeline_mode = #tpu.pipeline_mode<synchronous>, transform_indices = @transform_3, window_bounds = array<i64: 2, 4>}, {pipeline_mode = #tpu.pipeline_mode<synchronous>, transform_indices = @transform_4, window_bounds = array<i64: 9, 1, 1, 4>}, {pipeline_mode = #tpu.pipeline_mode<synchronous>, transform_indices = @transform_5, window_bounds = array<i64: 1, 1, 4>}, {pipeline_mode = #tpu.pipeline_mode<synchronous>, transform_indices = @transform_6, window_bounds = array<i64: 36, 8>}, {pipeline_mode = #tpu.pipeline_mode<synchronous>, transform_indices = @transform_7, window_bounds = array<i64: 1, 8>}, {transform_indices = @transform_8, window_bounds = array<i64: 1, 1, 4, 128>}]} {
    %c0 = arith.constant 0 : index
    %c0_0 = arith.constant 0 : index
    %c0_1 = arith.constant 0 : index
    %c0_2 = arith.constant 0 : index
    %c0_3 = arith.constant 0 : index
    %0 = vector.load %arg2[%c0, %c0_0, %c0_1, %c0_2, %c0_3] : memref<1x1x10x18x8xf32, #tpu.memory_space<vmem>>, vector<1x1x10x18x8xf32>
    %1 = vector.shape_cast %0 : vector<1x1x10x18x8xf32> to vector<10x18x8xf32>
    %c0_4 = arith.constant 0 : index
    %c0_5 = arith.constant 0 : index
    %2 = vector.load %arg4[%c0_4, %c0_5] : memref<72x4xbf16, #tpu.memory_space<vmem>>, vector<72x4xbf16>
    %3 = vector.extract_strided_slice %1 {offsets = [0, 0, 0], sizes = [8, 16, 8], strides = [1, 1, 1]} : vector<10x18x8xf32> to vector<8x16x8xf32>
    %4 = vector.extract_strided_slice %1 {offsets = [0, 1, 0], sizes = [8, 16, 8], strides = [1, 1, 1]} : vector<10x18x8xf32> to vector<8x16x8xf32>
    %5 = vector.extract_strided_slice %1 {offsets = [0, 2, 0], sizes = [8, 16, 8], strides = [1, 1, 1]} : vector<10x18x8xf32> to vector<8x16x8xf32>
    %6 = vector.extract_strided_slice %1 {offsets = [1, 0, 0], sizes = [8, 16, 8], strides = [1, 1, 1]} : vector<10x18x8xf32> to vector<8x16x8xf32>
    %7 = vector.extract_strided_slice %1 {offsets = [1, 1, 0], sizes = [8, 16, 8], strides = [1, 1, 1]} : vector<10x18x8xf32> to vector<8x16x8xf32>
    %8 = vector.extract_strided_slice %1 {offsets = [1, 2, 0], sizes = [8, 16, 8], strides = [1, 1, 1]} : vector<10x18x8xf32> to vector<8x16x8xf32>
    %9 = vector.extract_strided_slice %1 {offsets = [2, 0, 0], sizes = [8, 16, 8], strides = [1, 1, 1]} : vector<10x18x8xf32> to vector<8x16x8xf32>
    %10 = vector.extract_strided_slice %1 {offsets = [2, 1, 0], sizes = [8, 16, 8], strides = [1, 1, 1]} : vector<10x18x8xf32> to vector<8x16x8xf32>
    %11 = vector.extract_strided_slice %1 {offsets = [2, 2, 0], sizes = [8, 16, 8], strides = [1, 1, 1]} : vector<10x18x8xf32> to vector<8x16x8xf32>
    %12 = tpu.concatenate %3, %4, %5, %6, %7, %8, %9, %10, %11 in 2 : vector<8x16x8xf32>, vector<8x16x8xf32>, vector<8x16x8xf32>, vector<8x16x8xf32>, vector<8x16x8xf32>, vector<8x16x8xf32>, vector<8x16x8xf32>, vector<8x16x8xf32>, vector<8x16x8xf32> -> vector<8x16x72xf32>
    %13 = arith.truncf %12 : vector<8x16x72xf32> to vector<8x16x72xbf16>
    %14 = vector.shape_cast %13 : vector<8x16x72xbf16> to vector<128x72xbf16>
    %cst = arith.constant dense<0.000000e+00> : vector<128x4xf32>
    %15 = tpu.matmul %14, %2, %cst {dimension_numbers = #tpu.dot_dimension_numbers<[1], [0], [0], [1], [0, 0, 1, 1], [], []>} : vector<128x72xbf16>, vector<72x4xbf16>, vector<128x4xf32> -> vector<128x4xf32>
    %16 = vector.extract_strided_slice %1 {offsets = [1, 1, 0], sizes = [8, 16, 8], strides = [1, 1, 1]} : vector<10x18x8xf32> to vector<8x16x8xf32>
    %17 = vector.shape_cast %16 : vector<8x16x8xf32> to vector<128x8xf32>
    %18 = vector.extract_strided_slice %17 {offsets = [0, 0], sizes = [128, 4], strides = [1, 1]} : vector<128x8xf32> to vector<128x4xf32>
    %19 = vector.extract_strided_slice %17 {offsets = [0, 4], sizes = [128, 4], strides = [1, 1]} : vector<128x8xf32> to vector<128x4xf32>
    %20 = arith.addf %18, %19 : vector<128x4xf32>
    %c0_6 = arith.constant 0 : index
    %c0_7 = arith.constant 0 : index
    %21 = vector.load %arg5[%c0_6, %c0_7] : memref<2x4xf32, #tpu.memory_space<vmem>>, vector<2x4xf32>
    %22 = vector.extract_strided_slice %21 {offsets = [0, 0], sizes = [1, 4], strides = [1, 1]} : vector<2x4xf32> to vector<1x4xf32>
    %23 = vector.broadcast %22 : vector<1x4xf32> to vector<128x4xf32>
    %24 = arith.mulf %20, %23 : vector<128x4xf32>
    %25 = arith.addf %15, %24 : vector<128x4xf32>
    %26 = vector.extract_strided_slice %21 {offsets = [1, 0], sizes = [1, 4], strides = [1, 1]} : vector<2x4xf32> to vector<1x4xf32>
    %27 = vector.broadcast %26 : vector<1x4xf32> to vector<128x4xf32>
    %28 = arith.addf %25, %27 : vector<128x4xf32>
    %c0_8 = arith.constant 0 : index
    %c0_9 = arith.constant 0 : index
    %c0_10 = arith.constant 0 : index
    %c0_11 = arith.constant 0 : index
    %c0_12 = arith.constant 0 : index
    %29 = vector.load %arg3[%c0_8, %c0_9, %c0_10, %c0_11, %c0_12] : memref<1x1x12x20x1xf32, #tpu.memory_space<vmem>>, vector<1x1x12x20x1xf32>
    %30 = vector.shape_cast %29 : vector<1x1x12x20x1xf32> to vector<12x20x1xf32>
    %cst_13 = arith.constant 0.000000e+00 : f32
    %31 = vector.broadcast %cst_13 : f32 to vector<10x18x4xf32>
    %32 = vector.extract_strided_slice %30 {offsets = [0, 0, 0], sizes = [10, 18, 1], strides = [1, 1, 1]} : vector<12x20x1xf32> to vector<10x18x1xf32>
    %c0_14 = arith.constant 0 : index
    %c0_15 = arith.constant 0 : index
    %c0_16 = arith.constant 0 : index
    %c0_17 = arith.constant 0 : index
    %33 = vector.load %arg6[%c0_14, %c0_15, %c0_16, %c0_17] : memref<9x1x1x4xf32, #tpu.memory_space<vmem>>, vector<1x1x1x4xf32>
    %34 = vector.shape_cast %33 : vector<1x1x1x4xf32> to vector<1x1x4xf32>
    %35 = vector.broadcast %32 : vector<10x18x1xf32> to vector<10x18x4xf32>
    %36 = vector.broadcast %34 : vector<1x1x4xf32> to vector<10x18x4xf32>
    %37 = arith.mulf %35, %36 : vector<10x18x4xf32>
    %38 = arith.addf %31, %37 : vector<10x18x4xf32>
    %39 = vector.extract_strided_slice %30 {offsets = [0, 1, 0], sizes = [10, 18, 1], strides = [1, 1, 1]} : vector<12x20x1xf32> to vector<10x18x1xf32>
    %c1 = arith.constant 1 : index
    %c0_18 = arith.constant 0 : index
    %c0_19 = arith.constant 0 : index
    %c0_20 = arith.constant 0 : index
    %40 = vector.load %arg6[%c1, %c0_18, %c0_19, %c0_20] : memref<9x1x1x4xf32, #tpu.memory_space<vmem>>, vector<1x1x1x4xf32>
    %41 = vector.shape_cast %40 : vector<1x1x1x4xf32> to vector<1x1x4xf32>
    %42 = vector.broadcast %39 : vector<10x18x1xf32> to vector<10x18x4xf32>
    %43 = vector.broadcast %41 : vector<1x1x4xf32> to vector<10x18x4xf32>
    %44 = arith.mulf %42, %43 : vector<10x18x4xf32>
    %45 = arith.addf %38, %44 : vector<10x18x4xf32>
    %46 = vector.extract_strided_slice %30 {offsets = [0, 2, 0], sizes = [10, 18, 1], strides = [1, 1, 1]} : vector<12x20x1xf32> to vector<10x18x1xf32>
    %c2 = arith.constant 2 : index
    %c0_21 = arith.constant 0 : index
    %c0_22 = arith.constant 0 : index
    %c0_23 = arith.constant 0 : index
    %47 = vector.load %arg6[%c2, %c0_21, %c0_22, %c0_23] : memref<9x1x1x4xf32, #tpu.memory_space<vmem>>, vector<1x1x1x4xf32>
    %48 = vector.shape_cast %47 : vector<1x1x1x4xf32> to vector<1x1x4xf32>
    %49 = vector.broadcast %46 : vector<10x18x1xf32> to vector<10x18x4xf32>
    %50 = vector.broadcast %48 : vector<1x1x4xf32> to vector<10x18x4xf32>
    %51 = arith.mulf %49, %50 : vector<10x18x4xf32>
    %52 = arith.addf %45, %51 : vector<10x18x4xf32>
    %53 = vector.extract_strided_slice %30 {offsets = [1, 0, 0], sizes = [10, 18, 1], strides = [1, 1, 1]} : vector<12x20x1xf32> to vector<10x18x1xf32>
    %c3 = arith.constant 3 : index
    %c0_24 = arith.constant 0 : index
    %c0_25 = arith.constant 0 : index
    %c0_26 = arith.constant 0 : index
    %54 = vector.load %arg6[%c3, %c0_24, %c0_25, %c0_26] : memref<9x1x1x4xf32, #tpu.memory_space<vmem>>, vector<1x1x1x4xf32>
    %55 = vector.shape_cast %54 : vector<1x1x1x4xf32> to vector<1x1x4xf32>
    %56 = vector.broadcast %53 : vector<10x18x1xf32> to vector<10x18x4xf32>
    %57 = vector.broadcast %55 : vector<1x1x4xf32> to vector<10x18x4xf32>
    %58 = arith.mulf %56, %57 : vector<10x18x4xf32>
    %59 = arith.addf %52, %58 : vector<10x18x4xf32>
    %60 = vector.extract_strided_slice %30 {offsets = [1, 1, 0], sizes = [10, 18, 1], strides = [1, 1, 1]} : vector<12x20x1xf32> to vector<10x18x1xf32>
    %c4 = arith.constant 4 : index
    %c0_27 = arith.constant 0 : index
    %c0_28 = arith.constant 0 : index
    %c0_29 = arith.constant 0 : index
    %61 = vector.load %arg6[%c4, %c0_27, %c0_28, %c0_29] : memref<9x1x1x4xf32, #tpu.memory_space<vmem>>, vector<1x1x1x4xf32>
    %62 = vector.shape_cast %61 : vector<1x1x1x4xf32> to vector<1x1x4xf32>
    %63 = vector.broadcast %60 : vector<10x18x1xf32> to vector<10x18x4xf32>
    %64 = vector.broadcast %62 : vector<1x1x4xf32> to vector<10x18x4xf32>
    %65 = arith.mulf %63, %64 : vector<10x18x4xf32>
    %66 = arith.addf %59, %65 : vector<10x18x4xf32>
    %67 = vector.extract_strided_slice %30 {offsets = [1, 2, 0], sizes = [10, 18, 1], strides = [1, 1, 1]} : vector<12x20x1xf32> to vector<10x18x1xf32>
    %c5 = arith.constant 5 : index
    %c0_30 = arith.constant 0 : index
    %c0_31 = arith.constant 0 : index
    %c0_32 = arith.constant 0 : index
    %68 = vector.load %arg6[%c5, %c0_30, %c0_31, %c0_32] : memref<9x1x1x4xf32, #tpu.memory_space<vmem>>, vector<1x1x1x4xf32>
    %69 = vector.shape_cast %68 : vector<1x1x1x4xf32> to vector<1x1x4xf32>
    %70 = vector.broadcast %67 : vector<10x18x1xf32> to vector<10x18x4xf32>
    %71 = vector.broadcast %69 : vector<1x1x4xf32> to vector<10x18x4xf32>
    %72 = arith.mulf %70, %71 : vector<10x18x4xf32>
    %73 = arith.addf %66, %72 : vector<10x18x4xf32>
    %74 = vector.extract_strided_slice %30 {offsets = [2, 0, 0], sizes = [10, 18, 1], strides = [1, 1, 1]} : vector<12x20x1xf32> to vector<10x18x1xf32>
    %c6 = arith.constant 6 : index
    %c0_33 = arith.constant 0 : index
    %c0_34 = arith.constant 0 : index
    %c0_35 = arith.constant 0 : index
    %75 = vector.load %arg6[%c6, %c0_33, %c0_34, %c0_35] : memref<9x1x1x4xf32, #tpu.memory_space<vmem>>, vector<1x1x1x4xf32>
    %76 = vector.shape_cast %75 : vector<1x1x1x4xf32> to vector<1x1x4xf32>
    %77 = vector.broadcast %74 : vector<10x18x1xf32> to vector<10x18x4xf32>
    %78 = vector.broadcast %76 : vector<1x1x4xf32> to vector<10x18x4xf32>
    %79 = arith.mulf %77, %78 : vector<10x18x4xf32>
    %80 = arith.addf %73, %79 : vector<10x18x4xf32>
    %81 = vector.extract_strided_slice %30 {offsets = [2, 1, 0], sizes = [10, 18, 1], strides = [1, 1, 1]} : vector<12x20x1xf32> to vector<10x18x1xf32>
    %c7 = arith.constant 7 : index
    %c0_36 = arith.constant 0 : index
    %c0_37 = arith.constant 0 : index
    %c0_38 = arith.constant 0 : index
    %82 = vector.load %arg6[%c7, %c0_36, %c0_37, %c0_38] : memref<9x1x1x4xf32, #tpu.memory_space<vmem>>, vector<1x1x1x4xf32>
    %83 = vector.shape_cast %82 : vector<1x1x1x4xf32> to vector<1x1x4xf32>
    %84 = vector.broadcast %81 : vector<10x18x1xf32> to vector<10x18x4xf32>
    %85 = vector.broadcast %83 : vector<1x1x4xf32> to vector<10x18x4xf32>
    %86 = arith.mulf %84, %85 : vector<10x18x4xf32>
    %87 = arith.addf %80, %86 : vector<10x18x4xf32>
    %88 = vector.extract_strided_slice %30 {offsets = [2, 2, 0], sizes = [10, 18, 1], strides = [1, 1, 1]} : vector<12x20x1xf32> to vector<10x18x1xf32>
    %c8 = arith.constant 8 : index
    %c0_39 = arith.constant 0 : index
    %c0_40 = arith.constant 0 : index
    %c0_41 = arith.constant 0 : index
    %89 = vector.load %arg6[%c8, %c0_39, %c0_40, %c0_41] : memref<9x1x1x4xf32, #tpu.memory_space<vmem>>, vector<1x1x1x4xf32>
    %90 = vector.shape_cast %89 : vector<1x1x1x4xf32> to vector<1x1x4xf32>
    %91 = vector.broadcast %88 : vector<10x18x1xf32> to vector<10x18x4xf32>
    %92 = vector.broadcast %90 : vector<1x1x4xf32> to vector<10x18x4xf32>
    %93 = arith.mulf %91, %92 : vector<10x18x4xf32>
    %94 = arith.addf %87, %93 : vector<10x18x4xf32>
    %c0_42 = arith.constant 0 : index
    %c0_43 = arith.constant 0 : index
    %c0_44 = arith.constant 0 : index
    %95 = vector.load %arg7[%c0_42, %c0_43, %c0_44] : memref<1x1x4xf32, #tpu.memory_space<vmem>>, vector<1x1x4xf32>
    %96 = vector.broadcast %95 : vector<1x1x4xf32> to vector<10x18x4xf32>
    %97 = arith.addf %94, %96 : vector<10x18x4xf32>
    %cst_45 = arith.constant 0.000000e+00 : f32
    %98 = vector.broadcast %cst_45 : f32 to vector<10x18x4xf32>
    %99 = arith.maximumf %97, %98 : vector<10x18x4xf32>
    %100 = tpu.iota {dimensions = array<i32: 0>} : vector<10x18x1xi32>
    %101 = tpu.iota {dimensions = array<i32: 1>} : vector<10x18x1xi32>
    %c1_i32 = arith.constant 1 : i32
    %102 = vector.broadcast %c1_i32 : i32 to vector<10x18x1xi32>
    %103 = arith.cmpi sge, %100, %102 : vector<10x18x1xi32>
    %c0_i32 = arith.constant 0 : i32
    %104 = arith.cmpi sgt, %arg1, %c0_i32 : i32
    %105 = vector.broadcast %104 : i1 to vector<10x18x1xi1>
    %106 = arith.ori %103, %105 : vector<10x18x1xi1>
    %c8_i32 = arith.constant 8 : i32
    %107 = vector.broadcast %c8_i32 : i32 to vector<10x18x1xi32>
    %108 = arith.cmpi sle, %100, %107 : vector<10x18x1xi32>
    %c1_i32_46 = arith.constant 1 : i32
    %109 = arith.cmpi slt, %arg1, %c1_i32_46 : i32
    %110 = vector.broadcast %109 : i1 to vector<10x18x1xi1>
    %111 = arith.ori %108, %110 : vector<10x18x1xi1>
    %112 = arith.andi %106, %111 : vector<10x18x1xi1>
    %c1_i32_47 = arith.constant 1 : i32
    %113 = vector.broadcast %c1_i32_47 : i32 to vector<10x18x1xi32>
    %114 = arith.cmpi sge, %101, %113 : vector<10x18x1xi32>
    %c16_i32 = arith.constant 16 : i32
    %115 = vector.broadcast %c16_i32 : i32 to vector<10x18x1xi32>
    %116 = arith.cmpi sle, %101, %115 : vector<10x18x1xi32>
    %117 = arith.andi %114, %116 : vector<10x18x1xi1>
    %118 = arith.andi %112, %117 : vector<10x18x1xi1>
    %cst_48 = arith.constant 0.000000e+00 : f32
    %119 = vector.shape_cast %118 : vector<10x18x1xi1> to vector<10x18x1xi1>
    %120 = vector.broadcast %119 : vector<10x18x1xi1> to vector<10x18x4xi1>
    %121 = vector.broadcast %cst_48 : f32 to vector<10x18x4xf32>
    %122 = arith.select %120, %99, %121 : vector<10x18x4xi1>, vector<10x18x4xf32>
    %c0_49 = arith.constant 0 : index
    %c0_50 = arith.constant 0 : index
    %123 = vector.load %arg8[%c0_49, %c0_50] : memref<36x8xbf16, #tpu.memory_space<vmem>>, vector<36x8xbf16>
    %124 = vector.extract_strided_slice %122 {offsets = [0, 0, 0], sizes = [8, 16, 4], strides = [1, 1, 1]} : vector<10x18x4xf32> to vector<8x16x4xf32>
    %125 = vector.extract_strided_slice %122 {offsets = [0, 1, 0], sizes = [8, 16, 4], strides = [1, 1, 1]} : vector<10x18x4xf32> to vector<8x16x4xf32>
    %126 = vector.extract_strided_slice %122 {offsets = [0, 2, 0], sizes = [8, 16, 4], strides = [1, 1, 1]} : vector<10x18x4xf32> to vector<8x16x4xf32>
    %127 = vector.extract_strided_slice %122 {offsets = [1, 0, 0], sizes = [8, 16, 4], strides = [1, 1, 1]} : vector<10x18x4xf32> to vector<8x16x4xf32>
    %128 = vector.extract_strided_slice %122 {offsets = [1, 1, 0], sizes = [8, 16, 4], strides = [1, 1, 1]} : vector<10x18x4xf32> to vector<8x16x4xf32>
    %129 = vector.extract_strided_slice %122 {offsets = [1, 2, 0], sizes = [8, 16, 4], strides = [1, 1, 1]} : vector<10x18x4xf32> to vector<8x16x4xf32>
    %130 = vector.extract_strided_slice %122 {offsets = [2, 0, 0], sizes = [8, 16, 4], strides = [1, 1, 1]} : vector<10x18x4xf32> to vector<8x16x4xf32>
    %131 = vector.extract_strided_slice %122 {offsets = [2, 1, 0], sizes = [8, 16, 4], strides = [1, 1, 1]} : vector<10x18x4xf32> to vector<8x16x4xf32>
    %132 = vector.extract_strided_slice %122 {offsets = [2, 2, 0], sizes = [8, 16, 4], strides = [1, 1, 1]} : vector<10x18x4xf32> to vector<8x16x4xf32>
    %133 = tpu.concatenate %124, %125, %126, %127, %128, %129, %130, %131, %132 in 2 : vector<8x16x4xf32>, vector<8x16x4xf32>, vector<8x16x4xf32>, vector<8x16x4xf32>, vector<8x16x4xf32>, vector<8x16x4xf32>, vector<8x16x4xf32>, vector<8x16x4xf32>, vector<8x16x4xf32> -> vector<8x16x36xf32>
    %134 = arith.truncf %133 : vector<8x16x36xf32> to vector<8x16x36xbf16>
    %135 = vector.shape_cast %134 : vector<8x16x36xbf16> to vector<128x36xbf16>
    %cst_51 = arith.constant dense<0.000000e+00> : vector<128x8xf32>
    %136 = tpu.matmul %135, %123, %cst_51 {dimension_numbers = #tpu.dot_dimension_numbers<[1], [0], [0], [1], [0, 0, 1, 1], [], []>} : vector<128x36xbf16>, vector<36x8xbf16>, vector<128x8xf32> -> vector<128x8xf32>
    %c0_52 = arith.constant 0 : index
    %c0_53 = arith.constant 0 : index
    %137 = vector.load %arg9[%c0_52, %c0_53] : memref<1x8xf32, #tpu.memory_space<vmem>>, vector<1x8xf32>
    %138 = vector.broadcast %137 : vector<1x8xf32> to vector<128x8xf32>
    %139 = arith.addf %136, %138 : vector<128x8xf32>
    %140 = vector.extract_strided_slice %139 {offsets = [0, 0], sizes = [128, 4], strides = [1, 1]} : vector<128x8xf32> to vector<128x4xf32>
    %141 = arith.mulf %28, %140 : vector<128x4xf32>
    %142 = vector.extract_strided_slice %139 {offsets = [0, 4], sizes = [128, 4], strides = [1, 1]} : vector<128x8xf32> to vector<128x4xf32>
    %143 = arith.addf %141, %142 : vector<128x4xf32>
    %144 = tpu.transpose %143, [1, 0] : vector<128x4xf32> -> vector<4x128xf32>
    %c0_54 = arith.constant 0 : index
    %c0_55 = arith.constant 0 : index
    %c0_56 = arith.constant 0 : index
    %c0_57 = arith.constant 0 : index
    %145 = vector.load %arg10[%c0_54, %c0_55, %c0_56, %c0_57] : memref<1x1x4x128xf32, #tpu.memory_space<vmem>>, vector<1x1x4x128xf32>
    %146 = vector.shape_cast %145 : vector<1x1x4x128xf32> to vector<4x128xf32>
    %147 = vector.shape_cast %144 : vector<4x128xf32> to vector<1x1x4x128xf32>
    tpu.vector_store %arg10[%c0_54, %c0_55, %c0_56, %c0_57], %147 {strides = array<i32>} : memref<1x1x4x128xf32, #tpu.memory_space<vmem>>, vector<1x1x4x128xf32>,
    return
  }
  func.func @transform_0(%arg0: i32, %arg1: i32) -> (i32, i32, i32, i32, i32) {
    %c0_i32 = arith.constant 0 : i32
    %c0_i32_0 = arith.constant 0 : i32
    %c0_i32_1 = arith.constant 0 : i32
    %c0_i32_2 = arith.constant 0 : i32
    return %arg0, %arg1, %c0_i32, %c0_i32_0, %c0_i32_1 : i32, i32, i32, i32, i32
  }
  func.func @transform_1(%arg0: i32, %arg1: i32) -> (i32, i32, i32, i32, i32) {
    %c0_i32 = arith.constant 0 : i32
    %c0_i32_0 = arith.constant 0 : i32
    %c0_i32_1 = arith.constant 0 : i32
    %c0_i32_2 = arith.constant 0 : i32
    return %arg0, %arg1, %c0_i32, %c0_i32_0, %c0_i32_1 : i32, i32, i32, i32, i32
  }
  func.func @transform_2(%arg0: i32, %arg1: i32) -> (i32, i32) {
    %c0_i32 = arith.constant 0 : i32
    %c0_i32_0 = arith.constant 0 : i32
    %c0_i32_1 = arith.constant 0 : i32
    return %c0_i32, %c0_i32_0 : i32, i32
  }
  func.func @transform_3(%arg0: i32, %arg1: i32) -> (i32, i32) {
    %c0_i32 = arith.constant 0 : i32
    %c0_i32_0 = arith.constant 0 : i32
    %c0_i32_1 = arith.constant 0 : i32
    return %c0_i32, %c0_i32_0 : i32, i32
  }
  func.func @transform_4(%arg0: i32, %arg1: i32) -> (i32, i32, i32, i32) {
    %c0_i32 = arith.constant 0 : i32
    %c0_i32_0 = arith.constant 0 : i32
    %c0_i32_1 = arith.constant 0 : i32
    %c0_i32_2 = arith.constant 0 : i32
    %c0_i32_3 = arith.constant 0 : i32
    return %c0_i32, %c0_i32_0, %c0_i32_1, %c0_i32_2 : i32, i32, i32, i32
  }
  func.func @transform_5(%arg0: i32, %arg1: i32) -> (i32, i32, i32) {
    %c0_i32 = arith.constant 0 : i32
    %c0_i32_0 = arith.constant 0 : i32
    %c0_i32_1 = arith.constant 0 : i32
    %c0_i32_2 = arith.constant 0 : i32
    return %c0_i32, %c0_i32_0, %c0_i32_1 : i32, i32, i32
  }
  func.func @transform_6(%arg0: i32, %arg1: i32) -> (i32, i32) {
    %c0_i32 = arith.constant 0 : i32
    %c0_i32_0 = arith.constant 0 : i32
    %c0_i32_1 = arith.constant 0 : i32
    return %c0_i32, %c0_i32_0 : i32, i32
  }
  func.func @transform_7(%arg0: i32, %arg1: i32) -> (i32, i32) {
    %c0_i32 = arith.constant 0 : i32
    %c0_i32_0 = arith.constant 0 : i32
    %c0_i32_1 = arith.constant 0 : i32
    return %c0_i32, %c0_i32_0 : i32, i32
  }
  func.func @transform_8(%arg0: i32, %arg1: i32) -> (i32, i32, i32, i32) {
    %c0_i32 = arith.constant 0 : i32
    %c0_i32_0 = arith.constant 0 : i32
    %c0_i32_1 = arith.constant 0 : i32
    return %arg0, %arg1, %c0_i32, %c0_i32_0 : i32, i32, i32, i32
  }
}

</mosaic_0001>

<bundles_post_ra>
// kernel: _lambda_.1
= control target key start
LH: loop header
LB: loop body
LE: loop exit
PB: predicated region body
PF: predicated region fallthrough
CT: control target
= control target key end

     0   :  { %s4971_s27 = smov 0   ;;  %s4973_s28 = smov 0   ;;  %s8170_s0 = inlined_call_operand.vmem [shape: f32[2,2,10,18,8], index: 0, kind: input, shape index: {}]   ;;  %s8171_s1 = inlined_call_operand.vmem [shape: f32[2,2,12,20,1], index: 1, kind: input, shape index: {}]   ;;  %s8172_s2 = inlined_call_operand.vmem [shape: bf16[72,4], index: 2, kind: input, shape index: {}]   ;;  %s8173_s3 = inlined_call_operand.vmem [shape: f32[2,4], index: 3, kind: input, shape index: {}]   ;;  %s8174_s4 = inlined_call_operand.vmem [shape: f32[9,1,1,4], index: 4, kind: input, shape index: {}]   ;;  %s8175_s5 = inlined_call_operand.vmem [shape: f32[1,1,4], index: 5, kind: input, shape index: {}]   ;;  %s8176_s6 = inlined_call_operand.vmem [shape: bf16[36,8], index: 6, kind: input, shape index: {}]   ;;  %s8177_s7 = inlined_call_operand.vmem [shape: f32[1,8], index: 7, kind: input, shape index: {}]   ;;  %s8178_s8 = inlined_call_operand.vmem [shape: f32[2,2,4,128], index: 8, kind: output, shape index: {}]  }
   0x1   :  { %s4975_s29 = smov 0   ;;  %s4977_s30 = smov 0  }
   0x2   :  { %s4979_s9 = smov 0  }
   0x3 LB: > { %s27_s10 = sadd.s32 1, %s4902_s29  ;;  %s30_s11 = sadd.s32 1, %s4906_s30  ;;  %s4910_s9 = sphi %s4979_s9, %s18_s9   ;;  %s4906_s30 = sphi %s4977_s30, %s8726_s30   ;;  %s4902_s29 = sphi %s4975_s29, %s8725_s29   ;;  %s4898_s28 = sphi %s4973_s28, %s8724_s28   ;;  %s4894_s27 = sphi %s4971_s27, %s8723_s27  }
   0x4   : > { %p28_p0 = scmp.ge.s32.totalorder %s27_s10, 2  ;;  %p4030_p1 = scmp.ge.s32.totalorder %s4910_s9, 1 }
   0x5   : > { %p298_p2 = scmp.lt.s32.totalorder %s4910_s9, 5 }
   0x6   : > { %s8728_s10 = smov (%p28_p0, %s27_s10), 0  ;;  %s8730_s11 = smov (!%p28_p0, %s30_s11), %s4906_s30 }
   0x7   : > { %p299_p3 = pnand %p4030_p1, %p298_p2  ;;  %p32_p4 = scmp.ge.s32.totalorder %s8730_s11, 2 }
   0x9   : > { %s8732_s11 = smov (%p32_p4, %s8730_s11), 0  ;;  %302 = sbr.rel (%p299_p3) target bundleno = 1138 (0x472), region = 52 }
  0x10   : > { %p348_p5 = scmp.lt.s32.totalorder %s4898_s28, 1  ;;  %p350_p6 = scmp.lt.s32.totalorder %s4894_s27, 1  ;;  %vm438_vm0 = vcmask 1046528   ;;  %vm527_vm1 = vcmask 1045504   ;;  %vm1227_vm2 = vcmask 1043456   ;;  %vm930_vm3 = vcmask 64512  }
  0x11   : > { %s4912_s20 = smov 8   ;;  %s4913_s21 = smov 16   ;;  %vm947_vm4 = vcmask 130048   ;;  %vm964_vm5 = vcmask 195584   ;;  %vm981_vm6 = vcmask 261120   ;;  %vm998_vm7 = vcmask 326656  }
  0x12   : > { %s8734_s28 = smov (!%p348_p5, %s4898_s28), 1  ;;  %s4914_s22 = smov 24   ;;  %vm1015_vm8 = vcmask 392192   ;;  %vm1032_vm9 = vcmask 457728   ;;  %vm1049_vm10 = vcmask 523264   ;;  %vm1202_vm11 = vcmask 588800  }
  0x13   : > { %s5009_s12 = scalar_select %p350_p6, %s4894_s27, 1 }
  0x14   : > { %s4155_s13 = smul.u32 60, %s8734_s28  ;;  %s4916_s23 = smov 32  }
  0x15   : > { %s4154_s14 = smul.u32 30, %s5009_s12  ;;  %s4917_s24 = smov 40  }
  0x16   : > { %s4918_s25 = smov 48   ;;  %s4919_s18 = smov 56  }
  0x17   : > { %s354_s15 = sadd.s32 %s4155_s13, %s4154_s14  ;;  %s4920_s13 = smov 64  }
  0x18   : > { %s4031_s16 = sshll.u32 %s354_s15, 3  ;;  %s4156_s14 = smul.u32 36, %s5009_s12 }
  0x19   : > { %s5016_s19 = scalar_lea.vmem %s8170_s0, %s4031_s16  ;;  %s4157_s15 = smul.u32 72, %s8734_s28 }
  0x1a   : > { %v5019_v0 = vld [vmem:[%s5016_s19 + $0x30] sm:$0xff]  ;;  %v5022_v1 = vld [vmem:[%s5016_s19 + $0x38] sm:$0xff]  ;;  %v5025_v2 = vld [vmem:[%s5016_s19 + $0x40] sm:$0x3]  ;;  %p2906_p7 = scmp.gt.s32.totalorder %s4894_s27, 0 }
  0x1b   : > { %v449_v3 = vrot.slane %v5019_v0, 1  ;;  %v450_v4 = vrot.slane %v5022_v1, 1  ;;  %v452_v5 = vrot.slane %v5025_v2, 1  ;;  %v5031_v6 = vld [vmem:[%s5016_s19] sm:$0xff]  ;;  %v5034_v7 = vld [vmem:[%s5016_s19 + $0x8] sm:$0xff]  ;;  %v5045_v12 = vld [vmem:[%s5016_s19 + $0x50] sm:$0xff]  ;;  %s363_s16 = sadd.s32 %s4157_s15, %s4156_s14 }
  0x1c   : > { %v5037_v8 = vld [vmem:[%s5016_s19 + $0x48] sm:$0xff]  ;;  %v5040_v9 = vld [vmem:[%s5016_s19 + $0x10] sm:$0x3]  ;;  %v439_v10 = vrot.slane %v5031_v6, 1  ;;  %v440_v11 = vrot.slane %v5034_v7, 1  ;;  %v5059_v18 = vld [vmem:[%s5016_s19 + $0x18] sm:$0xff] }
  0x1d   : > { %v454_v13 = vrot.slane %v5037_v8, 1  ;;  %v5049_v14 = vsel %vm438_vm0, %v449_v3, %v450_v4  ;;  %v5052_v15 = vsel %vm438_vm0, %v450_v4, %v452_v5  ;;  %v442_v16 = vrot.slane %v5040_v9, 1  ;;  %v5056_v17 = vld [vmem:[%s5016_s19 + $0x58] sm:$0x3]  ;;  %v5062_v19 = vld [vmem:[%s5016_s19 + $0x20] sm:$0xff]  ;;  %v5100_v37 = vld [vmem:[%s5016_s19 + $0x68] sm:$0xff] }
  0x1e   : > { %8307 = vst [vmem:[#allocation2_spill] sm:$0xff] %v5049_v14  ;;  %8308 = vst [vmem:[#allocation3_spill] sm:$0xff] %v5052_v15  ;;  %v5066_v20 = vpack.i.bf16 %v5052_v15, %v5049_v14  ;;  %v441_v21 = vsel %vm438_vm0, %v439_v10, %v440_v11  ;;  %v455_v22 = vrot.slane %v5045_v12, 1  ;;  %v457_v23 = vrot.slane %v5056_v17, 1  ;;  %v5072_v24 = vld [vmem:[%s5016_s19 + $0x28] sm:$0x3] }
  0x1f   : > { %v5075_v25 = vld [vmem:[%s5016_s19 + $0x78] sm:$0xff]  ;;  %v5078_v26 = vld [vmem:[%s5016_s19 + $0x80] sm:$0xff]  ;;  %v443_v27 = vsel %vm438_vm0, %v440_v11, %v442_v16  ;;  %v444_v28 = vrot.slane %v5059_v18, 1  ;;  %v445_v29 = vrot.slane %v5062_v19, 1  ;;  %v447_v30 = vrot.slane %v5072_v24, 1  ;;  %v5106_v39 = vld [vmem:[%s5016_s19 + $0xa8] sm:$0xff] }
  0x20   : > { %v5085_v31 = vld [vmem:[%s5016_s19 + $0x88] sm:$0x3]  ;;  %v5088_v32 = vld [vmem:[%s5016_s19 + $0x60] sm:$0xff]  ;;  %4223 = vrot.lane.b32.xlu1 %v5066_v20, %s4912_s20  ;;  %v4212_v33 = vpack.i.bf16 %v443_v27, %v441_v21  ;;  %v5093_v34 = vsel %vm438_vm0, %v454_v13, %v455_v22  ;;  %v5096_v35 = vsel %vm438_vm0, %v455_v22, %v457_v23  ;;  %v464_v36 = vrot.slane %v5075_v25, 1  ;;  %v5103_v38 = vld [vmem:[%s5016_s19 + $0x70] sm:$0x3] }
  0x21   : > { %8309 = vst [vmem:[#allocation4_spill] sm:$0xff] %v5093_v34  ;;  %8310 = vst [vmem:[#allocation5_spill] sm:$0xff] %v5096_v35  ;;  %v5110_v40 = vpack.i.bf16 %v5096_v35, %v5093_v34  ;;  %v5113_v41 = vsel %vm438_vm0, %v444_v28, %v445_v29  ;;  %v5116_v42 = vsel %vm438_vm0, %v445_v29, %v447_v30  ;;  %v465_v43 = vrot.slane %v5078_v26, 1  ;;  %v5120_v44 = vld [vmem:[%s5016_s19 + $0xb0] sm:$0xff]  ;;  %v5123_v45 = vld [vmem:[%s5016_s19 + $0xb8] sm:$0x3] }
  0x22   : > { %8311 = vst [vmem:[#allocation6_spill] sm:$0xff] %v5113_v41  ;;  %8312 = vst [vmem:[#allocation7_spill] sm:$0xff] %v5116_v42  ;;  %v5126_v46 = vld [vmem:[%s5016_s19 + $0x90] sm:$0xff]  ;;  %4213 = vrot.lane.b32.xlu0 %v4212_v33, %s4912_s20  ;;  %v5131_v47 = vpack.i.bf16 %v5116_v42, %v5113_v41  ;;  %v467_v48 = vrot.slane %v5085_v31, 1  ;;  %v459_v49 = vrot.slane %v5088_v32, 1  ;;  %v460_v50 = vrot.slane %v5100_v37, 1 }
  0x23   : > { %v5137_v51 = vld [vmem:[%s5016_s19 + $0x98] sm:$0xff]  ;;  %v5140_v52 = vsel %vm438_vm0, %v464_v36, %v465_v43  ;;  %v462_v53 = vrot.slane %v5103_v38, 1  ;;  %v474_v54 = vrot.slane %v5106_v39, 1  ;;  %v475_v55 = vrot.slane %v5120_v44, 1  ;;  %v5146_v56 = vld [vmem:[%s5016_s19 + $0xa0] sm:$0x3] }
  0x24   : > { %8313 = vst [vmem:[#allocation8_spill] sm:$0xff] %v5140_v52  ;;  %4228 = vrot.lane.b32.xlu1 %v5110_v40, %s4912_s20  ;;  %v5151_v57 = vsel %vm438_vm0, %v465_v43, %v467_v48  ;;  %v5154_v58 = vsel %vm438_vm0, %v459_v49, %v460_v50  ;;  %v477_v59 = vrot.slane %v5123_v45, 1  ;;  %v469_v60 = vrot.slane %v5126_v46, 1  ;;  %s4032_s17 = sshll.u32 %s363_s16, 3  ;;  %s4923_s16 = smov 12  }
  0x25   : > { %8314 = vst [vmem:[#allocation9_spill] sm:$0xff] %v5151_v57  ;;  %8315 = vst [vmem:[#allocation10_spill] sm:$0xff] %v5154_v58  ;;  %v5160_v61 = vpack.i.bf16 %v5151_v57, %v5140_v52  ;;  %v5163_v62 = vsel %vm438_vm0, %v460_v50, %v462_v53  ;;  %v5166_v63 = vsel %vm438_vm0, %v474_v54, %v475_v55  ;;  %v470_v3 = vrot.slane %v5137_v51, 1  ;;  %s5381_s26 = scalar_lea.vmem %s8171_s1, %s4032_s17  ;;  %s4924_s17 = smov 20  }
  0x26   : > { %8316 = vst [vmem:[#allocation11_spill] sm:$0xff] %v5163_v62  ;;  %8317 = vst [vmem:[#allocation12_spill] sm:$0xff] %v5166_v63  ;;  %4218 = vrot.lane.b32.xlu0 %v5131_v47, %s4912_s20  ;;  %v5173_v4 = vpack.i.bf16 %v5163_v62, %v5154_v58  ;;  %v5176_v5 = vsel %vm438_vm0, %v475_v55, %v477_v59  ;;  %v472_v10 = vrot.slane %v5146_v56, 1  ;;  %v533_v11 = vrot.slane %v5059_v18, 2  ;;  %v1375_v52 = vld [vmem:[%s5381_s26 + $0xd8] sm:$0xff]  ;;  %v1376_v35 = vld [vmem:[%s5381_s26 + $0xe0] sm:$0xff] }
  0x27   : > { %8318 = vst [vmem:[#allocation13_spill] sm:$0xff] %v5176_v5  ;;  %v531_v13 = vrot.slane %v5040_v9, 2  ;;  %v5182_v16 = vsel %vm438_vm0, %v469_v60, %v470_v3  ;;  %v534_v21 = vrot.slane %v5062_v19, 2  ;;  %v536_v22 = vrot.slane %v5072_v24, 2  ;;  %s5902_s15 = scalar_select %p2906_p7, 1, 0 }
  0x28   : > { %8319 = vst [vmem:[#allocation14_spill] sm:$0xff] %v5182_v16  ;;  %4238 = vrot.lane.b32.xlu1 %v5160_v61, %s4912_s20  ;;  %v5190_v23 = vpack.i.bf16 %v5176_v5, %v5166_v63  ;;  %v5193_v27 = vsel %vm438_vm0, %v470_v3, %v472_v10  ;;  %v528_v28 = vrot.slane %v5031_v6, 2  ;;  %v529_v9 = vrot.slane %v5034_v7, 2  ;;  %v1372_v63 = vld [vmem:[%s5381_s26 + $0xc0] sm:$0xff]  ;;  %s7008_s14 = scalar_select %p350_p6, 1, 0 }
  0x29   : > { %8320 = vst [vmem:[#allocation15_spill] sm:$0xff] %v5193_v27  ;;  %v535_v29 = vsel %vm527_vm1, %v533_v11, %v534_v21  ;;  %v537_v30 = vsel %vm527_vm1, %v534_v21, %v536_v22  ;;  %v543_v24 = vrot.slane %v5037_v8, 2  ;;  %v544_v33 = vrot.slane %v5045_v12, 2 }
  0x2a   : > { %4233 = vrot.lane.b32.xlu0 %v5173_v4, %s4912_s20  ;;  %v5205_v36 = vpack.i.bf16 %v5193_v27, %v5182_v16  ;;  %v546_v43 = vrot.slane %v5056_v17, 2  ;;  %v530_v48 = vsel %vm527_vm1, %v528_v28, %v529_v9  ;;  %v532_v49 = vsel %vm527_vm1, %v529_v9, %v531_v13  ;;  %v1373_v16 = vld [vmem:[%s5381_s26 + $0xc8] sm:$0xff] }
  0x2b   : > { %v538_v50 = vrot.slane %v5019_v0, 2  ;;  %v539_v53 = vrot.slane %v5022_v1, 2  ;;  %v5214_v54 = vpack.i.bf16 %v537_v30, %v535_v29  ;;  %v541_v55 = vrot.slane %v5025_v2, 2 }
  0x2c   : > { %4248 = vrot.lane.b32.xlu1 %v5190_v23, %s4912_s20  ;;  %v553_v59 = vrot.slane %v5075_v25, 2  ;;  %v554_v60 = vrot.slane %v5078_v26, 2  ;;  %v545_v17 = vsel %vm527_vm1, %v543_v24, %v544_v33  ;;  %v547_v3 = vsel %vm527_vm1, %v544_v33, %v546_v43 }
  0x2d   : > { %v556_v10 = vrot.slane %v5085_v31, 2  ;;  %v4252_v11 = vpack.i.bf16 %v532_v49, %v530_v48  ;;  %v548_v13 = vrot.slane %v5088_v32, 2  ;;  %v549_v21 = vrot.slane %v5100_v37, 2 }
  0x2e   : > { %4243 = vrot.lane.b32.xlu0 %v5205_v36, %s4912_s20  ;;  %v540_v2 = vsel %vm527_vm1, %v538_v50, %v539_v53  ;;  %v542_v22 = vsel %vm527_vm1, %v539_v53, %v541_v55  ;;  %v551_v28 = vrot.slane %v5103_v38, 2  ;;  %v5231_v9 = vpack.i.bf16 %v547_v3, %v545_v17 }
  0x2f   : > { %v555_v31 = vsel %vm527_vm1, %v553_v59, %v554_v60  ;;  %v557_v29 = vsel %vm527_vm1, %v554_v60, %v556_v10  ;;  %v563_v30 = vrot.slane %v5106_v39, 2  ;;  %v564_v24 = vrot.slane %v5120_v44, 2 }
  0x30   : > { %4258 = vrot.lane.b32.xlu1 %v5214_v54, %s4913_s21  ;;  %v566_v33 = vrot.slane %v5123_v45, 2  ;;  %v5239_v43 = vpack.i.bf16 %v542_v22, %v540_v2  ;;  %v550_v38 = vsel %vm527_vm1, %v548_v13, %v549_v21  ;;  %v552_v48 = vsel %vm527_vm1, %v549_v21, %v551_v28 }
  0x31   : > { %v558_v49 = vrot.slane %v5126_v46, 2  ;;  %v559_v50 = vrot.slane %v5137_v51, 2  ;;  %v561_v53 = vrot.slane %v5146_v56, 2  ;;  %v5248_v55 = vpack.i.bf16 %v557_v29, %v555_v31  ;;  %v399_v31 = vld [vmem:[%s5016_s19 + $0xc0] sm:$0xff]  ;;  %v400_v29 = vld [vmem:[%s5016_s19 + $0xc8] sm:$0xff] }
  0x32   : > { %4253 = vrot.lane.b32.xlu0 %v4252_v11, %s4913_s21  ;;  %v565_v45 = vsel %vm527_vm1, %v563_v30, %v564_v24  ;;  %v567_v59 = vsel %vm527_vm1, %v564_v24, %v566_v33  ;;  %v5254_v60 = vpack.i.bf16 %v552_v48, %v550_v38  ;;  %v4297_v11 = vpack.i.bf16 %v5022_v1, %v5019_v0  ;;  %v401_v38 = vld [vmem:[%s5016_s19 + $0xd0] sm:$0x3] }
  0x33   : > { %v560_v17 = vsel %vm527_vm1, %v558_v49, %v559_v50  ;;  %v562_v3 = vsel %vm527_vm1, %v559_v50, %v561_v53  ;;  %v5260_v56 = vpack.i.bf16 %v567_v59, %v565_v45  ;;  %v4292_v13 = vpack.i.bf16 %v5062_v19, %v5059_v18 }
  0x34   : > { %4268 = vrot.lane.b32.xlu1 %v5231_v9, %s4913_s21  ;;  %v5264_v10 = vpack.i.bf16 %v562_v3, %v560_v17  ;;  %v4307_v21 = vpack.i.bf16 %v5100_v37, %v5088_v32  ;;  %v4302_v2 = vpack.i.bf16 %v5045_v12, %v5037_v8  ;;  %v4317_v22 = vpack.i.bf16 %v5137_v51, %v5126_v46 }
  0x35   : > { %v4915_v28 = vmov 0   ;;  %v4312_v30 = vpack.i.bf16 %v5078_v26, %v5075_v25  ;;  %v4327_v24 = vpack.i.bf16 %v400_v29, %v399_v31  ;;  %v4322_v33 = vpack.i.bf16 %v5120_v44, %v5106_v39 }
  0x36   : > { %4263 = vrot.lane.b32.xlu0 %v5239_v43, %s4913_s21  ;;  %4532 = vset.pattern.permute.xlu1 %v4915_v28  ;;  %v668_v48 = vrot.slane %v400_v29, 1  ;;  %v667_v49 = vrot.slane %v399_v31, 1  ;;  %v670_v50 = vrot.slane %v401_v38, 1  ;;  %v721_v17 = vrot.slane %v400_v29, 2  ;;  %v4854_v29 = vld [vmem:[%s8172_s2] sm:$0xff]  }
  0x37   : > { %4533 = vset.pattern.permute.xlu0 %v4915_v28  ;;  %v723_v3 = vrot.slane %v401_v38, 2  ;;  %4104 = vmatprep.subr.bf16.mxu0 %v4854_v29 }
  0x38   : > { %4278 = vrot.lane.b32.xlu1 %v5248_v55, %s4913_s21  ;;  %v5302_v53 = vsel %vm438_vm0, %v667_v49, %v668_v48  ;;  %v5305_v45 = vsel %vm438_vm0, %v668_v48, %v670_v50  ;;  %4105 = vmatpush3.bf16.msra.mxu0 %v4854_v29  ;;  %v4855_v49 = vld [vmem:[%s8172_s2 + $0x8] sm:$0xff]  }
  0x39   : > { %8321 = vst [vmem:[#allocation16_spill] sm:$0xff] %v5302_v53  ;;  %8322 = vst [vmem:[#allocation17_spill] sm:$0xff] %v5305_v45  ;;  %v4367_v59 = vpack.i.bf16 %v5305_v45, %v5302_v53  ;;  %v724_v28 = vsel %vm527_vm1, %v721_v17, %v723_v3  ;;  %4106 = vmatprep.subr.bf16.mxu0 %v4855_v49  ;;  %v1370_v53 = vld [vmem:[%s5381_s26 + $0xb0] sm:$0xff] }
  0x3a   : > { %4273 = vrot.lane.b32.xlu0 %v5254_v60, %s4913_s21 }
  0x3c   : > { %4288 = vrot.lane.b32.xlu1 %v5260_v56, %s4913_s21  ;;  %4107 = vmatpush3.bf16.msra.mxu0 %v4855_v49 }
  0x3e   : > { %4283 = vrot.lane.b32.xlu0 %v5264_v10, %s4913_s21 }
  0x40   : > { %4298 = vrot.lane.b32.xlu1 %v4297_v11, %s4914_s22 }
  0x42   : > { %4293 = vrot.lane.b32.xlu0 %v4292_v13, %s4914_s22 }
  0x44   : > { %4308 = vrot.lane.b32.xlu1 %v4307_v21, %s4914_s22 }
  0x46   : > { %4303 = vrot.lane.b32.xlu0 %v4302_v2, %s4914_s22 }
  0x48   : > { %4318 = vrot.lane.b32.xlu1 %v4317_v22, %s4914_s22 }
  0x4a   : > { %4313 = vrot.lane.b32.xlu0 %v4312_v30, %s4914_s22 }
  0x4c   : > { %4328 = vrot.lane.b32.xlu1 %v4327_v24, %s4914_s22 }
  0x4e   : > { %4323 = vrot.lane.b32.xlu0 %v4322_v33, %s4914_s22 }
  0x50   : > { %4338 = vrot.lane.b32.xlu1 %v5066_v20, %s4916_s23 }
  0x52   : > { %4333 = vrot.lane.b32.xlu0 %v5131_v47, %s4916_s23  ;;  %v720_v47 = vrot.slane %v399_v31, 2  ;;  %v403_v31 = vld [vmem:[%s5016_s19 + $0xe0] sm:$0xff] }
  0x54   : > { %4348 = vrot.lane.b32.xlu1 %v5173_v4, %s4916_s23  ;;  %v722_v13 = vsel %vm527_vm1, %v720_v47, %v721_v17 }
  0x55   : > { %v5325_v48 = vpack.i.bf16 %v724_v28, %v722_v13 }
  0x56   : > { %4343 = vrot.lane.b32.xlu0 %v5110_v40, %s4916_s23 }
  0x58   : > { %4358 = vrot.lane.b32.xlu1 %v5205_v36, %s4916_s23 }
  0x5a   : > { %4353 = vrot.lane.b32.xlu0 %v5160_v61, %s4916_s23 }
  0x5c   : > { %4368 = vrot.lane.b32.xlu1 %v4367_v59, %s4916_s23 }
  0x5e   : > { %4363 = vrot.lane.b32.xlu0 %v5190_v23, %s4916_s23 }
  0x60   : > { %4378 = vrot.lane.b32.xlu1 %v5239_v43, %s4917_s24 }
  0x62   : > { %4373 = vrot.lane.b32.xlu0 %v5214_v54, %s4917_s24  ;;  %v402_v54 = vld [vmem:[%s5016_s19 + $0xd8] sm:$0xff] }
  0x63   : > { %v4447_v38 = vpack.i.bf16 %v403_v31, %v402_v54  ;;  %v877_v17 = vrot.slane %v402_v54, 2 }
  0x64   : > { %4388 = vrot.lane.b32.xlu1 %v5254_v60, %s4917_s24 }
  0x66   : > { %4383 = vrot.lane.b32.xlu0 %v5231_v9, %s4917_s24 }
  0x68   : > { %4398 = vrot.lane.b32.xlu1 %v5264_v10, %s4917_s24 }
  0x6a   : > { %4393 = vrot.lane.b32.xlu0 %v5248_v55, %s4917_s24 }
  0x6c   : > { %4408 = vrot.lane.b32.xlu1 %v5325_v48, %s4917_s24 }
  0x6e   : > { %4403 = vrot.lane.b32.xlu0 %v5260_v56, %s4917_s24 }
  0x70   : > { %4418 = vrot.lane.b32.xlu1 %v4302_v2, %s4918_s25  ;;  %v404_v2 = vld [vmem:[%s5016_s19 + $0xe8] sm:$0x3]  ;;  %s8303_s19 = smov 124  }
  0x71   : > { %v880_v3 = vrot.slane %v404_v2, 2 }
  0x72   : > { %4413 = vrot.lane.b32.xlu0 %v4297_v11, %s4918_s25  ;;  %v4856_v11 = vld [vmem:[%s8172_s2 + $0x10] sm:$0xff]  }
  0x73   : > { %4108 = vmatprep.subr.bf16.mxu0 %v4856_v11 }
  0x74   : > { %4428 = vrot.lane.b32.xlu1 %v4312_v30, %s4918_s25  ;;  %4109 = vmatpush3.bf16.msra.mxu0 %v4856_v11  ;;  %v824_v30 = vrot.slane %v402_v54, 1  ;;  %v1351_v11 = vld [vmem:[%s5381_s26 + $0x18] sm:$0xff] }
  0x76   : > { %4423 = vrot.lane.b32.xlu0 %v4307_v21, %s4918_s25  ;;  %v825_v21 = vrot.slane %v403_v31, 1 }
  0x78   : > { %4438 = vrot.lane.b32.xlu1 %v4322_v33, %s4918_s25  ;;  %v827_v33 = vrot.slane %v404_v2, 1 }
  0x7a   : > { %4433 = vrot.lane.b32.xlu0 %v4317_v22, %s4918_s25  ;;  %v4857_v22 = vld [vmem:[%s8172_s2 + $0x18] sm:$0xff]   ;;  %v828_v50 = vsel %vm438_vm0, %v825_v21, %v827_v33  ;;  %v1353_v33 = vld [vmem:[%s5381_s26 + $0x28] sm:$0xf] }
  0x7b   : > { %4110 = vmatprep.subr.bf16.mxu0 %v4857_v22 }
  0x7c   : > { %4448 = vrot.lane.b32.xlu1 %v4447_v38, %s4918_s25  ;;  %4111 = vmatpush3.bf16.msra.mxu0 %v4857_v22  ;;  %v1349_v38 = vld [vmem:[%s5381_s26 + $0x8] sm:$0xff] }
  0x7e   : > { %4443 = vrot.lane.b32.xlu0 %v4327_v24, %s4918_s25  ;;  %v826_v24 = vsel %vm438_vm0, %v824_v30, %v825_v21  ;;  %v1352_v21 = vld [vmem:[%s5381_s26 + $0x20] sm:$0xff] }
  0x80   : > { %4458 = vrot.lane.b32.xlu1 %v5110_v40, %s4919_s18  ;;  %v4858_v40 = vld [vmem:[%s8172_s2 + $0x20] ss:$0 sps:$4 sm:$0xff]  }
  0x81   : > { %4152 = vmatprep.subr.msk.bf16.mxu0 %vm1227_vm2, %v4858_v40  ;;  %v1229_v47 = vsel %vm1227_vm2, %v4858_v40, 0  ;;  %v1355_v40 = vld [vmem:[%s5381_s26 + $0x38] sm:$0xff] }
  0x82   : > { %4453 = vrot.lane.b32.xlu0 %v5066_v20, %s4919_s18  ;;  %v4487_v20 = vpack.i.bf16 %v828_v50, %v826_v24  ;;  %4113 = vmatpush3.bf16.msra.mxu0 %v1229_v47  ;;  %v1354_v24 = vld [vmem:[%s5381_s26 + $0x30] sm:$0xff] }
  0x84   : > { %4468 = vrot.lane.b32.xlu1 %v5160_v61, %s4919_s18  ;;  %v878_v61 = vrot.slane %v403_v31, 2 }
  0x86   : > { %4463 = vrot.lane.b32.xlu0 %v5173_v4, %s4919_s18 }
  0x88   : > { %4478 = vrot.lane.b32.xlu1 %v5190_v23, %s4919_s18  ;;  %v879_v23 = vsel %vm527_vm1, %v877_v17, %v878_v61  ;;  %v1357_v17 = vld [vmem:[%s5381_s26 + $0x48] sm:$0xff] }
  0x8a   : > { %4473 = vrot.lane.b32.xlu0 %v5205_v36, %s4919_s18  ;;  %v881_v36 = vsel %vm527_vm1, %v878_v61, %v880_v3 }
  0x8c   : > { %4488 = vrot.lane.b32.xlu1 %v4487_v20, %s4919_s18  ;;  %v1356_v20 = vld [vmem:[%s5381_s26 + $0x40] sm:$0xf] }
  0x8e   : > { %4483 = vrot.lane.b32.xlu0 %v4367_v59, %s4919_s18  ;;  %s4925_s18 = smov 28  }
  0x90   : > { %4498 = vrot.lane.b32.xlu1 %v5231_v9, %s4920_s13 }
  0x92   : > { %4493 = vrot.lane.b32.xlu0 %v5239_v43, %s4920_s13  ;;  %v5358_v4 = vpop.permute.xlu1 %4223  ;;  %v4527_v43 = vpack.i.bf16 %v881_v36, %v879_v23  ;;  %v1358_v23 = vld [vmem:[%s5381_s26 + $0x50] sm:$0xff] }
  0x94   : > { %v5362_v13 = vpop.permute.xlu0 %4213  ;;  %4508 = vrot.lane.b32.xlu1 %v5248_v55, %s4920_s13 }
  0x95   : > { %v4216_v62 = vunpack.i.h.bf16 %v5362_v13  ;;  %v4215_v58 = vunpack.i.l.bf16 %v5362_v13 }
  0x96   : > { %4503 = vrot.lane.b32.xlu0 %v5254_v60, %s4920_s13  ;;  %v5368_v9 = vpop.permute.xlu1 %4228 }
  0x97   : > { %v4230_v34 = vunpack.i.l.bf16 %v5368_v9 }
  0x98   : > { %v5370_v59 = vpop.permute.xlu0 %4218  ;;  %4518 = vrot.lane.b32.xlu1 %v5260_v56, %s4920_s13 }
  0x99   : > { %v4220_v15 = vunpack.i.l.bf16 %v5370_v59 }
  0x9a   : > { %4513 = vrot.lane.b32.xlu0 %v5264_v10, %s4920_s13  ;;  %v5374_v28 = vpop.permute.xlu1 %4238  ;;  %v1348_v10 = vld [vmem:[%s5381_s26] sm:$0xff] }
  0x9b   : > { %v4240_v13 = vunpack.i.l.bf16 %v5374_v28 }
  0x9c   : > { %v5376_v55 = vpop.permute.xlu0 %4233  ;;  %4528 = vrot.lane.b32.xlu1 %v4527_v43, %s4920_s13  ;;  %v1359_v43 = vld [vmem:[%s5381_s26 + $0x58] sm:$0xf] }
  0x9e   : > { %4523 = vrot.lane.b32.xlu0 %v5325_v48, %s4920_s13  ;;  %v5384_v60 = vpop.permute.xlu1 %4248  ;;  %v1350_v48 = vld [vmem:[%s5381_s26 + $0x10] sm:$0xf] }
  0xa0   : > { %v5386_v56 = vpop.permute.xlu0 %4243  ;;  %1092 = vrot.lane.b32.xlu1 %v5116_v42, %s8303_s19  ;;  %v1368_v42 = vld [vmem:[%s5381_s26 + $0xa0] sm:$0xf] }
  0xa2   : > { %1090 = vrot.lane.b32.xlu0 %v5113_v41, %s8303_s19  ;;  %v5393_v54 = vpop.permute.xlu1 %4258 }
  0xa4   : > { %v5395_v31 = vpop.permute.xlu0 %4253  ;;  %1387 = vperm.xlu1 %4532, %v1348_v10  }
  0xa6   : > { %1094 = vrot.lane.b32.xlu0 %v5049_v14, %s8303_s19  ;;  %v5400_v29 = vpop.permute.xlu1 %4268  ;;  %v1366_v14 = vld [vmem:[%s5381_s26 + $0x90] sm:$0xff] }
  0xa8   : > { %v5403_v49 = vpop.permute.xlu0 %4263  ;;  %1397 = vperm.xlu1 %4532, %v1350_v48   ;;  %v1360_v48 = vld [vmem:[%s5381_s26 + $0x60] sm:$0xff] }
  0xaa   : > { %1392 = vperm.xlu0 %4533, %v1349_v38   ;;  %v5406_v2 = vpop.permute.xlu1 %4278 }
  0xac   : > { %v5409_v30 = vpop.permute.xlu0 %4273  ;;  %1402 = vperm.xlu1 %4532, %v1351_v11   ;;  %v1361_v11 = vld [vmem:[%s5381_s26 + $0x68] sm:$0xff] }
  0xae   : > { %1407 = vperm.xlu0 %4533, %v1352_v21   ;;  %v5412_v22 = vpop.permute.xlu1 %4288 }
  0xb0   : > { %v5415_v50 = vpop.permute.xlu0 %4283  ;;  %1412 = vperm.xlu1 %4532, %v1353_v33   ;;  %v1362_v33 = vld [vmem:[%s5381_s26 + $0x70] sm:$0xf] }
  0xb2   : > { %1417 = vperm.xlu0 %4533, %v1354_v24   ;;  %v5418_v47 = vpop.permute.xlu1 %4298 }
  0xb4   : > { %v5421_v61 = vpop.permute.xlu0 %4293  ;;  %1422 = vperm.xlu1 %4532, %v1355_v40   ;;  %v1363_v40 = vld [vmem:[%s5381_s26 + $0x78] sm:$0xff] }
  0xb6   : > { %1427 = vperm.xlu0 %4533, %v1356_v20   ;;  %v5424_v3 = vpop.permute.xlu1 %4308 }
  0xb8   : > { %v5427_v36 = vpop.permute.xlu0 %4303  ;;  %1432 = vperm.xlu1 %4532, %v1357_v17   ;;  %v1364_v17 = vld [vmem:[%s5381_s26 + $0x80] sm:$0xff] }
  0xba   : > { %1437 = vperm.xlu0 %4533, %v1358_v23   ;;  %v5430_v10 = vpop.permute.xlu1 %4318 }
  0xbc   : > { %v5433_v38 = vpop.permute.xlu0 %4313  ;;  %1442 = vperm.xlu1 %4532, %v1359_v43   ;;  %v1365_v43 = vld [vmem:[%s5381_s26 + $0x88] sm:$0xf] }
  0xbe   : > { %1447 = vperm.xlu0 %4533, %v1360_v48   ;;  %v5436_v21 = vpop.permute.xlu1 %4328 }
  0xc0   : > { %v5439_v24 = vpop.permute.xlu0 %4323  ;;  %1452 = vperm.xlu1 %4532, %v1361_v11   ;;  %v1367_v11 = vld [vmem:[%s5381_s26 + $0x98] sm:$0xff] }
  0xc2   : > { %1457 = vperm.xlu0 %4533, %v1362_v33   ;;  %v5442_v20 = vpop.permute.xlu1 %4338 }
  0xc4   : > { %v5445_v23 = vpop.permute.xlu0 %4333  ;;  %1462 = vperm.xlu1 %4532, %v1363_v40   ;;  %v1369_v40 = vld [vmem:[%s5381_s26 + $0xa8] sm:$0xff] }
  0xc6   : > { %1467 = vperm.xlu0 %4533, %v1364_v17   ;;  %v5448_v48 = vpop.permute.xlu1 %4348 }
  0xc8   : > { %v5451_v41 = vpop.permute.xlu0 %4343  ;;  %1472 = vperm.xlu1 %4532, %v1365_v43   ;;  %v1371_v43 = vld [vmem:[%s5381_s26 + $0xb8] sm:$0xf] }
  0xca   : > { %1477 = vperm.xlu0 %4533, %v1366_v14   ;;  %v5454_v33 = vpop.permute.xlu1 %4358 }
  0xcc   : > { %v5457_v45 = vpop.permute.xlu0 %4353  ;;  %1482 = vperm.xlu1 %4532, %v1367_v11  }
  0xce   : > { %1487 = vperm.xlu0 %4533, %v1368_v42   ;;  %v5460_v17 = vpop.permute.xlu1 %4368  ;;  %v1374_v42 = vld [vmem:[%s5381_s26 + $0xd0] sm:$0xf] }
  0xcf   : > { %8323 = vst [vmem:[#allocation18_spill] sm:$0xff] %v5460_v17 }
  0xd0   : > { %v5463_v5 = vpop.permute.xlu0 %4363  ;;  %1492 = vperm.xlu1 %4532, %v1369_v40   ;;  %v4226_v40 = vunpack.i.h.bf16 %v5358_v4 }
  0xd2   : > { %1497 = vperm.xlu0 %4533, %v1370_v53   ;;  %v5466_v14 = vpop.permute.xlu1 %4378  ;;  %v4225_v53 = vunpack.i.l.bf16 %v5358_v4  ;;  %v4241_v4 = vunpack.i.h.bf16 %v5374_v28 }
  0xd4   : > { %v5469_v27 = vpop.permute.xlu0 %4373  ;;  %1502 = vperm.xlu1 %4532, %v1371_v43  }
  0xd6   : > { %1507 = vperm.xlu0 %4533, %v1372_v63   ;;  %v5472_v11 = vpop.permute.xlu1 %4388  ;;  %v4231_v63 = vunpack.i.h.bf16 %v5368_v9  ;;  %v936_v9 = vsel %vm930_vm3, %v5022_v1, %v4226_v40  ;;  %v1378_v40 = vld [vmem:[%s5381_s26 + $0xf0] sm:$0xff] }
  0xd7   : > { %8324 = vst [vmem:[#allocation19_spill] sm:$0xff] %v5472_v11  ;;  %v937_v11 = vsel %vm930_vm3, %v5037_v8, %v4230_v34  ;;  %v941_v8 = vsel %vm930_vm3, %v5075_v25, %v4240_v13  ;;  %v4246_v34 = vunpack.i.h.bf16 %v5386_v56 }
  0xd8   : > { %v5475_v57 = vpop.permute.xlu0 %4383  ;;  %1512 = vperm.xlu1 %4532, %v1373_v16   ;;  %v4221_v16 = vunpack.i.h.bf16 %v5370_v59  ;;  %v932_v59 = vsel %vm930_vm3, %v5034_v7, %v4216_v62  ;;  %v938_v28 = vsel %vm930_vm3, %v5045_v12, %v4231_v63  ;;  %v933_v7 = vsel %vm930_vm3, %v5059_v18, %v4220_v15  ;;  %v1379_v18 = vld [vmem:[%s5381_s26 + $0xf8] sm:$0xff]  ;;  %v1380_v63 = vld [vmem:[%s5381_s26 + $0x100] sm:$0xf] }
  0xd9   : > { %8325 = vst [vmem:[#allocation20_spill] sm:$0xff] %v5475_v57  ;;  %v935_v57 = vsel %vm930_vm3, %v5019_v0, %v4225_v53  ;;  %v4235_v0 = vunpack.i.l.bf16 %v5376_v55  ;;  %v4245_v15 = vunpack.i.l.bf16 %v5386_v56  ;;  %v4260_v62 = vunpack.i.l.bf16 %v5393_v54 }
  0xda   : > { %1517 = vperm.xlu0 %4533, %v1374_v42   ;;  %v5482_v43 = vpop.permute.xlu1 %4398  ;;  %v4236_v42 = vunpack.i.h.bf16 %v5376_v55  ;;  %v934_v1 = vsel %vm930_vm3, %v5062_v19, %v4221_v16  ;;  %v4256_v55 = vunpack.i.h.bf16 %v5395_v31  ;;  %v4270_v56 = vunpack.i.l.bf16 %v5400_v29 }
  0xdb   : > { %8326 = vst [vmem:[#allocation21_spill] sm:$0xff] %v5482_v43  ;;  %v1377_v43 = vld [vmem:[%s5381_s26 + $0xe8] sm:$0xf]  ;;  %v939_v25 = vsel %vm930_vm3, %v5088_v32, %v4235_v0  ;;  %v4265_v16 = vunpack.i.l.bf16 %v5403_v49  ;;  %v943_v13 = vsel %vm930_vm3, %v5126_v46, %v4245_v15  ;;  %v1382_v15 = vld [vmem:[%s5381_s26 + $0x110] sm:$0xff] }
  0xdc   : > { %v5490_v17 = vpop.permute.xlu0 %4393  ;;  %1522 = vperm.xlu1 %4532, %v1375_v52   ;;  %v940_v19 = vsel %vm930_vm3, %v5100_v37, %v4236_v42  ;;  %v4271_v37 = vunpack.i.h.bf16 %v5400_v29  ;;  %v944_v29 = vsel %vm930_vm3, %v5137_v51, %v4246_v34  ;;  %v4280_v42 = vunpack.i.l.bf16 %v5406_v2  ;;  %v1381_v0 = vld [vmem:[%s5381_s26 + $0x108] sm:$0xff] }
  0xdd   : > { %8327 = vst [vmem:[#allocation22_spill] sm:$0xff] %v5490_v17  ;;  %v931_v17 = vsel %vm930_vm3, %v5031_v6, %v4215_v58  ;;  %v942_v6 = vsel %vm930_vm3, %v5078_v26, %v4241_v4  ;;  %v4250_v58 = vunpack.i.l.bf16 %v5384_v60  ;;  %v4261_v26 = vunpack.i.h.bf16 %v5393_v54 }
  0xde   : > { %1527 = vperm.xlu0 %4533, %v1376_v35   ;;  %v5503_v52 = vpop.permute.xlu1 %4408  ;;  %v4251_v35 = vunpack.i.h.bf16 %v5384_v60  ;;  %v4255_v60 = vunpack.i.l.bf16 %v5395_v31  ;;  %v4281_v4 = vunpack.i.h.bf16 %v5406_v2  ;;  %v955_v51 = vsel %vm947_vm4, %v938_v28, %v4271_v37 }
  0xdf   : > { %v945_v31 = vsel %vm930_vm3, %v5106_v39, %v4250_v58  ;;  %v950_v39 = vsel %vm947_vm4, %v933_v7, %v4260_v62  ;;  %v954_v46 = vsel %vm947_vm4, %v937_v11, %v4270_v56  ;;  %v4276_v34 = vunpack.i.h.bf16 %v5409_v30 }
  0xe0   : > { %v5519_v12 = vpop.permute.xlu0 %4403  ;;  %1532 = vperm.xlu1 %4532, %v1377_v43   ;;  %v4266_v43 = vunpack.i.h.bf16 %v5403_v49  ;;  %v946_v54 = vsel %vm930_vm3, %v5120_v44, %v4251_v35  ;;  %v4275_v44 = vunpack.i.l.bf16 %v5409_v30  ;;  %v951_v49 = vsel %vm947_vm4, %v934_v1, %v4261_v26  ;;  %v1383_v26 = vld [vmem:[%s5381_s26 + $0x118] sm:$0xf] }
  0xe1   : > { %v949_v35 = vsel %vm947_vm4, %v932_v59, %v4256_v55  ;;  %v952_v7 = vsel %vm947_vm4, %v935_v57, %v4265_v16  ;;  %v959_v1 = vsel %vm947_vm4, %v942_v6, %v4281_v4  ;;  %v4290_v59 = vunpack.i.l.bf16 %v5412_v22 }
  0xe2   : > { %1961 = vperm.xlu0 %4533, %v1378_v40   ;;  %v5532_v53 = vpop.permute.xlu1 %4418  ;;  %v948_v40 = vsel %vm947_vm4, %v931_v17, %v4255_v60  ;;  %v953_v2 = vsel %vm947_vm4, %v936_v9, %v4266_v43  ;;  %v4291_v17 = vunpack.i.h.bf16 %v5412_v22  ;;  %v958_v28 = vsel %vm947_vm4, %v941_v8, %v4280_v42 }
  0xe3   : > { %v956_v11 = vsel %vm947_vm4, %v939_v25, %v4275_v44  ;;  %v4286_v9 = vunpack.i.h.bf16 %v5415_v50  ;;  %v4285_v30 = vunpack.i.l.bf16 %v5415_v50  ;;  %v4301_v57 = vunpack.i.h.bf16 %v5418_v47 }
  0xe4   : > { %v5546_v32 = vpop.permute.xlu0 %4413  ;;  %1966 = vperm.xlu1 %4532, %v1379_v18   ;;  %v4300_v6 = vunpack.i.l.bf16 %v5418_v47  ;;  %v4296_v62 = vunpack.i.h.bf16 %v5421_v61  ;;  %v4295_v22 = vunpack.i.l.bf16 %v5421_v61  ;;  %v957_v8 = vsel %vm947_vm4, %v940_v19, %v4276_v34 }
  0xe5   : > { %v4311_v60 = vunpack.i.h.bf16 %v5424_v3  ;;  %v4310_v25 = vunpack.i.l.bf16 %v5424_v3  ;;  %v4305_v50 = vunpack.i.l.bf16 %v5427_v36  ;;  %v5588_v37 = vsel %vm947_vm4, %v946_v54, %v4291_v17 }
  0xe6   : > { %1971 = vperm.xlu0 %4533, %v1380_v63   ;;  %v5559_v58 = vpop.permute.xlu1 %4428  ;;  %v5591_v47 = vsel %vm947_vm4, %v945_v31, %v4290_v59  ;;  %v4306_v61 = vunpack.i.h.bf16 %v5427_v36  ;;  %v4320_v56 = vunpack.i.l.bf16 %v5430_v10  ;;  %v960_v19 = vsel %vm947_vm4, %v943_v13, %v4285_v30 }
  0xe7   : > { %v961_v63 = vsel %vm947_vm4, %v944_v29, %v4286_v9  ;;  %v4321_v3 = vunpack.i.h.bf16 %v5430_v10  ;;  %v4315_v16 = vunpack.i.l.bf16 %v5433_v38  ;;  %v967_v54 = vsel %vm964_vm5, %v950_v39, %v4300_v6 }
  0xe8   : > { %v5570_v18 = vpop.permute.xlu0 %4423  ;;  %2400 = vperm.xlu1 %4532, %v1381_v0   ;;  %v968_v31 = vsel %vm964_vm5, %v951_v49, %v4301_v57  ;;  %v965_v4 = vsel %vm964_vm5, %v948_v40, %v4295_v22  ;;  %v966_v36 = vsel %vm964_vm5, %v949_v35, %v4296_v62  ;;  %v971_v44 = vsel %vm964_vm5, %v954_v46, %v4310_v25 }
  0xe9   : > { %v972_v13 = vsel %vm964_vm5, %v955_v51, %v4311_v60  ;;  %v969_v29 = vsel %vm964_vm5, %v952_v7, %v4305_v50  ;;  %v4316_v10 = vunpack.i.h.bf16 %v5433_v38  ;;  %v970_v0 = vsel %vm964_vm5, %v953_v2, %v4306_v61 }
  0xea   : > { %2405 = vperm.xlu0 %4533, %v1382_v15   ;;  %v5581_v55 = vpop.permute.xlu1 %4438  ;;  %v975_v39 = vsel %vm964_vm5, %v958_v28, %v4320_v56  ;;  %v4326_v49 = vunpack.i.h.bf16 %v5439_v24  ;;  %v4325_v40 = vunpack.i.l.bf16 %v5439_v24  ;;  %v976_v35 = vsel %vm964_vm5, %v959_v1, %v4321_v3 }
  0xeb   : > { %v973_v46 = vsel %vm964_vm5, %v956_v11, %v4315_v16  ;;  %v4341_v51 = vunpack.i.h.bf16 %v5442_v20  ;;  %v4340_v15 = vunpack.i.l.bf16 %v5442_v20  ;;  %v4336_v38 = vunpack.i.h.bf16 %v5445_v23 }
  0xec   : > { %v5595_v43 = vpop.permute.xlu0 %4433  ;;  %2410 = vperm.xlu1 %4532, %v1383_v26   ;;  %v4335_v2 = vunpack.i.l.bf16 %v5445_v23  ;;  %v4351_v7 = vunpack.i.h.bf16 %v5448_v48  ;;  %v4350_v17 = vunpack.i.l.bf16 %v5448_v48  ;;  %v974_v59 = vsel %vm964_vm5, %v957_v8, %v4316_v10 }
  0xed   : > { %v4331_v1 = vunpack.i.h.bf16 %v5436_v21  ;;  %v4346_v28 = vunpack.i.h.bf16 %v5451_v41  ;;  %v4345_v11 = vunpack.i.l.bf16 %v5451_v41  ;;  %v4330_v20 = vunpack.i.l.bf16 %v5436_v21 }
  0xee   : > { %v5605_v42 = vpop.permute.xlu1 %4448  ;;  %v977_v9 = vsel %vm964_vm5, %v960_v19, %v4325_v40  ;;  %v978_v23 = vsel %vm964_vm5, %v961_v63, %v4326_v49  ;;  %v4360_v30 = vunpack.i.l.bf16 %v5454_v33  ;;  %v984_v48 = vsel %vm981_vm6, %v967_v54, %v4340_v15  ;;  %v8330_v49 = vld [vmem:[#allocation18_spill] sm:$0xff] }
  0xef   : > { %v985_v57 = vsel %vm981_vm6, %v968_v31, %v4341_v51  ;;  %v4361_v6 = vunpack.i.h.bf16 %v5454_v33  ;;  %v4355_v62 = vunpack.i.l.bf16 %v5457_v45  ;;  %v982_v41 = vsel %vm981_vm6, %v965_v4, %v4335_v2 }
  0xf0   : > { %v5615_v34 = vpop.permute.xlu0 %4443  ;;  %v983_v22 = vsel %vm981_vm6, %v966_v36, %v4336_v38  ;;  %v988_v8 = vsel %vm981_vm6, %v971_v44, %v4350_v17  ;;  %v989_v60 = vsel %vm981_vm6, %v972_v13, %v4351_v7  ;;  %v986_v50 = vsel %vm981_vm6, %v969_v29, %v4345_v11  ;;  %v8328_v44 = vld [vmem:[#allocation19_spill] sm:$0xff]  ;;  %v8329_v29 = vld [vmem:[#allocation20_spill] sm:$0xff]  ;;  %v8331_v38 = vld [vmem:[#allocation22_spill] sm:$0xff] }
  0xf1   : > { %v987_v61 = vsel %vm981_vm6, %v970_v0, %v4346_v28  ;;  %v4356_v56 = vunpack.i.h.bf16 %v5457_v45  ;;  %v4365_v33 = vunpack.i.l.bf16 %v5463_v5  ;;  %v5652_v19 = vsel %vm981_vm6, %v975_v39, %v4360_v30 }
  0xf2   : > { %v5625_v24 = vpop.permute.xlu1 %4458  ;;  %v4366_v63 = vunpack.i.h.bf16 %v5463_v5  ;;  %v4381_v3 = vunpack.i.h.bf16 %v5466_v14  ;;  %v4380_v16 = vunpack.i.l.bf16 %v5466_v14  ;;  %v5660_v31 = vsel %vm981_vm6, %v976_v35, %v4361_v6  ;;  %v8332_v6 = vld [vmem:[#allocation21_spill] sm:$0xff] }
  0xf3   : > { %v990_v4 = vsel %vm981_vm6, %v973_v46, %v4355_v62  ;;  %v4376_v45 = vunpack.i.h.bf16 %v5469_v27  ;;  %v4375_v36 = vunpack.i.l.bf16 %v5469_v27  ;;  %v4391_v13 = vunpack.i.h.bf16 %v8328_v44 }
  0xf4   : > { %v5635_v26 = vpop.permute.xlu0 %4453  ;;  %v4390_v5 = vunpack.i.l.bf16 %v8328_v44  ;;  %v4386_v10 = vunpack.i.h.bf16 %v8329_v29  ;;  %v4385_v14 = vunpack.i.l.bf16 %v8329_v29  ;;  %v5672_v39 = vsel %vm981_vm6, %v974_v59, %v4356_v56 }
  0xf5   : > { %v4371_v40 = vunpack.i.h.bf16 %v8330_v49  ;;  %v4370_v35 = vunpack.i.l.bf16 %v8330_v49  ;;  %v5677_v27 = vsel %vm981_vm6, %v977_v9, %v4365_v33  ;;  %v5680_v46 = vsel %vm981_vm6, %v978_v23, %v4366_v63 }
  0xf6   : > { %v5645_v25 = vpop.permute.xlu1 %4468  ;;  %v1001_v51 = vsel %vm998_vm7, %v984_v48, %v4380_v16  ;;  %v1002_v15 = vsel %vm998_vm7, %v985_v57, %v4381_v3  ;;  %v4395_v2 = vunpack.i.l.bf16 %v8331_v38  ;;  %v999_v17 = vsel %vm998_vm7, %v982_v41, %v4375_v36 }
  0xf7   : > { %v1000_v59 = vsel %vm998_vm7, %v983_v22, %v4376_v45  ;;  %v4421_v28 = vunpack.i.h.bf16 %v5532_v53  ;;  %v4420_v11 = vunpack.i.l.bf16 %v5532_v53  ;;  %v1005_v9 = vsel %vm998_vm7, %v988_v8, %v4390_v5 }
  0xf8   : > { %v5657_v54 = vpop.permute.xlu0 %4463  ;;  %v5693_v23 = vsel %vm998_vm7, %v989_v60, %v4391_v13  ;;  %v1003_v30 = vsel %vm998_vm7, %v986_v50, %v4385_v14  ;;  %v1004_v48 = vsel %vm998_vm7, %v987_v61, %v4386_v10  ;;  %v4401_v62 = vunpack.i.h.bf16 %v8332_v6 }
  0xf9   : > { %v4400_v41 = vunpack.i.l.bf16 %v8332_v6  ;;  %v4416_v22 = vunpack.i.h.bf16 %v5546_v32  ;;  %v4415_v56 = vunpack.i.l.bf16 %v5546_v32  ;;  %v4396_v53 = vunpack.i.h.bf16 %v8331_v38 }
  0xfa   : > { %v5669_v0 = vpop.permute.xlu1 %4478  ;;  %v1007_v8 = vsel %vm998_vm7, %v990_v4, %v4395_v2  ;;  %v4461_v60 = vunpack.i.h.bf16 %v5625_v24  ;;  %v4460_v50 = vunpack.i.l.bf16 %v5625_v24  ;;  %v1018_v33 = vsel %vm1015_vm8, %v1001_v51, %v4420_v11 }
  0xfb   : > { %v1019_v63 = vsel %vm1015_vm8, %v1002_v15, %v4421_v28  ;;  %v4431_v3 = vunpack.i.h.bf16 %v5559_v58  ;;  %v4430_v16 = vunpack.i.l.bf16 %v5559_v58  ;;  %v4426_v32 = vunpack.i.h.bf16 %v5570_v18 }
  0xfc   : > { %v5685_v7 = vpop.permute.xlu0 %4473  ;;  %v4425_v45 = vunpack.i.l.bf16 %v5570_v18  ;;  %v4456_v4 = vunpack.i.h.bf16 %v5635_v26  ;;  %v4455_v36 = vunpack.i.l.bf16 %v5635_v26  ;;  %v1016_v5 = vsel %vm1015_vm8, %v999_v17, %v4415_v56 }
  0xfd   : > { %v1017_v29 = vsel %vm1015_vm8, %v1000_v59, %v4416_v22  ;;  %v1035_v10 = vsel %vm1032_vm9, %v1018_v33, %v4460_v50  ;;  %v1036_v14 = vsel %vm1032_vm9, %v1019_v63, %v4461_v60  ;;  %v4466_v58 = vunpack.i.h.bf16 %v5657_v54 }
  0xfe   : > { %v5697_v57 = vpop.permute.xlu1 %4488  ;;  %v4465_v51 = vunpack.i.l.bf16 %v5657_v54  ;;  %v1020_v28 = vsel %vm1015_vm8, %v1003_v30, %v4425_v45  ;;  %v1021_v17 = vsel %vm1015_vm8, %v1004_v48, %v4426_v32  ;;  %v1033_v59 = vsel %vm1032_vm9, %v1016_v5, %v4455_v36 }
  0xff   : > { %v1034_v11 = vsel %vm1032_vm9, %v1017_v29, %v4456_v4  ;;  %v4436_v22 = vunpack.i.h.bf16 %v5595_v43  ;;  %v4435_v33 = vunpack.i.l.bf16 %v5595_v43  ;;  %v4471_v63 = vunpack.i.h.bf16 %v5645_v25 }
 0x100   : > { %v5707_v61 = vpop.permute.xlu0 %4483  ;;  %v4470_v30 = vunpack.i.l.bf16 %v5645_v25  ;;  %v1037_v32 = vsel %vm1032_vm9, %v1020_v28, %v4465_v51  ;;  %v1038_v4 = vsel %vm1032_vm9, %v1021_v17, %v4466_v58  ;;  %v1008_v43 = vsel %vm998_vm7, %v5672_v39, %v4396_v53 }
 0x101   : > { %v1022_v25 = vsel %vm1015_vm8, %v1005_v9, %v4430_v16  ;;  %v1023_v58 = vsel %vm1015_vm8, %v5693_v23, %v4431_v3  ;;  %v1025_v51 = vsel %vm1015_vm8, %v1008_v43, %v4436_v22  ;;  %v4405_v3 = vunpack.i.l.bf16 %v5519_v12 }
 0x102   : > { %v4499_v44 = vpop.permute.xlu1 %4498  ;;  %v1040_v39 = vsel %vm1032_vm9, %v1023_v58, %v4471_v63  ;;  %v4440_v22 = vunpack.i.l.bf16 %v5581_v55  ;;  %v980_v58 = vsel %vm964_vm5, %v5588_v37, %v4331_v1 }
 0x103   : > { %v4501_v24 = vunpack.i.h.bf16 %v4499_v44  ;;  %v4500_v13 = vunpack.i.l.bf16 %v4499_v44  ;;  %v997_v21 = vsel %vm981_vm6, %v980_v58, %v4371_v40 }
 0x104   : > { %v4494_v18 = vpop.permute.xlu0 %4493 }
 0x105   : > { %v1052_v15 = vsel %vm1049_vm10, %v1035_v10, %v4500_v13  ;;  %v1053_v26 = vsel %vm1049_vm10, %v1036_v14, %v4501_v24  ;;  %v4496_v38 = vunpack.i.h.bf16 %v4494_v18  ;;  %v4495_v2 = vunpack.i.l.bf16 %v4494_v18 }
 0x106   : > { %v4509_v56 = vpop.permute.xlu1 %4508  ;;  %v1067_v50 = vpack.c.bf16 %v1053_v26, %v1052_v15  ;;  %v4476_v24 = vunpack.i.h.bf16 %v5685_v7  ;;  %v4475_v13 = vunpack.i.l.bf16 %v5685_v7  ;;  %v1024_v7 = vsel %vm1015_vm8, %v1007_v8, %v4435_v33 }
 0x107   : > { %v1050_v54 = vsel %vm1049_vm10, %v1033_v59, %v4495_v2  ;;  %v1051_v60 = vsel %vm1049_vm10, %v1034_v11, %v4496_v38  ;;  %v4511_v5 = vunpack.i.h.bf16 %v4509_v56  ;;  %v4510_v29 = vunpack.i.l.bf16 %v4509_v56 }
 0x108   : > { %v4504_v45 = vpop.permute.xlu0 %4503  ;;  %v1066_v48 = vpack.c.bf16 %v1051_v60, %v1050_v54  ;;  %v1039_v26 = vsel %vm1032_vm9, %v1022_v25, %v4470_v30  ;;  %v1041_v16 = vsel %vm1032_vm9, %v1024_v7, %v4475_v13  ;;  %v1042_v38 = vsel %vm1032_vm9, %v1025_v51, %v4476_v24 }
 0x109   : > { %v4506_v36 = vunpack.i.h.bf16 %v4504_v45  ;;  %v4505_v44 = vunpack.i.l.bf16 %v4504_v45  ;;  %v1056_v2 = vsel %vm1049_vm10, %v1039_v26, %v4510_v29  ;;  %v1057_v23 = vsel %vm1049_vm10, %v1040_v39, %v4511_v5 }
 0x10a   : > { %4114 = vmatprep.mubr.msk.bf16.mxu0 %vm1202_vm11, %v1066_v48  ;;  %v4406_v8 = vunpack.i.h.bf16 %v5519_v12  ;;  %v4519_v28 = vpop.permute.xlu1 %4518  ;;  %v4441_v11 = vunpack.i.h.bf16 %v5581_v55  ;;  %v4446_v56 = vunpack.i.h.bf16 %v5615_v34  ;;  %v4445_v54 = vunpack.i.l.bf16 %v5615_v34 }
 0x10b   : > { %v1054_v10 = vsel %vm1049_vm10, %v1037_v32, %v4505_v44  ;;  %v1055_v14 = vsel %vm1049_vm10, %v1038_v4, %v4506_v36  ;;  %4115 = vmatmul.mubr.msk.bf16.vlgmr.msra.gmra.mrb[0].mxu0 %vm1202_vm11, %v1067_v50  ;;  %v4481_v50 = vunpack.i.h.bf16 %v5669_v0  ;;  %v4480_v33 = vunpack.i.l.bf16 %v5669_v0 }
 0x10c   : > { %v4514_v18 = vpop.permute.xlu0 %4513  ;;  %v1068_v15 = vpack.c.bf16 %v1055_v14, %v1054_v10  ;;  %v4486_v12 = vunpack.i.h.bf16 %v5707_v61  ;;  %v1069_v63 = vpack.c.bf16 %v1057_v23, %v1056_v2  ;;  %v4485_v30 = vunpack.i.l.bf16 %v5707_v61 }
 0x10d   : > { %v4516_v9 = vunpack.i.h.bf16 %v4514_v18  ;;  %v4515_v53 = vunpack.i.l.bf16 %v4514_v18  ;;  %v4521_v45 = vunpack.i.h.bf16 %v4519_v28  ;;  %v4520_v48 = vunpack.i.l.bf16 %v4519_v28 }
 0x10e   : > { %4118 = vmatprep.mubr.msk.bf16.mxu0 %vm1202_vm11, %v1068_v15  ;;  %v1009_v55 = vsel %vm998_vm7, %v5652_v19, %v4400_v41  ;;  %v1010_v34 = vsel %vm998_vm7, %v5660_v31, %v4401_v62  ;;  %v1011_v61 = vsel %vm998_vm7, %v5677_v27, %v4405_v3  ;;  %v1012_v36 = vsel %vm998_vm7, %v5680_v46, %v4406_v8  ;;  %v4529_v43 = vpop.permute.xlu1 %4528  ;;  %v5835_v8 = vld [vmem:[%s8174_s4 + $0x1] ss:$0 sm:$0xff] }
 0x10f   : > { %v1058_v17 = vsel %vm1049_vm10, %v1041_v16, %v4515_v53  ;;  %v1059_v59 = vsel %vm1049_vm10, %v1042_v38, %v4516_v9  ;;  %v1026_v44 = vsel %vm1015_vm8, %v1009_v55, %v4440_v22  ;;  %v1027_v24 = vsel %vm1015_vm8, %v1010_v34, %v4441_v11  ;;  %v5842_v22 = vld [vmem:[%s8174_s4 + $0x2] ss:$0 sm:$0xff] }
 0x110   : > { %v4524_v60 = vpop.permute.xlu0 %4523  ;;  %v1070_v32 = vpack.c.bf16 %v1059_v59, %v1058_v17  ;;  %v1028_v19 = vsel %vm1015_vm8, %v1011_v61, %v4445_v54  ;;  %v1029_v31 = vsel %vm1015_vm8, %v1012_v36, %v4446_v56  ;;  %v1043_v6 = vsel %vm1032_vm9, %v1026_v44, %v4480_v33 }
 0x111   : > { %v4526_v4 = vunpack.i.h.bf16 %v4524_v60  ;;  %v4525_v0 = vunpack.i.l.bf16 %v4524_v60  ;;  %v1044_v62 = vsel %vm1032_vm9, %v1027_v24, %v4481_v50  ;;  %v1045_v41 = vsel %vm1032_vm9, %v1028_v19, %v4485_v30  ;;  %v5848_v60 = vld [vmem:[%s8174_s4] ss:$0 sm:$0xff] }
 0x112   : > { %v1046_v27 = vsel %vm1032_vm9, %v1029_v31, %v4486_v12  ;;  %v1060_v46 = vsel %vm1049_vm10, %v1043_v6, %v4520_v48  ;;  %v1061_v13 = vsel %vm1049_vm10, %v1044_v62, %v4521_v45  ;;  %v4411_v5 = vunpack.i.h.bf16 %v5503_v52  ;;  %v5825_v53 = vpop.permute.xlu1 %1092 }
 0x113   : > { %4119 = vmatmul.mubr.msk.bf16.gmra.mrb[4].mxu0 %vm1202_vm11, %v1069_v63  ;;  %v4410_v29 = vunpack.i.l.bf16 %v5503_v52  ;;  %v1062_v25 = vsel %vm1049_vm10, %v1045_v41, %v4525_v0  ;;  %v1063_v10 = vsel %vm1049_vm10, %v1046_v27, %v4526_v4  ;;  %v979_v14 = vsel %vm964_vm5, %v5591_v47, %v4330_v20  ;;  %8333 = vst [vmem:[#allocation19_spill] sm:$0xff] %v5825_v53  ;;  %v5858_v0 = vld [vmem:[%s8174_s4 + $0x4] ss:$0 sm:$0xff] }
 0x114   : > { %4122 = vmatprep.mubr.msk.bf16.mxu0 %vm1202_vm11, %v1070_v32  ;;  %v4451_v7 = vunpack.i.h.bf16 %v5605_v42  ;;  %v4450_v51 = vunpack.i.l.bf16 %v5605_v42  ;;  %v996_v52 = vsel %vm981_vm6, %v979_v14, %v4370_v35  ;;  %v4491_v18 = vunpack.i.h.bf16 %v5697_v57  ;;  %v5827_v16 = vpop.permute.xlu0 %1090 }
 0x115   : > { %v4490_v15 = vunpack.i.l.bf16 %v5697_v57  ;;  %v1071_v26 = vpack.c.bf16 %v1061_v13, %v1060_v46  ;;  %v4531_v47 = vunpack.i.h.bf16 %v4529_v43  ;;  %v4530_v20 = vunpack.i.l.bf16 %v4529_v43  ;;  %8334 = vst [vmem:[#allocation20_spill] sm:$0xff] %v5827_v16  ;;  %v5874_v46 = vld [vmem:[%s8174_s4 + $0x3] ss:$0 sm:$0xff]  ;;  %v5879_v13 = vld [vmem:[%s8174_s4 + $0x5] ss:$0 sm:$0xff] }
 0x116   : > { %v1072_v37 = vpack.c.bf16 %v1063_v10, %v1062_v25  ;;  %v1013_v1 = vsel %vm998_vm7, %v996_v52, %v4410_v29  ;;  %v1014_v42 = vsel %vm998_vm7, %v997_v21, %v4411_v5  ;;  %v1155_v12 = vlaneseq }
 0x117   : > { %v1030_v35 = vsel %vm1015_vm8, %v1013_v1, %v4450_v51  ;;  %v1031_v39 = vsel %vm1015_vm8, %v1014_v42, %v4451_v7 }
 0x118   : > { %v1047_v57 = vsel %vm1032_vm9, %v1030_v35, %v4490_v15  ;;  %v1048_v49 = vsel %vm1032_vm9, %v1031_v39, %v4491_v18  ;;  %v5830_v23 = vpop.permute.xlu0 %1094  ;;  %v5860_v36 = vshrl.u32 %v1155_v12, 7  ;;  %vm3499_vm9 = vcmask 31744  }
 0x119   : > { %v1064_v40 = vsel %vm1049_vm10, %v1047_v57, %v4530_v20  ;;  %v1065_v9 = vsel %vm1049_vm10, %v1048_v49, %v4531_v47  ;;  %8335 = vst [vmem:[#allocation18_spill] sm:$0xff] %v5830_v23  ;;  %vm3532_vm10 = vcmask 97280  }
 0x11a   : > { %v1073_v38 = vpack.c.bf16 %v1065_v9, %v1064_v40  ;;  %v5868_v41 = vadd.s32 16, %v5860_v36  ;;  %vm2914_vm13 = vcmp.ge.s32.totalorder %v5860_v36, 1 }
 0x11b   : > { %4123 = vmatmul.mubr.msk.bf16.gmra.mrb[8].mxu0 %vm1202_vm11, %v1071_v26 }
 0x11c   : > { %4126 = vmatprep.mubr.msk.bf16.mxu0 %vm1202_vm11, %v1072_v37  ;;  %vm2919_vm14 = vcmp.le.s32.totalorder %v5868_v41, 16 }
 0x123   : > { %4127 = vmatmul.mubr.msk.bf16.gmra.mrb[12].mxu0 %vm1202_vm11, %v1073_v38  ;;  %v1388_v2 = vpop.permute.xlu1 %1387  ;;  %vm3565_vm11 = vcmask 162816  }
 0x124   : > { %v1609_v17 = vmul.f32 %v5835_v8, %v1388_v2  ;;  %v1787_v63 = vmul.f32 %v5842_v22, %v1388_v2  ;;  %v1541_v45 = vmul.f32 %v5848_v60, %v1388_v2 }
 0x126   : > { %v1669_v50 = vrot.slane %v1609_v17, 1  ;;  %v1847_v44 = vrot.slane %v1787_v63, 2 }
 0x127   : > { %v1398_v3 = vpop.permute.xlu1 %1397 }
 0x128   : > { %v1611_v56 = vmul.f32 %v5835_v8, %v1398_v3  ;;  %v1789_v34 = vmul.f32 %v5842_v22, %v1398_v3  ;;  %v1543_v6 = vmul.f32 %v5848_v60, %v1398_v3 }
 0x129   : > { %v1393_v28 = vpop.permute.xlu0 %1392 }
 0x12a   : > { %v1610_v59 = vmul.f32 %v5835_v8, %v1393_v28  ;;  %v1788_v33 = vmul.f32 %v5842_v22, %v1393_v28  ;;  %v1672_v48 = vrot.slane %v1611_v56, 1  ;;  %v1542_v24 = vmul.f32 %v5848_v60, %v1393_v28 }
 0x12b   : > { %v1403_v54 = vpop.permute.xlu1 %1402  ;;  %v1850_v10 = vrot.slane %v1789_v34, 2 }
 0x12c   : > { %v1670_v11 = vrot.slane %v1610_v59, 1  ;;  %v1848_v55 = vrot.slane %v1788_v33, 2  ;;  %v1612_v19 = vmul.f32 %v5835_v8, %v1403_v54  ;;  %v2048_v5 = vmul.f32 %v5858_v0, %v1403_v54 }
 0x12d   : > { %v1408_v32 = vpop.permute.xlu0 %1407  ;;  %v1751_v25 = vadd.f32 %v1672_v48, %v1543_v6  ;;  %v1544_v58 = vmul.f32 %v5848_v60, %v1403_v54  ;;  %v1790_v52 = vmul.f32 %v5842_v22, %v1403_v54  ;;  %v1980_v26 = vmul.f32 %v5874_v46, %v1403_v54 }
 0x12e   : > { %v1671_v30 = vsel %vm438_vm0, %v1669_v50, %v1670_v11  ;;  %v1613_v31 = vmul.f32 %v5835_v8, %v1408_v32  ;;  %v1673_v62 = vsel %vm438_vm0, %v1670_v11, %v1672_v48  ;;  %v1849_v27 = vsel %vm527_vm1, %v1847_v44, %v1848_v55 }
 0x12f   : > { %v1749_v4 = vadd.f32 %v1671_v30, %v1541_v45  ;;  %v1413_v61 = vpop.permute.xlu1 %1412  ;;  %v2049_v29 = vmul.f32 %v5858_v0, %v1408_v32  ;;  %v1750_v7 = vadd.f32 %v1673_v62, %v1542_v24  ;;  %v1674_v51 = vrot.slane %v1612_v19, 1 }
 0x130   : > { %v1614_v43 = vmul.f32 %v5835_v8, %v1413_v61  ;;  %v1675_v18 = vrot.slane %v1613_v31, 1  ;;  %v2226_v21 = vmul.f32 %v5879_v13, %v1403_v54  ;;  %v1791_v47 = vmul.f32 %v5842_v22, %v1408_v32 }
 0x131   : > { %v1927_v14 = vadd.f32 %v1849_v27, %v1749_v4  ;;  %v5886_v15 = vpop.permute.xlu0 %1417  ;;  %v2050_v20 = vmul.f32 %v5858_v0, %v1413_v61  ;;  %v2108_v37 = vrot.slane %v2048_v5, 1  ;;  %v2109_v1 = vrot.slane %v2049_v29, 1 }
 0x132   : > { %v2227_v42 = vmul.f32 %v5879_v13, %v1408_v32  ;;  %v1677_v35 = vrot.slane %v1614_v43, 1  ;;  %v1929_v57 = vadd.f32 %v1850_v10, %v1751_v25  ;;  %v1851_v49 = vsel %vm527_vm1, %v1848_v55, %v1850_v10 }
 0x133   : > { %v5894_v39 = vpop.permute.xlu1 %1422  ;;  %v2010_v40 = vadd.f32 %v1980_v26, %v1927_v14  ;;  %v1982_v9 = vmul.f32 %v5874_v46, %v1413_v61  ;;  %v1928_v38 = vadd.f32 %v1851_v49, %v1750_v7  ;;  %v1852_v2 = vrot.slane %v1790_v52, 2 }
 0x134   : > { %v1676_v3 = vsel %vm438_vm0, %v1674_v51, %v1675_v18  ;;  %v1792_v28 = vmul.f32 %v5842_v22, %v1413_v61  ;;  %v2286_v17 = vrot.slane %v2226_v21, 2  ;;  %v1853_v59 = vrot.slane %v1791_v47, 2 }
 0x135   : > { %v1546_v11 = vmul.f32 %v5848_v60, %v1413_v61  ;;  %v2111_v56 = vrot.slane %v2050_v20, 1  ;;  %v2110_v54 = vsel %vm438_vm0, %v2108_v37, %v2109_v1  ;;  %v2287_v50 = vrot.slane %v2227_v42, 2  ;;  %v5908_v63 = vpop.permute.xlu0 %1427 }
 0x136   : > { %v1678_v33 = vsel %vm438_vm0, %v1675_v18, %v1677_v35  ;;  %v2228_v12 = vmul.f32 %v5879_v13, %v1413_v61  ;;  %v1545_v30 = vmul.f32 %v5848_v60, %v1408_v32  ;;  %v1752_v45 = vadd.f32 %v1676_v3, %v1544_v58 }
 0x137   : > { %v2188_v48 = vadd.f32 %v2110_v54, %v2010_v40  ;;  %v2012_v55 = vadd.f32 %v1982_v9, %v1929_v57  ;;  %v1981_v34 = vmul.f32 %v5874_v46, %v1408_v32  ;;  %v1754_v4 = vadd.f32 %v1677_v35, %v1546_v11  ;;  %v5912_v24 = vpop.permute.xlu1 %1432 }
 0x138   : > { %v1855_v44 = vrot.slane %v1792_v28, 2  ;;  %v1753_v31 = vadd.f32 %v1678_v33, %v1545_v30  ;;  %v2112_v6 = vsel %vm438_vm0, %v2109_v1, %v2111_v56  ;;  %v5918_v61 = vmul.f32 %v5835_v8, %v5894_v39 }
 0x139   : > { %v1617_v62 = vmul.f32 %v5835_v8, %v5908_v63  ;;  %v1854_v27 = vsel %vm527_vm1, %v1852_v2, %v1853_v59  ;;  %v2011_v5 = vadd.f32 %v1981_v34, %v1928_v38  ;;  %v2288_v32 = vsel %vm527_vm1, %v2286_v17, %v2287_v50  ;;  %v5957_v35 = vpop.permute.xlu0 %1437 }
 0x13a   : > { %v2289_v29 = vrot.slane %v2228_v12, 2  ;;  %v5924_v43 = vadd.f32 %v1854_v27, %v1752_v45  ;;  %v5926_v25 = vadd.f32 %v2288_v32, %v2188_v48  ;;  %v2190_v10 = vadd.f32 %v2111_v56, %v2012_v55 }
 0x13b   : > { %v5930_v14 = vmul.f32 %v5835_v8, %v5886_v15  ;;  %v1856_v58 = vsel %vm527_vm1, %v1853_v59, %v1855_v44  ;;  %v5933_v7 = vadd.f32 %v1855_v44, %v1754_v4  ;;  %v2189_v51 = vadd.f32 %v2112_v6, %v2011_v5  ;;  %v5959_v57 = vpop.permute.xlu1 %1442 }
 0x13c   : > { %v5937_v52 = vmul.f32 %v5842_v22, %v5886_v15  ;;  %v1931_v18 = vadd.f32 %v1856_v58, %v1753_v31  ;;  %v5941_v26 = vmul.f32 %v5848_v60, %v5886_v15  ;;  %v8215_v21 = vrot.slane %v5918_v61, 1 }
 0x13d   : > { %v1682_v47 = vrot.slane %v1617_v62, 1  ;;  %v2290_v20 = vsel %vm527_vm1, %v2287_v50, %v2289_v29  ;;  %v5947_v37 = vmul.f32 %v5858_v0, %v5886_v15  ;;  %v5951_v1 = vmul.f32 %v5879_v13, %v5886_v15  ;;  %v6014_v62 = vpop.permute.xlu0 %1447 }
 0x13e   : > { %v5955_v42 = vmul.f32 %v5842_v22, %v5894_v39  ;;  %v5961_v49 = vadd.f32 %v2289_v29, %v2190_v10  ;;  %v5966_v9 = vmul.f32 %v5874_v46, %v5886_v15  ;;  %v5970_v38 = vmul.f32 %v5842_v22, %v5908_v63 }
 0x13f   : > { %v5972_v2 = vadd.f32 %v2290_v20, %v2189_v51  ;;  %v5977_v28 = vmul.f32 %v5858_v0, %v5894_v39  ;;  %v5981_v17 = vmul.f32 %v5879_v13, %v5894_v39  ;;  %v1548_v59 = vmul.f32 %v5848_v60, %v5894_v39 }
 0x140   : > { %8336 = vst [vmem:[#allocation22_spill] sm:$0xff] %v5970_v38  ;;  %v1984_v11 = vmul.f32 %v5874_v46, %v5894_v39  ;;  %v1683_v56 = vsel %vm438_vm0, %v8215_v21, %v1682_v47  ;;  %v1620_v54 = vmul.f32 %v5835_v8, %v5959_v57  ;;  %v8214_v12 = vrot.slane %v5955_v42, 2 }
 0x141   : > { %v5997_v30 = vmul.f32 %v5835_v8, %v5912_v24  ;;  %v1549_v48 = vmul.f32 %v5848_v60, %v5908_v63  ;;  %v8213_v55 = vrot.slane %v5970_v38, 2  ;;  %v6006_v34 = vmul.f32 %v5835_v8, %v5957_v35 }
 0x142   : > { %v5999_v45 = vadd.f32 %v1984_v11, %v1931_v18  ;;  %v6012_v31 = vmul.f32 %v5842_v22, %v5912_v24  ;;  %v1756_v6 = vadd.f32 %v1683_v56, %v1548_v59  ;;  %v6018_v27 = vmul.f32 %v5874_v46, %v5908_v63 }
 0x143   : > { %8337 = vst [vmem:[#allocation21_spill] sm:$0xff] %v5997_v30  ;;  %8338 = vst [vmem:[#allocation23_spill] sm:$0xff] %v6006_v34  ;;  %v6022_v5 = vmul.f32 %v5848_v60, %v5912_v24  ;;  %v6026_v32 = vmul.f32 %v5858_v0, %v5912_v24  ;;  %v1687_v29 = vrot.slane %v1620_v54, 1  ;;  %v6031_v58 = vmul.f32 %v5874_v46, %v5912_v24  ;;  %v6175_v30 = vld [vmem:[%s8174_s4 + $0x7] ss:$0 sm:$0xff] }
 0x144   : > { %8339 = vst [vmem:[#allocation24_spill] sm:$0xff] %v6012_v31  ;;  %v6035_v51 = vmul.f32 %v5879_v13, %v5912_v24  ;;  %v6039_v18 = vmul.f32 %v5842_v22, %v5957_v35  ;;  %v1861_v20 = vsel %vm527_vm1, %v8214_v12, %v8213_v55  ;;  %v8216_v59 = vrot.slane %v6006_v34, 1  ;;  %v6197_v34 = vld [vmem:[%s8174_s4 + $0x6] ss:$0 sm:$0xff] }
 0x145   : > { %8340 = vst [vmem:[#allocation25_spill] sm:$0xff] %v6022_v5  ;;  %8341 = vst [vmem:[#allocation26_spill] sm:$0xff] %v6026_v32  ;;  %v6049_v11 = vmul.f32 %v5858_v0, %v5957_v35  ;;  %v6053_v56 = vmul.f32 %v5842_v22, %v5959_v57  ;;  %v6055_v54 = vadd.f32 %v1682_v47, %v1549_v48  ;;  %v6070_v47 = vpop.permute.xlu1 %1452 }
 0x146   : > { %8342 = vst [vmem:[#allocation27_spill] sm:$0xff] %v6031_v58  ;;  %8343 = vst [vmem:[#allocation28_spill] sm:$0xff] %v6039_v18  ;;  %v1934_v3 = vadd.f32 %v1861_v20, %v1756_v6  ;;  %v1551_v40 = vmul.f32 %v5848_v60, %v5957_v35  ;;  %v1987_v12 = vmul.f32 %v5874_v46, %v5957_v35 }
 0x147   : > { %8344 = vst [vmem:[#allocation29_spill] sm:$0xff] %v6053_v56  ;;  %8345 = vst [vmem:[#allocation30_spill] sm:$0xff] %v6055_v54  ;;  %v1688_v21 = vsel %vm438_vm0, %v8216_v59, %v1687_v29  ;;  %v6068_v33 = vmul.f32 %v5858_v0, %v5959_v57  ;;  %v6075_v6 = vmul.f32 %v5879_v13, %v5957_v35  ;;  %v6083_v59 = vpop.permute.xlu0 %1457  ;;  %v8356_v16 = vrot.slane %v6053_v56, 2 }
 0x148   : > { %v1552_v20 = vmul.f32 %v5848_v60, %v5959_v57  ;;  %v6081_v10 = vmul.f32 %v5879_v13, %v5959_v57  ;;  %8346 = vst [vmem:[#allocation31_spill] sm:$0xff] %v6083_v59  ;;  %v6089_v50 = vmul.f32 %v5835_v8, %v6014_v62  ;;  %v6093_v4 = vmul.f32 %v5842_v22, %v6014_v62 }
 0x149   : > { %v6095_v19 = vadd.f32 %v1987_v12, %v1934_v3  ;;  %v6099_v48 = vmul.f32 %v5874_v46, %v5959_v57  ;;  %v6103_v23 = vmul.f32 %v5848_v60, %v6014_v62  ;;  %v1759_v55 = vadd.f32 %v1688_v21, %v1551_v40 }
 0x14a   : > { %8347 = vst [vmem:[#allocation32_spill] sm:$0xff] %v6089_v50  ;;  %8348 = vst [vmem:[#allocation33_spill] sm:$0xff] %v6093_v4  ;;  %v6105_v44 = vadd.f32 %v1687_v29, %v1552_v20  ;;  %v6110_v53 = vmul.f32 %v5835_v8, %v6070_v47  ;;  %v1623_v3 = vmul.f32 %v5835_v8, %v6083_v59  ;;  %v8357_v12 = vrot.slane %v6039_v18, 2 }
 0x14b   : > { %8349 = vst [vmem:[#allocation34_spill] sm:$0xff] %v6099_v48  ;;  %8350 = vst [vmem:[#allocation35_spill] sm:$0xff] %v6103_v23  ;;  %v6117_v31 = vmul.f32 %v5874_v46, %v6014_v62  ;;  %v6121_v21 = vmul.f32 %v5858_v0, %v6014_v62  ;;  %v6125_v40 = vmul.f32 %v5842_v22, %v6070_v47 }
 0x14c   : > { %8351 = vst [vmem:[#allocation36_spill] sm:$0xff] %v6105_v44  ;;  %8352 = vst [vmem:[#allocation37_spill] sm:$0xff] %v6110_v53  ;;  %v1866_v23 = vsel %vm527_vm1, %v8357_v12, %v8356_v16  ;;  %v6136_v44 = vmul.f32 %v5858_v0, %v6070_v47  ;;  %v6142_v5 = vmul.f32 %v5879_v13, %v6014_v62  ;;  %v1692_v12 = vrot.slane %v1623_v3, 1 }
 0x14d   : > { %8353 = vst [vmem:[#allocation38_spill] sm:$0xff] %v6117_v31  ;;  %8354 = vst [vmem:[#allocation39_spill] sm:$0xff] %v6121_v21  ;;  %v6138_v31 = vpop.permute.xlu1 %1462  ;;  %v1554_v29 = vmul.f32 %v5848_v60, %v6070_v47  ;;  %v1937_v20 = vadd.f32 %v1866_v23, %v1759_v55  ;;  %v6148_v4 = vmul.f32 %v5842_v22, %v6083_v59  ;;  %v8370_v48 = vrot.slane %v6110_v53, 1 }
 0x14e   : > { %8355 = vst [vmem:[#allocation40_spill] sm:$0xff] %v6125_v40  ;;  %8358 = vst [vmem:[#allocation41_spill] sm:$0xff] %v6136_v44  ;;  %v6153_v50 = vmul.f32 %v5858_v0, %v6083_v59  ;;  %v6157_v56 = vmul.f32 %v5879_v13, %v6083_v59  ;;  %v1990_v23 = vmul.f32 %v5874_v46, %v6070_v47 }
 0x14f   : > { %8359 = vst [vmem:[#allocation42_spill] sm:$0xff] %v6138_v31  ;;  %8360 = vst [vmem:[#allocation43_spill] sm:$0xff] %v6142_v5  ;;  %v6165_v55 = vmul.f32 %v5835_v8, %v6138_v31  ;;  %v6170_v16 = vmul.f32 %v5879_v13, %v6070_v47  ;;  %v1555_v5 = vmul.f32 %v5848_v60, %v6083_v59  ;;  %v8380_v58 = vrot.slane %v6148_v4, 2 }
 0x150   : > { %8361 = vst [vmem:[#allocation44_spill] sm:$0xff] %v6148_v4  ;;  %8362 = vst [vmem:[#allocation45_spill] sm:$0xff] %v6153_v50  ;;  %v6181_v18 = vmul.f32 %v5842_v22, %v6138_v31  ;;  %v6183_v21 = vadd.f32 %v1990_v23, %v1937_v20  ;;  %v6192_v44 = vmul.f32 %v6175_v30, %v6083_v59 }
 0x151   : > { %8363 = vst [vmem:[#allocation46_spill] sm:$0xff] %v6157_v56  ;;  %8364 = vst [vmem:[#allocation47_spill] sm:$0xff] %v6165_v55  ;;  %v1693_v20 = vsel %vm438_vm0, %v8370_v48, %v1692_v12  ;;  %v6213_v54 = vmul.f32 %v5874_v46, %v6138_v31  ;;  %v6217_v53 = vmul.f32 %v5858_v0, %v6138_v31  ;;  %v8375_v48 = vstv %s5902_s15  ;;  %s4922_s15 = smov 4  }
 0x152   : > { %8365 = vst [vmem:[#allocation48_spill] sm:$0xff] %v6170_v16  ;;  %8366 = vst [vmem:[#allocation49_spill] sm:$0xff] %v6181_v18  ;;  %v6188_v16 = vmul.f32 %v5874_v46, %v6083_v59  ;;  %vm6221_vm12 = vcmp.eq.s32.totalorder %v8375_v48, 1  ;;  %v2420_v38 = vmul.f32 %v6197_v34, %v5894_v39  ;;  %v2421_v3 = vmul.f32 %v6197_v34, %v5908_v63  ;;  %v6236_v48 = vld [vmem:[%s8174_s4 + $0x8] ss:$0 sm:$0xff] }
 0x153   : > { %8367 = vst [vmem:[#allocation50_spill] sm:$0xff] %v6183_v21  ;;  %8369 = vst [vmem:[#allocation52_spill] sm:$0xff] %v6192_v44  ;;  %v6208_v21 = vadd.f32 %v1692_v12, %v1555_v5  ;;  %v2419_v12 = vmul.f32 %v6197_v34, %v5886_v15  ;;  %v1762_v5 = vadd.f32 %v1693_v20, %v1554_v29  ;;  %v6282_v44 = vld [vmem:[%s8175_s5] ss:$0 sm:$0xff] }
 0x154   : > { %8368 = vst [vmem:[#allocation51_spill] sm:$0xff] %v6188_v16  ;;  %v6206_v16 = vmul.f32 %v5848_v60, %v6138_v31  ;;  %8373 = vst [vmem:[#allocation55_spill] sm:$0xff] %v6213_v54  ;;  %v2487_v18 = vmul.f32 %v6175_v30, %v5886_v15  ;;  %v2488_v55 = vmul.f32 %v6175_v30, %v5894_v39 }
 0x155   : > { %8372 = vst [vmem:[#allocation54_spill] sm:$0xff] %v6208_v21  ;;  %8374 = vst [vmem:[#allocation56_spill] sm:$0xff] %v6217_v53  ;;  %v6247_v21 = vpop.permute.xlu0 %1467  ;;  %v2449_v54 = vadd.f32 %v2419_v12, %v5926_v25  ;;  %v2450_v56 = vadd.f32 %v2420_v38, %v5972_v2  ;;  %v2451_v50 = vadd.f32 %v2421_v3, %v5961_v49  ;;  %v8381_v25 = vrot.slane %v6125_v40, 2 }
 0x156   : > { %8371 = vst [vmem:[#allocation53_spill] sm:$0xff] %v6206_v16  ;;  %v6241_v16 = vmul.f32 %v5879_v13, %v6138_v31  ;;  %8379 = vst [vmem:[#allocation58_spill] sm:$0xff] %v6247_v21  ;;  %v2489_v59 = vmul.f32 %v6175_v30, %v5908_v63  ;;  %v2547_v31 = vrot.slane %v2487_v18, 1  ;;  %v2665_v29 = vmul.f32 %v6236_v48, %v5886_v15  ;;  %v6270_v15 = vpop.permute.xlu1 %1472 }
 0x157   : > { %v2666_v20 = vmul.f32 %v6236_v48, %v5894_v39  ;;  %v1871_v38 = vsel %vm527_vm1, %v8381_v25, %v8380_v58  ;;  %v2667_v2 = vmul.f32 %v6236_v48, %v5908_v63  ;;  %v6268_v18 = vmul.f32 %v5835_v8, %v6247_v21  ;;  %8383 = vst [vmem:[#allocation60_spill] sm:$0xff] %v6270_v15  ;;  %vm6308_vm15 = vmand %vm6221_vm12, %vm2914_vm13 }
 0x158   : > { %8378 = vst [vmem:[#allocation57_spill] sm:$0xff] %v6241_v16  ;;  %v2548_v16 = vrot.slane %v2488_v55, 1  ;;  %v2550_v49 = vrot.slane %v2489_v59, 1  ;;  %v2725_v55 = vrot.slane %v2665_v29, 2  ;;  %v1940_v58 = vadd.f32 %v1871_v38, %v1762_v5  ;;  %vm2925_vm2 = vmand %vm6221_vm12, %vm2919_vm14 }
 0x159   : > { %8382 = vst [vmem:[#allocation59_spill] sm:$0xff] %v6268_v18  ;;  %v2726_v3 = vrot.slane %v2666_v20, 2  ;;  %v2728_v53 = vrot.slane %v2667_v2, 2  ;;  %v6276_v59 = vmul.f32 %v5842_v22, %v6247_v21  ;;  %v6289_v5 = vmul.f32 %v5848_v60, %v6247_v21 }
 0x15a   : > { %v2549_v39 = vsel %vm438_vm0, %v2547_v31, %v2548_v16  ;;  %v2551_v12 = vsel %vm438_vm0, %v2548_v16, %v2550_v49  ;;  %v2629_v4 = vadd.f32 %v2550_v49, %v2451_v50  ;;  %v1626_v31 = vmul.f32 %v5835_v8, %v6270_v15 }
 0x15b   : > { %v2627_v32 = vadd.f32 %v2549_v39, %v2449_v54  ;;  %v2628_v25 = vadd.f32 %v2551_v12, %v2450_v56  ;;  %v2727_v40 = vsel %vm527_vm1, %v2725_v55, %v2726_v3  ;;  %v2729_v54 = vsel %vm527_vm1, %v2726_v3, %v2728_v53 }
 0x15c   : > { %v2807_v16 = vadd.f32 %v2728_v53, %v2629_v4  ;;  %v1993_v56 = vmul.f32 %v5874_v46, %v6247_v21  ;;  %v6295_v29 = vmul.f32 %v5858_v0, %v6247_v21  ;;  %v6300_v49 = vmul.f32 %v5842_v22, %v6270_v15 }
 0x15d   : > { %v2805_v50 = vadd.f32 %v2727_v40, %v2627_v32  ;;  %v2806_v20 = vadd.f32 %v2729_v54, %v2628_v25  ;;  %v6315_v2 = vmul.f32 %v5879_v13, %v6247_v21  ;;  %v1558_v39 = vmul.f32 %v5848_v60, %v6270_v15  ;;  %v6326_v25 = vpop.permute.xlu0 %1477 }
 0x15e   : > { %8384 = vst [vmem:[#allocation61_spill] sm:$0xff] %v6295_v29  ;;  %8385 = vst [vmem:[#allocation62_spill] sm:$0xff] %v6300_v49  ;;  %v2844_v4 = vadd.f32 %v6282_v44, %v2807_v16  ;;  %v6324_v3 = vadd.f32 %v1993_v56, %v1940_v58  ;;  %v1697_v12 = vrot.slane %v1626_v31, 1  ;;  %v6331_v40 = vmul.f32 %v5874_v46, %v6270_v15 }
 0x15f   : > { %v2842_v53 = vadd.f32 %v6282_v44, %v2805_v50  ;;  %8388 = vst [vmem:[#allocation63_spill] sm:$0xff] %v6315_v2  ;;  %v2843_v55 = vadd.f32 %v6282_v44, %v2806_v20  ;;  %v6335_v20 = vmul.f32 %v5858_v0, %v6270_v15  ;;  %v6340_v58 = vmul.f32 %v5879_v13, %v6270_v15 }
 0x160   : > { %8389 = vst [vmem:[#allocation64_spill] sm:$0xff] %v6324_v3  ;;  %v2874_v50 = vmax.f32 %v2844_v4, 0.0  ;;  %8390 = vst [vmem:[#allocation65_spill] sm:$0xff] %v6331_v40  ;;  %v6352_v4 = vmul.f32 %v5848_v60, %v6326_v25  ;;  %v8395_v2 = vrot.slane %v6268_v18, 1  ;;  %v6369_v3 = vadd.f32 %v1697_v12, %v1558_v39 }
 0x161   : > { %v2872_v54 = vmax.f32 %v2842_v53, 0.0  ;;  %v2873_v38 = vmax.f32 %v2843_v55, 0.0  ;;  %v6348_v53 = vmul.f32 %v6175_v30, %v6270_v15  ;;  %v2013_v29 = vadd.f32 %v5966_v9, %v5924_v43 }
 0x162   : > { %v2952_v56 = vsel %vm2925_vm2, %v2874_v50, 0.0  ;;  %8393 = vst [vmem:[#allocation68_spill] sm:$0xff] %v6352_v4  ;;  %v6361_v32 = vsel %vm438_vm0, %v8395_v2, %v1697_v12  ;;  %8397 = vst [vmem:[#allocation71_spill] sm:$0xff] %v6369_v3  ;;  %v2015_v15 = vadd.f32 %v6018_v27, %v5933_v7  ;;  %v2053_v12 = vmul.f32 %v5858_v0, %v5908_v63  ;;  %v8489_v3 = vld [vmem:[#allocation39_spill] sm:$0xff] }
 0x163   : > { %v6344_v31 = vsel %vm6308_vm15, %v2872_v54, 0.0  ;;  %8392 = vst [vmem:[#allocation67_spill] sm:$0xff] %v6348_v53  ;;  %v6356_v55 = vsel %vm6221_vm12, %v2873_v38, 0.0  ;;  %v3012_v16 = vrot.slane %v2952_v56, 1  ;;  %v6365_v54 = vmul.f32 %v5835_v8, %v6326_v25 }
 0x164   : > { %8391 = vst [vmem:[#allocation66_spill] sm:$0xff] %v6344_v31  ;;  %8394 = vst [vmem:[#allocation69_spill] sm:$0xff] %v6356_v55  ;;  %v3009_v50 = vrot.slane %v6344_v31, 1  ;;  %v3010_v40 = vrot.slane %v6356_v55, 1  ;;  %v3097_v23 = vrot.slane %v6344_v31, 2  ;;  %v3098_v38 = vrot.slane %v6356_v55, 2 }
 0x165   : > { %8396 = vst [vmem:[#allocation70_spill] sm:$0xff] %v6365_v54  ;;  %v3100_v4 = vrot.slane %v2952_v56, 2  ;;  %v8398_v56 = vrot.slane %v5977_v28, 1  ;;  %v2231_v43 = vmul.f32 %v5879_v13, %v5908_v63  ;;  %v8400_v7 = vrot.slane %v5981_v17, 2 }
 0x166   : > { %v3011_v18 = vsel %vm438_vm0, %v3009_v50, %v3010_v40  ;;  %v3013_v2 = vsel %vm438_vm0, %v3010_v40, %v3012_v16  ;;  %v3099_v21 = vsel %vm527_vm1, %v3097_v23, %v3098_v38  ;;  %v8399_v50 = vrot.slane %v5947_v37, 1 }
 0x167   : > { %v4534_v53 = vpack.i.bf16 %v3013_v2, %v3011_v18  ;;  %v3101_v39 = vsel %vm527_vm1, %v3098_v38, %v3100_v4  ;;  %v8401_v9 = vrot.slane %v5951_v1, 2  ;;  %v2116_v18 = vrot.slane %v2053_v12, 1 }
 0x168   : > { %v4544_v31 = vpack.i.bf16 %v3101_v39, %v3099_v21  ;;  %v2115_v40 = vsel %vm438_vm0, %v8399_v50, %v8398_v56  ;;  %v2422_v16 = vmul.f32 %v6197_v34, %v5912_v24  ;;  %v2423_v37 = vmul.f32 %v6197_v34, %v5957_v35 }
 0x169   : > { %v2293_v27 = vsel %vm527_vm1, %v8401_v9, %v8400_v7  ;;  %4535 = vrot.lane.b32.xlu0 %v4534_v53, %s4922_s15  ;;  %v2191_v21 = vadd.f32 %v2115_v40, %v2013_v29  ;;  %v2294_v4 = vrot.slane %v2231_v43, 2  ;;  %v2424_v63 = vmul.f32 %v6197_v34, %v5959_v57 }
 0x16a   : > { %v2490_v1 = vmul.f32 %v6175_v30, %v5912_v24  ;;  %v2491_v23 = vmul.f32 %v6175_v30, %v5957_v35  ;;  %v8402_v53 = vmov %v8398_v56  ;;  %v2193_v38 = vadd.f32 %v2116_v18, %v2015_v15 }
 0x16b   : > { %v2117_v29 = vsel %vm438_vm0, %v8402_v53, %v2116_v18  ;;  %v2369_v2 = vadd.f32 %v2293_v27, %v2191_v21  ;;  %v2492_v39 = vmul.f32 %v6175_v30, %v5959_v57  ;;  %v8403_v56 = vmov %v8400_v7  ;;  %v6423_v21 = vpop.permute.xlu1 %1482 }
 0x16c   : > { %v2192_v12 = vadd.f32 %v2117_v29, %v5999_v45  ;;  %v2295_v50 = vsel %vm527_vm1, %v8403_v56, %v2294_v4  ;;  %v2552_v40 = vrot.slane %v2490_v1, 1  ;;  %v2553_v43 = vrot.slane %v2491_v23, 1 }
 0x16d   : > { %4545 = vrot.lane.b32.xlu0 %v4544_v31, %s4912_s20  ;;  %v2371_v7 = vadd.f32 %v2294_v4, %v2193_v38  ;;  %v2452_v9 = vadd.f32 %v2422_v16, %v2369_v2  ;;  %v2555_v28 = vrot.slane %v2492_v39, 1  ;;  %v2668_v15 = vmul.f32 %v6236_v48, %v5912_v24 }
 0x16e   : > { %v2370_v27 = vadd.f32 %v2295_v50, %v2192_v12  ;;  %v2554_v18 = vsel %vm438_vm0, %v2552_v40, %v2553_v43  ;;  %v2669_v45 = vmul.f32 %v6236_v48, %v5957_v35  ;;  %v2670_v17 = vmul.f32 %v6236_v48, %v5959_v57 }
 0x16f   : > { %v2454_v1 = vadd.f32 %v2424_v63, %v2371_v7  ;;  %v2556_v31 = vsel %vm438_vm0, %v2553_v43, %v2555_v28  ;;  %v2630_v4 = vadd.f32 %v2554_v18, %v2452_v9  ;;  %v2730_v16 = vrot.slane %v2668_v15, 2 }
 0x170   : > { %v2453_v53 = vadd.f32 %v2423_v37, %v2370_v27  ;;  %v2731_v24 = vrot.slane %v2669_v45, 2  ;;  %v2733_v29 = vrot.slane %v2670_v17, 2  ;;  %v6431_v35 = vmul.f32 %v5842_v22, %v6326_v25  ;;  %v6441_v37 = vpop.permute.xlu0 %1487 }
 0x171   : > { %v2632_v57 = vadd.f32 %v2555_v28, %v2454_v1  ;;  %v6435_v63 = vmul.f32 %v5858_v0, %v6326_v25  ;;  %v6439_v39 = vmul.f32 %v5835_v8, %v6423_v21  ;;  %v6446_v50 = vmul.f32 %v5842_v22, %v6423_v21 }
 0x172   : > { %8404 = vst [vmem:[#allocation72_spill] sm:$0xff] %v6431_v35  ;;  %v2631_v12 = vadd.f32 %v2556_v31, %v2453_v53  ;;  %v2732_v56 = vsel %vm527_vm1, %v2730_v16, %v2731_v24  ;;  %v2734_v40 = vsel %vm527_vm1, %v2731_v24, %v2733_v29  ;;  %v6451_v9 = vmul.f32 %v5874_v46, %v6326_v25 }
 0x173   : > { %8405 = vst [vmem:[#allocation73_spill] sm:$0xff] %v6439_v39  ;;  %8406 = vst [vmem:[#allocation74_spill] sm:$0xff] %v6446_v50  ;;  %v2808_v43 = vadd.f32 %v2732_v56, %v2630_v4  ;;  %v2810_v7 = vadd.f32 %v2733_v29, %v2632_v57  ;;  %v6455_v28 = vmul.f32 %v5879_v13, %v6326_v25  ;;  %vm3598_vm12 = vcmask 228352  }
 0x174   : > { %8407 = vst [vmem:[#allocation75_spill] sm:$0xff] %v6451_v9  ;;  %v1765_v15 = vadd.f32 %v6361_v32, %v6289_v5  ;;  %v2809_v27 = vadd.f32 %v2734_v40, %v2631_v12  ;;  %v1629_v45 = vmul.f32 %v5835_v8, %v6441_v37  ;;  %v1560_v4 = vmul.f32 %v5848_v60, %v6423_v21 }
 0x175   : > { %8408 = vst [vmem:[#allocation76_spill] sm:$0xff] %v6455_v28  ;;  %v2845_v17 = vadd.f32 %v6282_v44, %v2808_v43  ;;  %v2847_v1 = vadd.f32 %v6282_v44, %v2810_v7  ;;  %v8409_v5 = vrot.slane %v6300_v49, 2  ;;  %v8410_v32 = vrot.slane %v6276_v59, 2 }
 0x176   : > { %v2846_v53 = vadd.f32 %v6282_v44, %v2809_v27  ;;  %v1996_v40 = vmul.f32 %v5874_v46, %v6423_v21  ;;  %v6479_v43 = vmul.f32 %v5858_v0, %v6423_v21  ;;  %v6485_v27 = vmul.f32 %v5879_v13, %v6423_v21 }
 0x177   : > { %v1876_v24 = vsel %vm527_vm1, %v8410_v32, %v8409_v5  ;;  %v2875_v57 = vmax.f32 %v2845_v17, 0.0  ;;  %v2877_v12 = vmax.f32 %v2847_v1, 0.0  ;;  %v1702_v18 = vrot.slane %v1629_v45, 1  ;;  %v6501_v45 = vpop.permute.xlu1 %1492 }
 0x178   : > { %v1943_v56 = vadd.f32 %v1876_v24, %v1765_v15  ;;  %v6481_v7 = vmax.f32 %v2846_v53, 0.0  ;;  %8412 = vst [vmem:[#allocation78_spill] sm:$0xff] %v6485_v27  ;;  %v6499_v24 = vmul.f32 %v5842_v22, %v6441_v37  ;;  %8415 = vst [vmem:[#allocation81_spill] sm:$0xff] %v6501_v45  ;;  %v6511_v38 = vmul.f32 %v5879_v13, %v6441_v37 }
 0x179   : > { %v6489_v5 = vsel %vm2914_vm13, %v2875_v57, 0.0  ;;  %v2955_v15 = vsel %vm2919_vm14, %v2877_v12, 0.0  ;;  %v6507_v12 = vmul.f32 %v5858_v0, %v6441_v37  ;;  %v6525_v35 = vmul.f32 %v5835_v8, %v6501_v45 }
 0x17a   : > { %8411 = vst [vmem:[#allocation77_spill] sm:$0xff] %v6481_v7  ;;  %8413 = vst [vmem:[#allocation79_spill] sm:$0xff] %v6489_v5  ;;  %v3014_v17 = vrot.slane %v6489_v5, 1  ;;  %v3015_v1 = vrot.slane %v6481_v7, 1  ;;  %v3017_v32 = vrot.slane %v2955_v15, 1  ;;  %v4554_v53 = vpack.i.bf16 %v6481_v7, %v6489_v5 }
 0x17b   : > { %8414 = vst [vmem:[#allocation80_spill] sm:$0xff] %v6499_v24  ;;  %v3102_v57 = vrot.slane %v6489_v5, 2  ;;  %v3103_v2 = vrot.slane %v6481_v7, 2  ;;  %v3105_v31 = vrot.slane %v2955_v15, 2  ;;  %8416 = vst [vmem:[#allocation82_spill] sm:$0xff] %v6511_v38  ;;  %v6516_v16 = vadd.f32 %v1996_v40, %v1943_v56 }
 0x17c   : > { %v3016_v23 = vsel %vm438_vm0, %v3014_v17, %v3015_v1  ;;  %v3018_v29 = vsel %vm438_vm0, %v3015_v1, %v3017_v32  ;;  %4555 = vrot.lane.b32.xlu0 %v4554_v53, %s4923_s16  ;;  %v1561_v15 = vmul.f32 %v5848_v60, %v6441_v37  ;;  %v8418_v5 = vrot.slane %v6439_v39, 1  ;;  %8419 = vst [vmem:[#allocation84_spill] sm:$0xff] %v6525_v35  ;;  %v8442_v35 = vld [vmem:[#allocation26_spill] sm:$0xff] }
 0x17d   : > { %8417 = vst [vmem:[#allocation83_spill] sm:$0xff] %v6516_v16  ;;  %v4539_v55 = vpack.i.bf16 %v3018_v29, %v3016_v23  ;;  %v6529_v17 = vmul.f32 %v5842_v22, %v6501_v45  ;;  %v3104_v1 = vsel %vm527_vm1, %v3102_v57, %v3103_v2  ;;  %v3106_v56 = vsel %vm527_vm1, %v3103_v2, %v3105_v31  ;;  %v6564_v2 = vpop.permute.xlu0 %1497  ;;  %v8500_v16 = vld [vmem:[#allocation60_spill] sm:$0xff] }
 0x17e   : > { %v1703_v7 = vsel %vm438_vm0, %v8418_v5, %v1702_v18  ;;  %v6537_v5 = vmul.f32 %v5874_v46, %v6441_v37  ;;  %v6542_v23 = vmul.f32 %v5858_v0, %v6501_v45  ;;  %v6544_v29 = vadd.f32 %v1702_v18, %v1561_v15  ;;  %8426 = vst [vmem:[#allocation91_spill] sm:$0xff] %v6564_v2 }
 0x17f   : > { %8420 = vst [vmem:[#allocation85_spill] sm:$0xff] %v6529_v17  ;;  %4540 = vrot.lane.b32.xlu1 %v4539_v55, %s4922_s15  ;;  %v1768_v31 = vadd.f32 %v1703_v7, %v1560_v4  ;;  %v6550_v57 = vmul.f32 %v6175_v30, %v6441_v37  ;;  %v6554_v40 = vmul.f32 %v5848_v60, %v6501_v45  ;;  %v8427_v4 = vrot.slane %v5918_v61, 1 }
 0x180   : > { %8421 = vst [vmem:[#allocation86_spill] sm:$0xff] %v6537_v5  ;;  %8422 = vst [vmem:[#allocation87_spill] sm:$0xff] %v6542_v23  ;;  %v6558_v32 = vmul.f32 %v5874_v46, %v6501_v45  ;;  %v6560_v54 = vpack.i.bf16 %v3106_v56, %v3104_v1  ;;  %v8428_v7 = vrot.slane %v5930_v14, 1  ;;  %v6579_v56 = vpop.permute.xlu1 %1502  ;;  %v8432_v61 = vrot.slane %v6068_v33, 1  ;;  %4565 = vrot.lane.b32.xlu0 %v4539_v55, %s4913_s21  ;;  %v8444_v23 = vld [vmem:[#allocation31_spill] sm:$0xff] }
 0x181   : > { %8423 = vst [vmem:[#allocation88_spill] sm:$0xff] %v6544_v29  ;;  %8424 = vst [vmem:[#allocation89_spill] sm:$0xff] %v6554_v40  ;;  %v8429_v29 = vrot.slane %v6499_v24, 2  ;;  %v8433_v14 = vrot.slane %v6049_v11, 1  ;;  %v8434_v18 = vrot.slane %v5955_v42, 2  ;;  %v2297_v17 = vrot.slane %v6075_v6, 2 }
 0x182   : > { %8425 = vst [vmem:[#allocation90_spill] sm:$0xff] %v6558_v32  ;;  %v1681_v53 = vsel %vm438_vm0, %v8428_v7, %v8427_v4  ;;  %v8430_v32 = vrot.slane %v6446_v50, 2  ;;  %8431 = vst [vmem:[#allocation92_spill] sm:$0xff] %v6579_v56  ;;  %v2494_v55 = vmul.f32 %v6175_v30, %v6070_v47  ;;  %v1632_v42 = vmul.f32 %v5835_v8, %v6579_v56  ;;  %v8438_v6 = vld [vmem:[#allocation52_spill] sm:$0xff] }
 0x183   : > { %4550 = vrot.lane.b32.xlu1 %v6560_v54, %s4912_s20  ;;  %v1755_v15 = vadd.f32 %v1681_v53, %v5941_v26  ;;  %v2122_v4 = vsel %vm438_vm0, %v8433_v14, %v8432_v61  ;;  %v6597_v26 = vmul.f32 %v5835_v8, %v6564_v2  ;;  %v2296_v61 = vrot.slane %v6035_v51, 2 }
 0x184   : > { %v1881_v1 = vsel %vm527_vm1, %v8430_v32, %v8429_v29  ;;  %v8435_v32 = vrot.slane %v5937_v52, 2  ;;  %v2195_v40 = vadd.f32 %v2122_v4, %v6095_v19  ;;  %v8437_v52 = vrot.slane %v6081_v10, 2  ;;  %4575 = vrot.lane.b32.xlu0 %v6560_v54, %s4924_s17 }
 0x185   : > { %v1946_v7 = vadd.f32 %v1881_v1, %v1768_v31  ;;  %8436 = vst [vmem:[#allocation93_spill] sm:$0xff] %v6597_v26  ;;  %v2493_v19 = vmul.f32 %v6175_v30, %v6014_v62  ;;  %v8439_v1 = vld [vmem:[#allocation27_spill] sm:$0xff]  ;;  %v2426_v51 = vmul.f32 %v6197_v34, %v6070_v47  ;;  %v2558_v4 = vrot.slane %v2494_v55, 1 }
 0x186   : > { %v1859_v29 = vsel %vm527_vm1, %v8435_v32, %v8434_v18  ;;  %v2300_v31 = vsel %vm527_vm1, %v2297_v17, %v8437_v52  ;;  %v6615_v32 = vmul.f32 %v5842_v22, %v6564_v2  ;;  %v8443_v52 = vrot.slane %v8442_v35, 1 }
 0x187   : > { %v1933_v53 = vadd.f32 %v1859_v29, %v1755_v15  ;;  %v2373_v15 = vadd.f32 %v2300_v31, %v2195_v40  ;;  %v8441_v29 = vrot.slane %v6049_v11, 1  ;;  %v2672_v18 = vmul.f32 %v6236_v48, %v6070_v47 }
 0x188   : > { %8440 = vst [vmem:[#allocation52_spill] sm:$0xff] %v6615_v32  ;;  %v6626_v40 = vmul.f32 %v6236_v48, %v8444_v23  ;;  %v2298_v55 = vsel %vm527_vm1, %v2296_v61, %v2297_v17  ;;  %v2557_v50 = vrot.slane %v2493_v19, 1  ;;  %v8445_v11 = vrot.slane %v8438_v6, 1 }
 0x189   : > { %v2016_v14 = vadd.f32 %v8439_v1, %v1933_v53  ;;  %v2120_v24 = vsel %vm438_vm0, %v8443_v52, %v8441_v29  ;;  %v2456_v31 = vadd.f32 %v2426_v51, %v2373_v15  ;;  %v2671_v1 = vmul.f32 %v6236_v48, %v6014_v62 }
 0x18a   : > { %v2561_v35 = vsel %vm438_vm0, %v2558_v4, %v8445_v11  ;;  %v2736_v29 = vrot.slane %v2672_v18, 2  ;;  %v8264_v52 = vrot.slane %v6626_v40, 2  ;;  %v1707_v47 = vrot.slane %v1632_v42, 1 }
 0x18b   : > { %v2194_v53 = vadd.f32 %v2120_v24, %v2016_v14  ;;  %v2425_v5 = vmul.f32 %v6197_v34, %v6014_v62  ;;  %v2634_v24 = vadd.f32 %v2561_v35, %v2456_v31  ;;  %v1999_v17 = vmul.f32 %v5874_v46, %v6564_v2 }
 0x18c   : > { %v6641_v61 = vmul.f32 %v5858_v0, %v6564_v2  ;;  %v2559_v19 = vsel %vm438_vm0, %v2557_v50, %v2558_v4  ;;  %v2739_v18 = vsel %vm527_vm1, %v2736_v29, %v8264_v52  ;;  %v8265_v42 = vrot.slane %v6597_v26, 1  ;;  %v6659_v4 = vpop.permute.xlu0 %1507 }
 0x18d   : > { %v2372_v39 = vadd.f32 %v2298_v55, %v2194_v53  ;;  %v6650_v14 = vmul.f32 %v5842_v22, %v6579_v56  ;;  %v2812_v15 = vadd.f32 %v2739_v18, %v2634_v24  ;;  %v6654_v51 = vmul.f32 %v5879_v13, %v6501_v45  ;;  %8449 = vst [vmem:[#allocation94_spill] sm:$0xff] %v6659_v4  ;;  %v8499_v45 = vld [vmem:[#allocation67_spill] sm:$0xff] }
 0x18e   : > { %8446 = vst [vmem:[#allocation27_spill] sm:$0xff] %v6641_v61  ;;  %v1563_v53 = vmul.f32 %v5848_v60, %v6564_v2  ;;  %v2735_v55 = vrot.slane %v2671_v1, 2  ;;  %v6661_v31 = vadd.f32 %v1999_v17, %v1946_v7  ;;  %v6665_v11 = vmul.f32 %v5879_v13, %v6564_v2 }
 0x18f   : > { %8447 = vst [vmem:[#allocation26_spill] sm:$0xff] %v6650_v14  ;;  %v2455_v62 = vadd.f32 %v2425_v5, %v2372_v39  ;;  %8448 = vst [vmem:[#allocation31_spill] sm:$0xff] %v6654_v51  ;;  %v1708_v39 = vsel %vm438_vm0, %v8265_v42, %v1707_v47  ;;  %v6673_v24 = vmul.f32 %v5858_v0, %v6579_v56  ;;  %v8463_v54 = vrot.slane %v6650_v14, 2  ;;  %v8486_v51 = vld [vmem:[#allocation41_spill] sm:$0xff] }
 0x190   : > { %8450 = vst [vmem:[#allocation95_spill] sm:$0xff] %v6661_v31  ;;  %8451 = vst [vmem:[#allocation96_spill] sm:$0xff] %v6665_v11  ;;  %v2737_v18 = vsel %vm527_vm1, %v2735_v55, %v2736_v29  ;;  %v2849_v7 = vadd.f32 %v6282_v44, %v2812_v15  ;;  %v1564_v1 = vmul.f32 %v5848_v60, %v6579_v56  ;;  %v8455_v29 = vld [vmem:[#allocation30_spill] sm:$0xff]  ;;  %v8288_v38 = vrot.slane %v8499_v45, 1 }
 0x191   : > { %v2633_v5 = vadd.f32 %v2559_v19, %v2455_v62  ;;  %8452 = vst [vmem:[#allocation97_spill] sm:$0xff] %v6673_v24  ;;  %v6682_v42 = vmul.f32 %v5874_v46, %v6579_v56  ;;  %v6686_v19 = vmul.f32 %v5879_v13, %v6579_v56  ;;  %v6688_v62 = vpop.permute.xlu1 %1512  ;;  %v1771_v35 = vadd.f32 %v1708_v39, %v1563_v53  ;;  %v8456_v55 = vld [vmem:[#allocation22_spill] sm:$0xff] }
 0x192   : > { %v8457_v15 = vrot.slane %v8456_v55, 2  ;;  %v6695_v60 = vmul.f32 %v6175_v30, %v6579_v56  ;;  %v6706_v53 = vadd.f32 %v1707_v47, %v1564_v1  ;;  %v6711_v55 = vpop.permute.xlu0 %1517  ;;  %v6716_v26 = vmul.f32 %v5874_v46, %v6659_v4  ;;  %v8491_v56 = vld [vmem:[#allocation50_spill] sm:$0xff] }
 0x193   : > { %v2811_v52 = vadd.f32 %v2737_v18, %v2633_v5  ;;  %8453 = vst [vmem:[#allocation98_spill] sm:$0xff] %v6682_v42  ;;  %8454 = vst [vmem:[#allocation99_spill] sm:$0xff] %v6686_v19  ;;  %v1633_v5 = vmul.f32 %v5835_v8, %v6659_v4  ;;  %v6701_v18 = vmul.f32 %v5842_v22, %v6659_v4  ;;  %v8464_v47 = vrot.slane %v6615_v32, 2 }
 0x194   : > { %v1935_v50 = vadd.f32 %v8457_v15, %v8455_v29  ;;  %8458 = vst [vmem:[#allocation30_spill] sm:$0xff] %v6695_v60  ;;  %8459 = vst [vmem:[#allocation22_spill] sm:$0xff] %v6706_v53  ;;  %v6709_v29 = vmax.f32 %v2849_v7, 0.0  ;;  %v8461_v15 = vld [vmem:[#allocation34_spill] sm:$0xff]  ;;  %v8465_v39 = vrot.slane %v6068_v33, 1  ;;  %v2002_v14 = vmul.f32 %v5874_v46, %v6688_v62 }
 0x195   : > { %v2848_v17 = vadd.f32 %v6282_v44, %v2811_v52  ;;  %8462 = vst [vmem:[#allocation34_spill] sm:$0xff] %v6716_v26  ;;  %v6720_v52 = vmul.f32 %v5835_v8, %v6688_v62  ;;  %v1886_v7 = vsel %vm527_vm1, %v8464_v47, %v8463_v54  ;;  %v1709_v53 = vrot.slane %v1633_v5, 1  ;;  %v8495_v60 = vld [vmem:[#allocation42_spill] sm:$0xff] }
 0x196   : > { %8460 = vst [vmem:[#allocation100_spill] sm:$0xff] %v6709_v29  ;;  %v2018_v42 = vadd.f32 %v8461_v15, %v1935_v50  ;;  %v6730_v50 = vmul.f32 %v5842_v22, %v6688_v62  ;;  %v1949_v15 = vadd.f32 %v1886_v7, %v1771_v35  ;;  %v6742_v54 = vmul.f32 %v5835_v8, %v6711_v55  ;;  %v6768_v7 = vpop.permute.xlu1 %1522 }
 0x197   : > { %v2878_v31 = vmax.f32 %v2848_v17, 0.0  ;;  %v8467_v35 = vrot.slane %v6081_v10, 2  ;;  %v2427_v33 = vmul.f32 %v6197_v34, %v8444_v23  ;;  %v6757_v46 = vmul.f32 %v5879_v13, %v6659_v4  ;;  %8471 = vst [vmem:[#allocation105_spill] sm:$0xff] %v6768_v7  ;;  %v6793_v10 = vld [vmem:[%s8174_s4] ss:$0 sm:$0xff] }
 0x198   : > { %v2196_v17 = vadd.f32 %v8465_v39, %v2018_v42  ;;  %v6762_v5 = vadd.f32 %v2002_v14, %v1949_v15  ;;  %v6766_v23 = vmul.f32 %v5858_v0, %v6688_v62  ;;  %v3020_v15 = vrot.slane %v6709_v29, 1 }
 0x199   : > { %v6736_v26 = vsel %vm2914_vm13, %v2878_v31, 0.0  ;;  %v6753_v31 = vmul.f32 %v5858_v0, %v6659_v4  ;;  %8469 = vst [vmem:[#allocation103_spill] sm:$0xff] %v6757_v46  ;;  %v8472_v0 = vld [vmem:[#allocation23_spill] sm:$0xff]  ;;  %v3108_v42 = vrot.slane %v6709_v29, 2  ;;  %v1565_v8 = vmul.f32 %v6793_v10, %v6659_v4  ;;  %v8477_v46 = vld [vmem:[#allocation25_spill] sm:$0xff] }
 0x19a   : > { %8466 = vst [vmem:[#allocation101_spill] sm:$0xff] %v6736_v26  ;;  %v4559_v22 = vpack.i.bf16 %v6709_v29, %v6736_v26  ;;  %v2374_v47 = vadd.f32 %v8467_v35, %v2196_v17  ;;  %8470 = vst [vmem:[#allocation104_spill] sm:$0xff] %v6762_v5  ;;  %v6775_v17 = vld [vmem:[%s8174_s4 + $0x2] ss:$0 sm:$0xff]  ;;  %v8473_v35 = vrot.slane %v8472_v0, 1  ;;  %v3019_v0 = vrot.slane %v6736_v26, 1 }
 0x19b   : > { %8468 = vst [vmem:[#allocation102_spill] sm:$0xff] %v6753_v31  ;;  %v6779_v14 = vmul.f32 %v6775_v17, %v6711_v55  ;;  %v8481_v29 = vld [vmem:[#allocation24_spill] sm:$0xff]  ;;  %v8484_v4 = vld [vmem:[#allocation45_spill] sm:$0xff]  ;;  %v8487_v24 = vrot.slane %v8486_v51, 1  ;;  %v2428_v2 = vmul.f32 %v6197_v34, %v8495_v60  ;;  %v2496_v51 = vmul.f32 %v6175_v30, %v8495_v60 }
 0x19c   : > { %4560 = vrot.lane.b32.xlu1 %v4559_v22, %s4923_s16  ;;  %v2457_v39 = vadd.f32 %v2427_v33, %v2374_v47  ;;  %4585 = vrot.lane.b32.xlu0 %v4559_v22, %s4914_s22  ;;  %v8474_v47 = vld [vmem:[#allocation21_spill] sm:$0xff]  ;;  %v8476_v22 = vrot.slane %v8438_v6, 1  ;;  %v6805_v6 = vld [vmem:[%s8174_s4 + $0x4] ss:$0 sm:$0xff]  ;;  %v8482_v32 = vrot.slane %v8481_v29, 2  ;;  %v8485_v11 = vrot.slane %v8484_v4, 1 }
 0x19d   : > { %v8475_v33 = vrot.slane %v8474_v47, 1  ;;  %v8478_v47 = vrot.slane %v6720_v52, 1  ;;  %v8488_v49 = vmov %v8487_v24  ;;  %vm3661_vm2 = vcmask 293888  }
 0x19e   : > { %v2635_v13 = vadd.f32 %v8476_v22, %v2457_v39  ;;  %v6809_v39 = vmul.f32 %v6805_v6, %v6768_v7  ;;  %v2127_v61 = vsel %vm438_vm0, %v8487_v24, %v8485_v11  ;;  %v8496_v11 = vld [vmem:[#allocation46_spill] sm:$0xff] }
 0x19f   : > { %v1686_v1 = vsel %vm438_vm0, %v8475_v33, %v8473_v35  ;;  %v1711_v35 = vsel %vm438_vm0, %v1709_v53, %v8478_v47  ;;  %v8479_v33 = vld [vmem:[#allocation28_spill] sm:$0xff]  ;;  %v3107_v53 = vrot.slane %v6736_v26, 2 }
 0x1a0   : > { %v1758_v5 = vadd.f32 %v1686_v1, %v8477_v46  ;;  %v8480_v22 = vrot.slane %v8479_v33, 2  ;;  %v8483_v46 = vrot.slane %v6626_v40, 2  ;;  %v8490_v33 = vrot.slane %v8489_v3, 1 }
 0x1a2   : > { %v1864_v1 = vsel %vm527_vm1, %v8482_v32, %v8480_v22  ;;  %v2813_v19 = vadd.f32 %v8483_v46, %v2635_v13  ;;  %v2125_v29 = vsel %vm438_vm0, %v8490_v33, %v8488_v49  ;;  %v2198_v32 = vadd.f32 %v2127_v61, %v8491_v56  ;;  %v8492_v22 = vld [vmem:[#allocation43_spill] sm:$0xff]  ;;  %v8493_v13 = vld [vmem:[#allocation48_spill] sm:$0xff]  ;;  %v8498_v61 = vld [vmem:[#allocation58_spill] sm:$0xff] }
 0x1a3   : > { %v1936_v47 = vadd.f32 %v1864_v1, %v1758_v5  ;;  %v2301_v40 = vrot.slane %v8492_v22, 2  ;;  %v2302_v46 = vrot.slane %v8493_v13, 2  ;;  %v8494_v1 = vld [vmem:[#allocation38_spill] sm:$0xff]  ;;  %v8497_v49 = vrot.slane %v8496_v11, 2 }
 0x1a4   : > { %v2850_v5 = vadd.f32 %v6282_v44, %v2813_v19  ;;  %v2429_v24 = vmul.f32 %v6197_v34, %v8498_v61  ;;  %v2497_v19 = vmul.f32 %v6175_v30, %v8498_v61  ;;  %v2562_v13 = vrot.slane %v2496_v51, 1 }
 0x1a5   : > { %v2019_v26 = vadd.f32 %v8494_v1, %v1936_v47  ;;  %v2303_v3 = vsel %vm527_vm1, %v2301_v40, %v2302_v46  ;;  %v2305_v56 = vsel %vm527_vm1, %v2302_v46, %v8497_v49  ;;  %v2674_v40 = vmul.f32 %v6236_v48, %v8495_v60 }
 0x1a6   : > { %v2880_v33 = vmax.f32 %v2850_v5, 0.0  ;;  %v2376_v22 = vadd.f32 %v2305_v56, %v2198_v32  ;;  %v2563_v1 = vrot.slane %v2497_v19, 1  ;;  %v2675_v28 = vmul.f32 %v6236_v48, %v8498_v61  ;;  %v6858_v32 = vpop.permute.xlu0 %1527 }
 0x1a7   : > { %v2197_v47 = vadd.f32 %v2125_v29, %v2019_v26  ;;  %v6855_v5 = vmul.f32 %v6236_v48, %v8500_v16  ;;  %v3021_v26 = vsel %vm438_vm0, %v3019_v0, %v3020_v15  ;;  %v2740_v19 = vrot.slane %v2674_v40, 2  ;;  %v6889_v40 = vpop.permute.xlu1 %1532 }
 0x1a8   : > { %v2958_v46 = vsel %vm2919_vm14, %v2880_v33, 0.0  ;;  %v2459_v9 = vadd.f32 %v2429_v24, %v2376_v22  ;;  %v2566_v60 = vsel %vm438_vm0, %v2563_v1, %v8288_v38  ;;  %v2741_v33 = vrot.slane %v2675_v28, 2 }
 0x1a9   : > { %v2375_v49 = vadd.f32 %v2303_v3, %v2197_v47  ;;  %v3022_v29 = vrot.slane %v2958_v46, 1  ;;  %v3110_v51 = vrot.slane %v2958_v46, 2  ;;  %v1773_v24 = vadd.f32 %v1711_v35, %v1565_v8  ;;  %v8512_v8 = vld [vmem:[#allocation29_spill] sm:$0xff] }
 0x1aa   : > { %v2637_v61 = vadd.f32 %v2566_v60, %v2459_v9  ;;  %v2564_v47 = vsel %vm438_vm0, %v2562_v13, %v2563_v1  ;;  %v8289_v22 = vrot.slane %v6855_v5, 2  ;;  %v6870_v46 = vmul.f32 %v6805_v6, %v6858_v32 }
 0x1ab   : > { %v2458_v56 = vadd.f32 %v2428_v2, %v2375_v49  ;;  %v3023_v3 = vsel %vm438_vm0, %v3020_v15, %v3022_v29  ;;  %v3109_v38 = vsel %vm527_vm1, %v3107_v53, %v3108_v42  ;;  %v3111_v9 = vsel %vm527_vm1, %v3108_v42, %v3110_v51  ;;  %v6901_v29 = vld [vmem:[%s8174_s4 + $0x5] ss:$0 sm:$0xff] }
 0x1ac   : > { %v6866_v0 = vpack.i.bf16 %v3023_v3, %v3021_v26  ;;  %v2742_v28 = vsel %vm527_vm1, %v2740_v19, %v2741_v33  ;;  %v2744_v2 = vsel %vm527_vm1, %v2741_v33, %v8289_v22  ;;  %v8501_v15 = vrot.slane %v6730_v50, 2  ;;  %v6894_v26 = vld [vmem:[%s8174_s4 + $0x3] ss:$0 sm:$0xff] }
 0x1ad   : > { %v2636_v27 = vadd.f32 %v2564_v47, %v2458_v56  ;;  %v8502_v35 = vrot.slane %v6701_v18, 2  ;;  %v2815_v53 = vadd.f32 %v2744_v2, %v2637_v61  ;;  %v1890_v1 = vrot.slane %v6779_v14, 2 }
 0x1ae   : > { %4570 = vrot.lane.b32.xlu1 %v6866_v0, %s4913_s21  ;;  %4595 = vrot.lane.b32.xlu0 %v6866_v0, %s4925_s18  ;;  %v2004_v18 = vmul.f32 %v6894_v26, %v6768_v7  ;;  %v6905_v14 = vpack.i.bf16 %v3111_v9, %v3109_v38  ;;  %v8503_v56 = vrot.slane %v6742_v54, 1  ;;  %v8504_v61 = vrot.slane %v6720_v52, 1 }
 0x1af   : > { %v1889_v13 = vsel %vm527_vm1, %v8502_v35, %v8501_v15  ;;  %v2814_v42 = vadd.f32 %v2742_v28, %v2636_v27  ;;  %v2250_v27 = vmul.f32 %v6901_v29, %v6768_v7  ;;  %v2852_v60 = vadd.f32 %v6282_v44, %v2815_v53 }
 0x1b0   : > { %v1951_v49 = vadd.f32 %v1889_v13, %v1773_v24  ;;  %v1713_v19 = vsel %vm438_vm0, %v8504_v61, %v8503_v56  ;;  %v2148_v33 = vrot.slane %v6809_v39, 1  ;;  %v2149_v3 = vrot.slane %v6870_v46, 1 }
 0x1b1   : > { %v2851_v51 = vadd.f32 %v6282_v44, %v2814_v42  ;;  %v6918_v24 = vmul.f32 %v6901_v29, %v6858_v32  ;;  %v1566_v38 = vmul.f32 %v6793_v10, %v6688_v62  ;;  %v6924_v9 = vmax.f32 %v2852_v60, 0.0 }
 0x1b2   : > { %4580 = vrot.lane.b32.xlu1 %v6905_v14, %s4924_s17  ;;  %v2074_v52 = vmul.f32 %v6805_v6, %v6889_v40  ;;  %v1567_v39 = vmul.f32 %v6793_v10, %v6711_v55  ;;  %v6933_v28 = vmul.f32 %v6901_v29, %v6688_v62  ;;  %v2034_v2 = vadd.f32 %v2004_v18, %v1951_v49 }
 0x1b3   : > { %v2881_v47 = vmax.f32 %v2851_v51, 0.0  ;;  %8505 = vst [vmem:[#allocation23_spill] sm:$0xff] %v6924_v9  ;;  %v1774_v15 = vadd.f32 %v1713_v19, %v1566_v38  ;;  %v6937_v35 = vmul.f32 %v6805_v6, %v6711_v55  ;;  %v8508_v42 = vmov %v8503_v56  ;;  %v6952_v56 = vpop.permute.xlu0 %1961  ;;  %4605 = vrot.lane.b32.xlu0 %v6905_v14, %s4916_s23 }
 0x1b4   : > { %8506 = vst [vmem:[#allocation21_spill] sm:$0xff] %v6933_v28  ;;  %v1775_v53 = vadd.f32 %v8508_v42, %v1567_v39  ;;  %v2006_v51 = vmul.f32 %v6894_v26, %v6889_v40  ;;  %v6949_v60 = vmul.f32 %v6901_v29, %v6711_v55  ;;  %v2150_v49 = vsel %vm438_vm0, %v2148_v33, %v2149_v3 }
 0x1b5   : > { %v6941_v13 = vsel %vm2914_vm13, %v2881_v47, 0.0  ;;  %v2326_v18 = vrot.slane %v2250_v27, 2  ;;  %v2327_v19 = vrot.slane %v6918_v24, 2  ;;  %v2151_v54 = vrot.slane %v2074_v52, 1  ;;  %v8511_v27 = vld [vmem:[#allocation36_spill] sm:$0xff] }
 0x1b6   : > { %8507 = vst [vmem:[#allocation25_spill] sm:$0xff] %v6941_v13  ;;  %8509 = vst [vmem:[#allocation28_spill] sm:$0xff] %v6949_v60  ;;  %v6956_v61 = vpack.i.bf16 %v6924_v9, %v6941_v13  ;;  %v8510_v38 = vrot.slane %v6730_v50, 2  ;;  %v1953_v39 = vadd.f32 %v1890_v1, %v1775_v53  ;;  %v2212_v42 = vadd.f32 %v2150_v49, %v2034_v2 }
 0x1b7   : > { %v8513_v46 = vrot.slane %v8512_v8, 2  ;;  %v6969_v28 = vmul.f32 %v6894_v26, %v6711_v55  ;;  %v6973_v24 = vmul.f32 %v6175_v30, %v6711_v55  ;;  %v2252_v50 = vmul.f32 %v6901_v29, %v6889_v40  ;;  %v1972_v52 = vpop.permute.xlu0 %1971 }
 0x1b8   : > { %v1891_v47 = vsel %vm527_vm1, %v8510_v38, %v1890_v1  ;;  %4590 = vrot.lane.b32.xlu1 %v6956_v61, %s4914_s22  ;;  %v2036_v1 = vadd.f32 %v2006_v51, %v1953_v39  ;;  %v6980_v2 = vmul.f32 %v6175_v30, %v6952_v56  ;;  %v2005_v8 = vmul.f32 %v6894_v26, %v6858_v32  ;;  %v6993_v38 = vpop.permute.xlu1 %1966 }
 0x1b9   : > { %v1952_v33 = vadd.f32 %v1891_v47, %v1774_v15  ;;  %v1938_v22 = vadd.f32 %v8513_v46, %v8511_v27  ;;  %8514 = vst [vmem:[#allocation24_spill] sm:$0xff] %v6969_v28  ;;  %v8516_v46 = vld [vmem:[#allocation51_spill] sm:$0xff]  ;;  %v2328_v49 = vsel %vm527_vm1, %v2326_v18, %v2327_v19  ;;  %v6991_v51 = vmul.f32 %v6236_v48, %v6952_v56 }
 0x1ba   : > { %8515 = vst [vmem:[#allocation45_spill] sm:$0xff] %v6980_v2  ;;  %v2152_v47 = vsel %vm438_vm0, %v2149_v3, %v2151_v54  ;;  %v2390_v39 = vadd.f32 %v2328_v49, %v2212_v42  ;;  %v8518_v28 = vrot.slane %v8484_v4, 1  ;;  %v7002_v18 = vmul.f32 %v6175_v30, %v6889_v40  ;;  %v4867_v49 = vld [vmem:[%s8174_s4 + $0x1] ss:$0 sm:$0xff] }
 0x1bb   : > { %v2021_v15 = vadd.f32 %v8516_v46, %v1938_v22  ;;  %8517 = vst [vmem:[#allocation41_spill] sm:$0xff] %v6991_v51  ;;  %v2035_v27 = vadd.f32 %v2005_v8, %v1952_v33  ;;  %v2430_v22 = vmul.f32 %v6197_v34, %v8500_v16  ;;  %v2443_v46 = vmul.f32 %v6197_v34, %v6952_v56 }
 0x1bc   : > { %8519 = vst [vmem:[#allocation39_spill] sm:$0xff] %v7002_v18  ;;  %v2329_v53 = vrot.slane %v2252_v50, 2  ;;  %v2214_v60 = vadd.f32 %v2151_v54, %v2036_v1  ;;  %v8521_v16 = vrot.slane %v8496_v11, 2  ;;  %v7020_v50 = vmul.f32 %v6236_v48, %v6993_v38 }
 0x1bd   : > { %v2199_v31 = vadd.f32 %v8518_v28, %v2021_v15  ;;  %v2213_v4 = vadd.f32 %v2152_v47, %v2035_v27  ;;  %v7013_v28 = vmul.f32 %v6175_v30, %v6993_v38  ;;  %v2513_v54 = vmul.f32 %v6175_v30, %v1972_v52 }
 0x1be   : > { %8522 = vst [vmem:[#allocation43_spill] sm:$0xff] %v7020_v50  ;;  %v2691_v1 = vmul.f32 %v6236_v48, %v1972_v52  ;;  %v7024_v8 = vadd.f32 %v2443_v46, %v2390_v39  ;;  %v1636_v11 = vmul.f32 %v4867_v49, %v6768_v7  ;;  %v2330_v47 = vsel %vm527_vm1, %v2327_v19, %v2329_v53 }
 0x1bf   : > { %8520 = vst [vmem:[#allocation50_spill] sm:$0xff] %v7013_v28  ;;  %v2377_v42 = vadd.f32 %v8521_v16, %v2199_v31  ;;  %v7031_v31 = vmul.f32 %v4867_v49, %v6858_v32  ;;  %v2392_v27 = vadd.f32 %v2329_v53, %v2214_v60  ;;  %v7035_v16 = vmul.f32 %v6805_v6, %v1972_v52 }
 0x1c0   : > { %8523 = vst [vmem:[#allocation48_spill] sm:$0xff] %v7024_v8  ;;  %v2391_v48 = vadd.f32 %v2330_v47, %v2213_v4  ;;  %v8524_v46 = vrot.slane %v8499_v45, 1  ;;  %v8294_v33 = vrot.slane %v7020_v50, 2  ;;  %v2445_v3 = vmul.f32 %v6197_v34, %v1972_v52 }
 0x1c1   : > { %v2460_v15 = vadd.f32 %v2430_v22, %v2377_v42  ;;  %v7040_v22 = vmul.f32 %v6901_v29, %v1972_v52  ;;  %v2590_v51 = vrot.slane %v2513_v54, 1  ;;  %v2768_v19 = vrot.slane %v2691_v1, 2 }
 0x1c2   : > { %v2444_v60 = vmul.f32 %v6197_v34, %v6993_v38  ;;  %v8525_v53 = vrot.slane %v6855_v5, 2  ;;  %v1714_v47 = vrot.slane %v1636_v11, 1  ;;  %v8298_v30 = vrot.slane %v7031_v31, 1 }
 0x1c3   : > { %v2638_v42 = vadd.f32 %v8524_v46, %v2460_v15  ;;  %v7052_v39 = vmul.f32 %v6894_v26, %v1972_v52  ;;  %v2475_v15 = vadd.f32 %v2445_v3, %v2392_v27  ;;  %v1814_v46 = vmul.f32 %v6775_v17, %v6768_v7 }
 0x1c4   : > { %v2474_v54 = vadd.f32 %v2444_v60, %v2391_v48  ;;  %v7061_v5 = vmul.f32 %v6775_v17, %v6858_v32  ;;  %v8526_v11 = vrot.slane %v7013_v28, 1  ;;  %v2769_v3 = vsel %vm527_vm1, %v8294_v33, %v2768_v19 }
 0x1c5   : > { %v2816_v4 = vadd.f32 %v8525_v53, %v2638_v42  ;;  %v3024_v27 = vrot.slane %v6941_v13, 1  ;;  %v3025_v48 = vrot.slane %v6924_v9, 1  ;;  %v1568_v60 = vmul.f32 %v6793_v10, %v6768_v7 }
 0x1c6   : > { %v2591_v52 = vsel %vm438_vm0, %v8526_v11, %v2590_v51  ;;  %v2076_v53 = vmul.f32 %v6805_v6, %v6993_v38  ;;  %v2653_v11 = vadd.f32 %v2590_v51, %v2475_v15  ;;  %v1892_v1 = vrot.slane %v1814_v46, 2 }
 0x1c7   : > { %v2853_v34 = vadd.f32 %v6282_v44, %v2816_v4  ;;  %v1716_v4 = vsel %vm438_vm0, %v1714_v47, %v8298_v30  ;;  %v2254_v33 = vmul.f32 %v6901_v29, %v6993_v38  ;;  %v1638_v45 = vmul.f32 %v4867_v49, %v6889_v40 }
 0x1c8   : > { %v3112_v8 = vrot.slane %v6941_v13, 2  ;;  %v3113_v2 = vrot.slane %v6924_v9, 2  ;;  %v2652_v28 = vadd.f32 %v2591_v52, %v2474_v54  ;;  %v3026_v18 = vsel %vm438_vm0, %v3024_v27, %v3025_v48  ;;  %v2401_v52 = vpop.permute.xlu1 %2400 }
 0x1c9   : > { %v2883_v42 = vmax.f32 %v2853_v34, 0.0  ;;  %v1776_v51 = vadd.f32 %v1716_v4, %v1568_v60  ;;  %v2075_v15 = vmul.f32 %v6805_v6, %v6952_v56  ;;  %v2253_v49 = vmul.f32 %v6901_v29, %v6952_v56 }
 0x1ca   : > { %v3114_v46 = vsel %vm527_vm1, %v3112_v8, %v3113_v2  ;;  %v2154_v50 = vrot.slane %v2076_v53, 1  ;;  %v2332_v13 = vrot.slane %v2254_v33, 2  ;;  %v1717_v7 = vrot.slane %v1638_v45, 1 }
 0x1cb   : > { %v2961_v34 = vsel %vm2919_vm14, %v2883_v42, 0.0  ;;  %v2831_v9 = vadd.f32 %v2768_v19, %v2653_v11  ;;  %v8527_v27 = vrot.slane %v7061_v5, 2  ;;  %v7101_v29 = vmul.f32 %v6775_v17, %v6889_v40  ;;  %v7116_v17 = vld [vmem:[%s8174_s4 + $0x6] ss:$0 sm:$0xff] }
 0x1cc   : > { %v3027_v47 = vrot.slane %v2961_v34, 1  ;;  %v3115_v42 = vrot.slane %v2961_v34, 2  ;;  %v1570_v33 = vmul.f32 %v6793_v10, %v6889_v40  ;;  %v7107_v19 = vadd.f32 %v2769_v3, %v2652_v28  ;;  %v7124_v28 = vld [vmem:[%s8174_s4 + $0x7] ss:$0 sm:$0xff] }
 0x1cd   : > { %v1894_v60 = vsel %vm527_vm1, %v1892_v1, %v8527_v27  ;;  %v7119_v45 = vmul.f32 %v7116_v17, %v2401_v52  ;;  %v7127_v1 = vmul.f32 %v7124_v28, %v2401_v52  ;;  %v7140_v53 = vadd.f32 %v6282_v44, %v2831_v9 }
 0x1ce   : > { %v3028_v30 = vsel %vm438_vm0, %v3025_v48, %v3027_v47  ;;  %v3116_v6 = vsel %vm527_vm1, %v3113_v2, %v3115_v42  ;;  %v1954_v4 = vadd.f32 %v1894_v60, %v1776_v51  ;;  %v2331_v2 = vrot.slane %v2253_v49, 2  ;;  %v4859_v49 = vld [vmem:[%s8176_s6] sm:$0xff]   ;;  %v8532_v60 = vld [vmem:[#allocation32_spill] sm:$0xff] }
 0x1cf   : > { %v7093_v54 = vpack.i.bf16 %v3028_v30, %v3026_v18  ;;  %v7103_v8 = vpack.i.bf16 %v3116_v6, %v3114_v46  ;;  %v2007_v18 = vmul.f32 %v6894_v26, %v6952_v56  ;;  %v2153_v30 = vrot.slane %v2075_v15, 1  ;;  %v7132_v56 = vld [vmem:[%s8174_s4 + $0x8] ss:$0 sm:$0xff]  ;;  %4130 = vmatprep.subr.bf16.mxu1 %v4859_v49 }
 0x1d0   : > { %v7135_v3 = vmul.f32 %v7132_v56, %v2401_v52  ;;  %v1778_v48 = vadd.f32 %v1717_v7, %v1570_v33  ;;  %v7144_v34 = vsel %vm527_vm1, %v2331_v2, %v2332_v13  ;;  %v1569_v51 = vmul.f32 %v6793_v10, %v6858_v32  ;;  %v8530_v10 = vld [vmem:[#allocation37_spill] sm:$0xff]  ;;  %4131 = vmatpush3.bf16.msra.mxu1 %v4859_v49 }
 0x1d1   : > { %4600 = vrot.lane.b32.xlu1 %v7093_v54, %s4925_s18  ;;  %4615 = vrot.lane.b32.xlu0 %v7103_v8, %s4916_s23  ;;  %v2155_v11 = vsel %vm438_vm0, %v2153_v30, %v2154_v50  ;;  %v2037_v47 = vadd.f32 %v2007_v18, %v1954_v4  ;;  %v1895_v15 = vrot.slane %v7101_v29, 2  ;;  %v7154_v46 = vmul.f32 %v6894_v26, %v6993_v38  ;;  %v8536_v18 = vld [vmem:[#allocation40_spill] sm:$0xff]  ;;  %v8538_v30 = vld [vmem:[#allocation33_spill] sm:$0xff] }
 0x1d2   : > { %v8528_v44 = vrot.slane %v7035_v16, 1  ;;  %v8529_v42 = vrot.slane %v7040_v22, 2  ;;  %v8531_v27 = vrot.slane %v8530_v10, 1  ;;  %v8533_v6 = vrot.slane %v8532_v60, 1  ;;  %v8543_v10 = vld [vmem:[#allocation63_spill] sm:$0xff]  ;;  %v8545_v60 = vld [vmem:[#allocation57_spill] sm:$0xff] }
 0x1d3   : > { %v7173_v38 = vadd.f32 %v2155_v11, %v2037_v47  ;;  %v8534_v4 = vrot.slane %v7031_v31, 1  ;;  %v1956_v29 = vadd.f32 %v1895_v15, %v1778_v48  ;;  %v8539_v2 = vrot.slane %v8538_v30, 2  ;;  %v8541_v11 = vld [vmem:[#allocation61_spill] sm:$0xff] }
 0x1d4   : > { %v7159_v9 = vsel %vm438_vm0, %v2154_v50, %v8528_v44  ;;  %v7164_v52 = vsel %vm527_vm1, %v2332_v13, %v8529_v42  ;;  %v1691_v26 = vsel %vm438_vm0, %v8533_v6, %v8531_v27  ;;  %v8535_v13 = vld [vmem:[#allocation35_spill] sm:$0xff]  ;;  %v8540_v42 = vrot.slane %v6335_v20, 1  ;;  %v8544_v27 = vld [vmem:[#allocation64_spill] sm:$0xff] }
 0x1d5   : > { %4610 = vrot.lane.b32.xlu1 %v6866_v0, %s4922_s15  ;;  %v1718_v50 = vsel %vm438_vm0, %v8534_v4, %v1717_v7  ;;  %4625 = vrot.lane.b32.xlu0 %v6905_v14, %s4912_s20  ;;  %v1761_v33 = vadd.f32 %v1691_v26, %v8535_v13  ;;  %v8537_v0 = vrot.slane %v8536_v18, 2  ;;  %v8542_v47 = vrot.slane %v8541_v11, 1  ;;  %v4860_v26 = vld [vmem:[%s8176_s6 + $0x8] sm:$0xff]  }
 0x1d6   : > { %v2307_v7 = vrot.slane %v8543_v10, 2  ;;  %v2306_v6 = vrot.slane %v8545_v60, 2  ;;  %v1777_v4 = vadd.f32 %v1718_v50, %v1569_v51  ;;  %v8546_v13 = vrot.slane %v6340_v58, 2  ;;  %v8549_v50 = vld [vmem:[#allocation56_spill] sm:$0xff]  ;;  %4132 = vmatprep.subr.bf16.mxu1 %v4860_v26 }
 0x1d7   : > { %v1869_v44 = vsel %vm527_vm1, %v8539_v2, %v8537_v0  ;;  %v2132_v31 = vsel %vm438_vm0, %v8542_v47, %v8540_v42  ;;  %v2039_v0 = vadd.f32 %v7052_v39, %v1956_v29  ;;  %v2432_v2 = vmul.f32 %v7116_v17, %v6423_v21  ;;  %4133 = vmatpush3.bf16.msra.mxu1 %v4860_v26 }
 0x1d8   : > { %v1939_v48 = vadd.f32 %v1869_v44, %v1761_v33  ;;  %v2201_v14 = vadd.f32 %v2132_v31, %v8544_v27  ;;  %v2310_v18 = vsel %vm527_vm1, %v2307_v7, %v8546_v13  ;;  %v8547_v33 = vld [vmem:[#allocation55_spill] sm:$0xff]  ;;  %v8548_v51 = vmov %v8542_v47 }
 0x1d9   : > { %4620 = vrot.lane.b32.xlu1 %v7093_v54, %s4922_s15  ;;  %4635 = vrot.lane.b32.xlu0 %v6956_v61, %s4923_s16  ;;  %v8550_v44 = vrot.slane %v8549_v50, 1  ;;  %v2499_v47 = vmul.f32 %v7124_v28, %v6326_v25  ;;  %v2500_v39 = vmul.f32 %v7124_v28, %v6423_v21  ;;  %v2570_v61 = vrot.slane %v6550_v57, 1  ;;  %v8555_v50 = vld [vmem:[#allocation44_spill] sm:$0xff] }
 0x1da   : > { %v2022_v30 = vadd.f32 %v8547_v33, %v1939_v48  ;;  %v2379_v49 = vadd.f32 %v2310_v18, %v2201_v14  ;;  %v2308_v31 = vsel %vm527_vm1, %v2306_v6, %v2307_v7  ;;  %v2677_v11 = vmul.f32 %v7132_v56, %v6326_v25 }
 0x1db   : > { %v2130_v42 = vsel %vm438_vm0, %v8550_v44, %v8548_v51  ;;  %v2567_v27 = vrot.slane %v2499_v47, 1  ;;  %v2568_v14 = vrot.slane %v2500_v39, 1  ;;  %v2678_v60 = vmul.f32 %v7132_v56, %v6423_v21  ;;  %v8554_v51 = vld [vmem:[#allocation54_spill] sm:$0xff] }
 0x1dc   : > { %v2200_v29 = vadd.f32 %v2130_v42, %v2022_v30  ;;  %v2462_v10 = vadd.f32 %v2432_v2, %v2379_v49  ;;  %v7229_v13 = vmul.f32 %v7132_v56, %v6441_v37  ;;  %v8552_v7 = vrot.slane %v7061_v5, 2  ;;  %v7240_v49 = vpop.permute.xlu1 %2410 }
 0x1dd   : > { %4630 = vrot.lane.b32.xlu1 %v7103_v8, %s4912_s20  ;;  %v8553_v26 = vrot.slane %v7035_v16, 1  ;;  %4645 = vrot.lane.b32.xlu0 %v7093_v54, %s4913_s21  ;;  %v2431_v30 = vmul.f32 %v7116_v17, %v6326_v25  ;;  %v2569_v21 = vsel %vm438_vm0, %v2567_v27, %v2568_v14  ;;  %v2571_v5 = vsel %vm438_vm0, %v2568_v14, %v2570_v61  ;;  %v8560_v27 = vld [vmem:[#allocation47_spill] sm:$0xff] }
 0x1de   : > { %v7221_v48 = vpop.f32.mrb[0].mxu0  ;;  %v1896_v6 = vsel %vm527_vm1, %v8552_v7, %v1895_v15  ;;  %v2378_v33 = vadd.f32 %v2308_v31, %v2200_v29  ;;  %v2746_v2 = vrot.slane %v2678_v60, 2  ;;  %v2748_v15 = vrot.slane %v7229_v13, 2  ;;  %v8558_v29 = vld [vmem:[#allocation59_spill] sm:$0xff] }
 0x1df   : > { %8551 = vst [vmem:[#allocation38_spill] sm:$0xff] %v7221_v48  ;;  %v2217_v18 = vadd.f32 %v8553_v26, %v2039_v0  ;;  %v2640_v0 = vadd.f32 %v2571_v5, %v2462_v10  ;;  %v8556_v54 = vrot.slane %v8555_v50, 2  ;;  %v7250_v42 = vpop.f32.mrb[1].mxu0  ;;  %v1955_v25 = vadd.f32 %v1896_v6, %v1777_v4  ;;  %v8563_v4 = vld [vmem:[#allocation65_spill] sm:$0xff] }
 0x1e0   : > { %v2461_v16 = vadd.f32 %v2431_v30, %v2378_v33  ;;  %8557 = vst [vmem:[#allocation42_spill] sm:$0xff] %v7250_v42  ;;  %v2745_v47 = vrot.slane %v2677_v11, 2  ;;  %v2749_v39 = vsel %vm527_vm1, %v2746_v2, %v2748_v15  ;;  %v8559_v31 = vrot.slane %v8558_v29, 1  ;;  %v7258_v60 = vpop.f32.mrb[2].mxu0  ;;  %v8566_v50 = vld [vmem:[#allocation53_spill] sm:$0xff]  ;;  %v7273_v29 = vpop.permute.xlu0 %2405 }
 0x1e1   : > { %v1941_v44 = vadd.f32 %v8556_v54, %v8554_v51  ;;  %v8561_v7 = vrot.slane %v8560_v27, 1  ;;  %8562 = vst [vmem:[#allocation46_spill] sm:$0xff] %v7258_v60  ;;  %v2448_v10 = vmul.f32 %v7116_v17, %v7240_v49  ;;  %v2818_v26 = vadd.f32 %v2749_v39, %v2640_v0  ;;  %4655 = vrot.lane.b32.xlu0 %v7103_v8, %s4924_s17  ;;  %v7265_v6 = vpop.f32.mrb[3].mxu0  ;;  %v7278_v8 = vld [vmem:[%s8175_s5] ss:$0 sm:$0xff]  ;;  %v8569_v0 = vld [vmem:[#allocation49_spill] sm:$0xff] }
 0x1e2   : > { %v2639_v13 = vadd.f32 %v2569_v21, %v2461_v16  ;;  %8564 = vst [vmem:[#allocation58_spill] sm:$0xff] %v7265_v6  ;;  %v8565_v33 = vrot.slane %v7040_v22, 2  ;;  %v2747_v5 = vsel %vm527_vm1, %v2745_v47, %v2746_v2  ;;  %v2433_v51 = vmul.f32 %v7116_v17, %v6441_v37  ;;  %v8632_v48 = vld [vmem:[#allocation93_spill] sm:$0xff] }
 0x1e3   : > { %v1696_v14 = vsel %vm438_vm0, %v8561_v7, %v8559_v31  ;;  %v2024_v11 = vadd.f32 %v8563_v4, %v1941_v44  ;;  %v2855_v16 = vadd.f32 %v7278_v8, %v2818_v26  ;;  %v8567_v22 = vrot.slane %v6335_v20, 1 }
 0x1e4   : > { %v2395_v30 = vadd.f32 %v8565_v33, %v2217_v18  ;;  %v1764_v54 = vadd.f32 %v1696_v14, %v8566_v50  ;;  %v2817_v21 = vadd.f32 %v2747_v5, %v2639_v13  ;;  %v8568_v2 = vrot.slane %v6276_v59, 2  ;;  %v8576_v59 = vld [vmem:[#allocation78_spill] sm:$0xff]  ;;  %v8578_v50 = vld [vmem:[#allocation83_spill] sm:$0xff] }
 0x1e5   : > { %v2202_v18 = vadd.f32 %v8567_v22, %v2024_v11  ;;  %v8570_v44 = vrot.slane %v8569_v0, 2  ;;  %v8572_v31 = vrot.slane %v6479_v43, 1  ;;  %v8573_v27 = vrot.slane %v6435_v63, 1  ;;  %v8579_v43 = vld [vmem:[#allocation75_spill] sm:$0xff]  ;;  %v8580_v0 = vld [vmem:[#allocation76_spill] sm:$0xff] }
 0x1e6   : > { %v7288_v47 = vpop.f32.mrb[4].mxu0  ;;  %v8574_v14 = vrot.slane %v6507_v12, 1  ;;  %v2312_v26 = vrot.slane %v8576_v59, 2  ;;  %v2854_v4 = vadd.f32 %v7278_v8, %v2817_v21  ;;  %v7302_v11 = vmax.f32 %v2855_v16, 0.0 }
 0x1e7   : > { %v1874_v37 = vsel %vm527_vm1, %v8570_v44, %v8568_v2  ;;  %8571 = vst [vmem:[#allocation67_spill] sm:$0xff] %v7288_v47  ;;  %v2135_v7 = vsel %vm438_vm0, %v8573_v27, %v8572_v31  ;;  %v8575_v20 = vmov %v8572_v31  ;;  %v8577_v33 = vrot.slane %v6340_v58, 2  ;;  %v8582_v27 = vld [vmem:[#allocation82_spill] sm:$0xff] }
 0x1e8   : > { %v1942_v39 = vadd.f32 %v1874_v37, %v1764_v54  ;;  %v2137_v13 = vsel %vm438_vm0, %v8575_v20, %v8574_v14  ;;  %v7308_v63 = vadd.f32 %v7154_v46, %v1955_v25  ;;  %v7312_v22 = vmul.f32 %v7124_v28, %v7273_v29 }
 0x1e9   : > { %v2380_v5 = vadd.f32 %v8577_v33, %v2202_v18  ;;  %v2204_v54 = vadd.f32 %v2137_v13, %v8578_v50  ;;  %v2311_v44 = vrot.slane %v8580_v0, 2  ;;  %v7316_v37 = vadd.f32 %v2448_v10, %v2395_v30  ;;  %v7322_v18 = vpop.f32.mrb[5].mxu0  ;;  %v8585_v13 = vld [vmem:[#allocation81_spill] sm:$0xff]  ;;  %v8587_v33 = vld [vmem:[#allocation91_spill] sm:$0xff] }
 0x1ea   : > { %v2025_v2 = vadd.f32 %v8579_v43, %v1942_v39  ;;  %v7320_v21 = vmul.f32 %v7124_v28, %v7240_v49  ;;  %v2884_v58 = vmax.f32 %v2854_v4, 0.0  ;;  %8581 = vst [vmem:[#allocation60_spill] sm:$0xff] %v7322_v18  ;;  %v3030_v46 = vrot.slane %v7302_v11, 1  ;;  %v7329_v20 = vpop.f32.mrb[6].mxu0 }
 0x1eb   : > { %v2463_v16 = vadd.f32 %v2433_v51, %v2380_v5  ;;  %v2313_v31 = vsel %vm527_vm1, %v2311_v44, %v2312_v26  ;;  %v8583_v14 = vrot.slane %v8582_v27, 2  ;;  %8584 = vst [vmem:[#allocation36_spill] sm:$0xff] %v7329_v20  ;;  %v2502_v59 = vmul.f32 %v7124_v28, %v8585_v13  ;;  %v8588_v44 = vld [vmem:[#allocation30_spill] sm:$0xff] }
 0x1ec   : > { %v2203_v25 = vadd.f32 %v2135_v7, %v2025_v2  ;;  %v7333_v10 = vsel %vm2914_vm13, %v2884_v58, 0.0  ;;  %v7339_v7 = vpop.f32.mrb[7].mxu0  ;;  %v2435_v5 = vmul.f32 %v7116_v17, %v8587_v33  ;;  %v2434_v57 = vmul.f32 %v7116_v17, %v8585_v13 }
 0x1ed   : > { %v2315_v39 = vsel %vm527_vm1, %v2312_v26, %v8583_v14  ;;  %v2641_v30 = vadd.f32 %v2570_v61, %v2463_v16  ;;  %8586 = vst [vmem:[#allocation29_spill] sm:$0xff] %v7339_v7  ;;  %v4639_v4 = vpack.i.bf16 %v7302_v11, %v7333_v10  ;;  %v3118_v26 = vrot.slane %v7302_v11, 2  ;;  %v8590_v7 = vld [vmem:[#allocation92_spill] sm:$0xff] }
 0x1ee   : > { %v2382_v51 = vadd.f32 %v2315_v39, %v2204_v54  ;;  %v2381_v43 = vadd.f32 %v2313_v31, %v2203_v25  ;;  %v2503_v61 = vmul.f32 %v7124_v28, %v8587_v33  ;;  %v3029_v54 = vrot.slane %v7333_v10, 1  ;;  %v7354_v16 = vpop.f32.mrb[8].mxu0 }
 0x1ef   : > { %v2819_v50 = vadd.f32 %v2748_v15, %v2641_v30  ;;  %4640 = vrot.lane.b32.xlu1 %v4639_v4, %s4923_s16  ;;  %4665 = vrot.lane.b32.xlu0 %v4639_v4, %s4914_s22  ;;  %v2572_v0 = vrot.slane %v2502_v59, 1  ;;  %v2575_v58 = vrot.slane %v8588_v44, 1  ;;  %8589 = vst [vmem:[#allocation51_spill] sm:$0xff] %v7354_v16  ;;  %v2680_v14 = vmul.f32 %v7132_v56, %v8585_v13  ;;  %v8591_v59 = vld [vmem:[#allocation71_spill] sm:$0xff]  ;;  %v8592_v4 = vld [vmem:[#allocation62_spill] sm:$0xff]  ;;  %v7371_v13 = vpop.f32.mrb[9].mxu0 }
 0x1f0   : > { %v2465_v2 = vadd.f32 %v2435_v5, %v2382_v51  ;;  %v2464_v25 = vadd.f32 %v2434_v57, %v2381_v43  ;;  %v2573_v31 = vrot.slane %v2503_v61, 1  ;;  %v3117_v39 = vrot.slane %v7333_v10, 2  ;;  %8594 = vst [vmem:[#allocation37_spill] sm:$0xff] %v7371_v13  ;;  %v7374_v47 = vpop.f32.mrb[10].mxu0 }
 0x1f1   : > { %v2856_v15 = vadd.f32 %v7278_v8, %v2819_v50  ;;  %v2681_v30 = vmul.f32 %v7132_v56, %v8587_v33  ;;  %v7364_v51 = vmul.f32 %v7132_v56, %v8590_v7  ;;  %v8593_v5 = vrot.slane %v8592_v4, 2  ;;  %8595 = vst [vmem:[#allocation32_spill] sm:$0xff] %v7374_v47 }
 0x1f2   : > { %v2574_v50 = vsel %vm438_vm0, %v2572_v0, %v2573_v31  ;;  %v2576_v43 = vsel %vm438_vm0, %v2573_v31, %v2575_v58  ;;  %v2750_v57 = vrot.slane %v2680_v14, 2  ;;  %v8597_v0 = vld [vmem:[#allocation73_spill] sm:$0xff]  ;;  %v8599_v31 = vld [vmem:[#allocation70_spill] sm:$0xff] }
 0x1f3   : > { %v1944_v44 = vadd.f32 %v8593_v5, %v8591_v59  ;;  %v2886_v16 = vmax.f32 %v2856_v15, 0.0  ;;  %v2642_v61 = vadd.f32 %v2574_v50, %v2464_v25  ;;  %v2643_v20 = vadd.f32 %v2576_v43, %v2465_v2  ;;  %v8596_v15 = vld [vmem:[#allocation86_spill] sm:$0xff]  ;;  %v7385_v25 = vpop.f32.mrb[11].mxu0 }
 0x1f4   : > { %v2751_v18 = vrot.slane %v2681_v30, 2  ;;  %v2753_v33 = vrot.slane %v7364_v51, 2  ;;  %v3031_v59 = vsel %vm438_vm0, %v3029_v54, %v3030_v46  ;;  %v8598_v5 = vrot.slane %v8597_v0, 1  ;;  %8601 = vst [vmem:[#allocation35_spill] sm:$0xff] %v7385_v25  ;;  %v8630_v25 = vld [vmem:[#allocation80_spill] sm:$0xff] }
 0x1f5   : > { %v2964_v60 = vsel %vm2919_vm14, %v2886_v16, 0.0  ;;  %v2027_v4 = vadd.f32 %v8596_v15, %v1944_v44  ;;  %v8600_v14 = vrot.slane %v8599_v31, 1  ;;  %v8602_v54 = vrot.slane %v6507_v12, 1  ;;  %v8603_v44 = vld [vmem:[#allocation68_spill] sm:$0xff] }
 0x1f6   : > { %v3032_v2 = vrot.slane %v2964_v60, 1  ;;  %v3120_v30 = vrot.slane %v2964_v60, 2  ;;  %v2752_v51 = vsel %vm527_vm1, %v2750_v57, %v2751_v18  ;;  %v2754_v50 = vsel %vm527_vm1, %v2751_v18, %v2753_v33 }
 0x1f7   : > { %v1701_v13 = vsel %vm438_vm0, %v8600_v14, %v8598_v5  ;;  %v2820_v43 = vadd.f32 %v2752_v51, %v2642_v61  ;;  %v2821_v16 = vadd.f32 %v2754_v50, %v2643_v20  ;;  %v2205_v47 = vadd.f32 %v8602_v54, %v2027_v4  ;;  %v7397_v14 = vpop.f32.mrb[12].mxu0  ;;  %v8605_v20 = vld [vmem:[#allocation74_spill] sm:$0xff]  ;;  %v8607_v61 = vld [vmem:[#allocation72_spill] sm:$0xff]  ;;  %v8614_v50 = vld [vmem:[#allocation97_spill] sm:$0xff] }
 0x1f8   : > { %v1767_v15 = vadd.f32 %v1701_v13, %v8603_v44  ;;  %v3033_v0 = vsel %vm438_vm0, %v3030_v46, %v3032_v2  ;;  %v3119_v31 = vsel %vm527_vm1, %v3117_v39, %v3118_v26  ;;  %v3121_v5 = vsel %vm527_vm1, %v3118_v26, %v3120_v30  ;;  %8604 = vst [vmem:[#allocation40_spill] sm:$0xff] %v7397_v14  ;;  %v8610_v2 = vld [vmem:[#allocation27_spill] sm:$0xff] }
 0x1f9   : > { %v2436_v60 = vmul.f32 %v7116_v17, %v8590_v7  ;;  %v7399_v57 = vpack.i.bf16 %v3033_v0, %v3031_v59  ;;  %v2857_v18 = vadd.f32 %v7278_v8, %v2820_v43  ;;  %v8606_v12 = vrot.slane %v8605_v20, 2  ;;  %v8612_v7 = vld [vmem:[#allocation87_spill] sm:$0xff] }
 0x1fa   : > { %v8608_v4 = vrot.slane %v8607_v61, 2  ;;  %v2858_v46 = vadd.f32 %v7278_v8, %v2821_v16  ;;  %v8609_v39 = vrot.slane %v8582_v27, 2  ;;  %v8611_v30 = vrot.slane %v8610_v2, 1  ;;  %v7426_v16 = vpop.f32.mrb[13].mxu0  ;;  %v8619_v61 = vld [vmem:[#allocation31_spill] sm:$0xff] }
 0x1fb   : > { %v8613_v51 = vrot.slane %v8612_v7, 1  ;;  %v8615_v54 = vrot.slane %v8614_v50, 1  ;;  %4650 = vrot.lane.b32.xlu1 %v7399_v57, %s4913_s21  ;;  %v7422_v0 = vpack.i.bf16 %v3121_v5, %v3119_v31  ;;  %4675 = vrot.lane.b32.xlu0 %v7399_v57, %s4925_s18  ;;  %8617 = vst [vmem:[#allocation33_spill] sm:$0xff] %v7426_v16  ;;  %v8623_v5 = vld [vmem:[#allocation90_spill] sm:$0xff]  ;;  %v2506_v14 = vmul.f32 %v7124_v28, %v6688_v62 }
 0x1fc   : > { %v1879_v13 = vsel %vm527_vm1, %v8608_v4, %v8606_v12  ;;  %v2383_v26 = vadd.f32 %v8609_v39, %v2205_v47  ;;  %v8616_v43 = vmov %v8611_v30  ;;  %v2887_v47 = vmax.f32 %v2857_v18, 0.0  ;;  %v8620_v39 = vld [vmem:[#allocation96_spill] sm:$0xff] }
 0x1fd   : > { %v2140_v59 = vsel %vm438_vm0, %v8613_v51, %v8611_v30  ;;  %v2142_v44 = vsel %vm438_vm0, %v8616_v43, %v8615_v54  ;;  %v1945_v27 = vadd.f32 %v1879_v13, %v1767_v15  ;;  %v7428_v20 = vmax.f32 %v2858_v46, 0.0  ;;  %v7432_v30 = vpop.f32.mrb[14].mxu0  ;;  %v8624_v51 = vld [vmem:[#allocation95_spill] sm:$0xff] }
 0x1fe   : > { %v2466_v12 = vadd.f32 %v2436_v60, %v2383_v26  ;;  %v2316_v4 = vrot.slane %v8619_v61, 2  ;;  %v2317_v2 = vrot.slane %v8620_v39, 2  ;;  %8621 = vst [vmem:[#allocation63_spill] sm:$0xff] %v7432_v30  ;;  %v7436_v31 = vsel %vm2914_vm13, %v2887_v47, 0.0  ;;  %v7440_v15 = vpop.f32.mrb[15].mxu0  ;;  %v8626_v26 = vld [vmem:[#allocation94_spill] sm:$0xff] }
 0x1ff   : > { %8618 = vst [vmem:[#allocation61_spill] sm:$0xff] %v7428_v20  ;;  %8622 = vst [vmem:[#allocation64_spill] sm:$0xff] %v7436_v31  ;;  %v2028_v7 = vadd.f32 %v8623_v5, %v1945_v27  ;;  %v2207_v18 = vadd.f32 %v2142_v44, %v8624_v51  ;;  %v3034_v46 = vrot.slane %v7436_v31, 1  ;;  %v3035_v60 = vrot.slane %v7428_v20, 1  ;;  %4660 = vrot.lane.b32.xlu1 %v7422_v0, %s4924_s17  ;;  %v8627_v39 = vld [vmem:[#allocation99_spill] sm:$0xff] }
 0x200   : > { %8625 = vst [vmem:[#allocation57_spill] sm:$0xff] %v7440_v15  ;;  %v2644_v13 = vadd.f32 %v2575_v58, %v2466_v12  ;;  %v2437_v54 = vmul.f32 %v7116_v17, %v8626_v26  ;;  %4685 = vrot.lane.b32.xlu0 %v7422_v0, %s4916_s23  ;;  %v3122_v43 = vrot.slane %v7436_v31, 2  ;;  %v3123_v44 = vrot.slane %v7428_v20, 2 }
 0x201   : > { %v2206_v47 = vadd.f32 %v2140_v59, %v2028_v7  ;;  %v2438_v58 = vmul.f32 %v7116_v17, %v6688_v62  ;;  %v7456_v27 = vpack.i.bf16 %v7428_v20, %v7436_v31  ;;  %v2318_v61 = vsel %vm527_vm1, %v2316_v4, %v2317_v2 }
 0x202   : > { %v2822_v12 = vadd.f32 %v2753_v33, %v2644_v13  ;;  %v8628_v5 = vrot.slane %v8627_v39, 2  ;;  %v3036_v15 = vsel %vm438_vm0, %v3034_v46, %v3035_v60  ;;  %v2505_v59 = vmul.f32 %v7124_v28, %v8626_v26 }
 0x203   : > { %v2384_v30 = vadd.f32 %v2318_v61, %v2206_v47  ;;  %v2683_v4 = vmul.f32 %v7132_v56, %v8626_v26  ;;  %4670 = vrot.lane.b32.xlu1 %v7456_v27, %s4914_s22  ;;  %v2684_v46 = vmul.f32 %v7132_v56, %v6688_v62  ;;  %v2578_v61 = vrot.slane %v2506_v14, 1  ;;  %v8629_v26 = vld [vmem:[#allocation88_spill] sm:$0xff] }
 0x204   : > { %v2320_v51 = vsel %vm527_vm1, %v2317_v2, %v8628_v5  ;;  %v2859_v7 = vadd.f32 %v7278_v8, %v2822_v12  ;;  %v3124_v2 = vsel %vm527_vm1, %v3122_v43, %v3123_v44  ;;  %v2577_v12 = vrot.slane %v2505_v59, 1 }
 0x205   : > { %v2385_v16 = vadd.f32 %v2320_v51, %v2207_v18  ;;  %v2467_v13 = vadd.f32 %v2437_v54, %v2384_v30  ;;  %v7478_v5 = vmul.f32 %v7132_v56, %v6711_v55  ;;  %v2755_v51 = vrot.slane %v2683_v4, 2  ;;  %v8634_v30 = vld [vmem:[#allocation84_spill] sm:$0xff] }
 0x206   : > { %v2889_v47 = vmax.f32 %v2859_v7, 0.0  ;;  %v2756_v33 = vrot.slane %v2684_v46, 2  ;;  %v8631_v6 = vrot.slane %v8630_v25, 2  ;;  %v8633_v43 = vrot.slane %v8632_v48, 1 }
 0x207   : > { %v2468_v18 = vadd.f32 %v2438_v58, %v2385_v16  ;;  %v8635_v16 = vrot.slane %v8634_v30, 1  ;;  %v2579_v14 = vsel %vm438_vm0, %v2577_v12, %v2578_v61  ;;  %v8636_v58 = vrot.slane %v6973_v24, 1 }
 0x208   : > { %v1947_v42 = vadd.f32 %v8631_v6, %v8629_v26  ;;  %v2967_v62 = vsel %vm2919_vm14, %v2889_v47, 0.0  ;;  %v2758_v7 = vrot.slane %v7478_v5, 2  ;;  %v2645_v6 = vadd.f32 %v2579_v14, %v2467_v13 }
 0x209   : > { %v1706_v54 = vsel %vm438_vm0, %v8635_v16, %v8633_v43  ;;  %v2581_v59 = vsel %vm438_vm0, %v2578_v61, %v8636_v58  ;;  %v3037_v4 = vrot.slane %v2967_v62, 1  ;;  %v3125_v25 = vrot.slane %v2967_v62, 2  ;;  %v8637_v43 = vld [vmem:[#allocation98_spill] sm:$0xff]  ;;  %v8638_v16 = vld [vmem:[#allocation89_spill] sm:$0xff] }
 0x20a   : > { %v2646_v46 = vadd.f32 %v2581_v59, %v2468_v18  ;;  %v2757_v48 = vsel %vm527_vm1, %v2755_v51, %v2756_v33  ;;  %v2759_v26 = vsel %vm527_vm1, %v2756_v33, %v2758_v7  ;;  %v2030_v30 = vadd.f32 %v8637_v43, %v1947_v42  ;;  %v8650_v43 = vld [vmem:[#allocation104_spill] sm:$0xff] }
 0x20b   : > { %v1770_v47 = vadd.f32 %v1706_v54, %v8638_v16  ;;  %v3038_v12 = vsel %vm438_vm0, %v3035_v60, %v3037_v4  ;;  %v3126_v31 = vsel %vm527_vm1, %v3123_v44, %v3125_v25  ;;  %v2823_v20 = vadd.f32 %v2757_v48, %v2645_v6  ;;  %v8651_v16 = vld [vmem:[#allocation21_spill] sm:$0xff] }
 0x20c   : > { %v2824_v61 = vadd.f32 %v2759_v26, %v2646_v46  ;;  %v4679_v58 = vpack.i.bf16 %v3038_v12, %v3036_v15  ;;  %v7501_v5 = vpack.i.bf16 %v3126_v31, %v3124_v2  ;;  %v2439_v33 = vmul.f32 %v7116_v17, %v6711_v55  ;;  %v8640_v15 = vld [vmem:[#allocation52_spill] sm:$0xff]  ;;  %v8642_v2 = vld [vmem:[#allocation85_spill] sm:$0xff]  ;;  %v8648_v46 = vld [vmem:[#allocation102_spill] sm:$0xff] }
 0x20d   : > { %v2860_v13 = vadd.f32 %v7278_v8, %v2823_v20  ;;  %v2595_v42 = vrot.slane %v7320_v21, 1  ;;  %v8639_v60 = vrot.slane %v8614_v50, 1  ;;  %v8641_v31 = vrot.slane %v8640_v15, 2  ;;  %v8654_v15 = vld [vmem:[#allocation105_spill] sm:$0xff] }
 0x20e   : > { %v2861_v18 = vadd.f32 %v7278_v8, %v2824_v61  ;;  %4680 = vrot.lane.b32.xlu1 %v4679_v58, %s4925_s18  ;;  %4695 = vrot.lane.b32.xlu0 %v7501_v5, %s4916_s23  ;;  %v8643_v51 = vrot.slane %v8642_v2, 2  ;;  %v8644_v14 = vrot.slane %v6937_v35, 1  ;;  %v8645_v59 = vrot.slane %v6766_v23, 1  ;;  %v8652_v61 = vld [vmem:[#allocation34_spill] sm:$0xff] }
 0x20f   : > { %v2208_v44 = vadd.f32 %v8639_v60, %v2030_v30  ;;  %v2890_v54 = vmax.f32 %v2860_v13, 0.0  ;;  %v8646_v25 = vrot.slane %v8627_v39, 2  ;;  %v8649_v48 = vrot.slane %v8648_v46, 1  ;;  %v8653_v60 = vld [vmem:[#allocation103_spill] sm:$0xff] }
 0x210   : > { %v1884_v20 = vsel %vm527_vm1, %v8643_v51, %v8641_v31  ;;  %v7518_v62 = vmax.f32 %v2861_v18, 0.0  ;;  %v2147_v4 = vsel %vm438_vm0, %v8645_v59, %v8644_v14  ;;  %v8647_v6 = vmov %v8645_v59  ;;  %v7539_v18 = vpop.permute.xlu0 %4535 }
 0x211   : > { %v1948_v55 = vadd.f32 %v1884_v20, %v1770_v47  ;;  %v2386_v50 = vadd.f32 %v8646_v25, %v2208_v44  ;;  %v2145_v26 = vsel %vm438_vm0, %v8649_v48, %v8647_v6  ;;  %v2210_v30 = vadd.f32 %v2147_v4, %v8650_v43 }
 0x212   : > { %v2322_v12 = vrot.slane %v8651_v16, 2  ;;  %v7536_v47 = vsel %vm2914_vm13, %v2890_v54, 0.0  ;;  %4690 = vrot.lane.b32.xlu1 %v7399_v57, %s4922_s15  ;;  %4705 = vrot.lane.b32.xlu0 %v7422_v0, %s4912_s20  ;;  %v3040_v39 = vrot.slane %v7518_v62, 1  ;;  %v2321_v44 = vrot.slane %v8653_v60, 2  ;;  %v8655_v54 = vld [vmem:[#allocation28_spill] sm:$0xff]  ;;  %v8659_v60 = vld [vmem:[#allocation22_spill] sm:$0xff] }
 0x213   : > { %v2031_v13 = vadd.f32 %v8652_v61, %v1948_v55  ;;  %v2469_v23 = vadd.f32 %v2439_v33, %v2386_v50  ;;  %v2440_v31 = vmul.f32 %v7116_v17, %v8654_v15  ;;  %v7551_v2 = vpack.i.bf16 %v7518_v62, %v7536_v47 }
 0x214   : > { %v3128_v51 = vrot.slane %v7518_v62, 2  ;;  %v8656_v57 = vrot.slane %v8655_v54, 2  ;;  %v8657_v0 = vrot.slane %v6973_v24, 1  ;;  %v2323_v14 = vsel %vm527_vm1, %v2321_v44, %v2322_v12  ;;  %v8660_v44 = vld [vmem:[#allocation26_spill] sm:$0xff] }
 0x215   : > { %v2209_v20 = vadd.f32 %v2145_v26, %v2031_v13  ;;  %v2441_v4 = vmul.f32 %v7116_v17, %v6858_v32  ;;  %v3039_v25 = vrot.slane %v7536_v47, 1  ;;  %v2508_v6 = vmul.f32 %v7124_v28, %v8654_v15  ;;  %v8658_v26 = vld [vmem:[#allocation39_spill] sm:$0xff] }
 0x216   : > { %v2325_v55 = vsel %vm527_vm1, %v2322_v12, %v8656_v57  ;;  %v2647_v33 = vadd.f32 %v8657_v0, %v2469_v23  ;;  %v2509_v46 = vmul.f32 %v7124_v28, %v6858_v32  ;;  %4700 = vrot.lane.b32.xlu1 %v4679_v58, %s4922_s15  ;;  %4715 = vrot.lane.b32.xlu0 %v7456_v27, %s4923_s16  ;;  %v2585_v43 = vrot.slane %v8658_v26, 1  ;;  %v7575_v23 = vpop.permute.xlu0 %4545 }
 0x217   : > { %v2388_v59 = vadd.f32 %v2325_v55, %v2210_v30  ;;  %v2387_v50 = vadd.f32 %v2323_v14, %v2209_v20  ;;  %v2686_v30 = vmul.f32 %v7132_v56, %v8654_v15  ;;  %v2582_v12 = vrot.slane %v2508_v6, 1  ;;  %v8662_v6 = vld [vmem:[#allocation24_spill] sm:$0xff] }
 0x218   : > { %v2825_v24 = vadd.f32 %v2758_v7, %v2647_v33  ;;  %v2583_v61 = vrot.slane %v2509_v46, 1  ;;  %v2687_v13 = vmul.f32 %v7132_v56, %v6858_v32  ;;  %v2688_v27 = vmul.f32 %v7132_v56, %v6889_v40 }
 0x219   : > { %v2471_v48 = vadd.f32 %v2441_v4, %v2388_v59  ;;  %v2470_v16 = vadd.f32 %v2440_v31, %v2387_v50  ;;  %v2760_v7 = vrot.slane %v2686_v30, 2  ;;  %v8661_v20 = vrot.slane %v8660_v44, 2 }
 0x21a   : > { %v2862_v28 = vadd.f32 %v7278_v8, %v2825_v24  ;;  %v3127_v15 = vrot.slane %v7536_v47, 2  ;;  %v2584_v31 = vsel %vm438_vm0, %v2582_v12, %v2583_v61  ;;  %v2586_v55 = vsel %vm438_vm0, %v2583_v61, %v2585_v43  ;;  %4710 = vrot.lane.b32.xlu1 %v7501_v5, %s4912_s20  ;;  %4725 = vrot.lane.b32.xlu0 %v4679_v58, %s4913_s21  ;;  %v8663_v58 = vld [vmem:[#allocation50_spill] sm:$0xff]  ;;  %v7604_v44 = vpop.permute.xlu0 %4555 }
 0x21b   : > { %v1950_v57 = vadd.f32 %v8661_v20, %v8659_v60  ;;  %v2761_v0 = vrot.slane %v2687_v13, 2  ;;  %v2648_v33 = vadd.f32 %v2584_v31, %v2470_v16  ;;  %v2649_v14 = vadd.f32 %v2586_v55, %v2471_v48  ;;  %v8665_v16 = vld [vmem:[#allocation45_spill] sm:$0xff] }
 0x21c   : > { %v2892_v32 = vmax.f32 %v2862_v28, 0.0  ;;  %v2763_v59 = vrot.slane %v2688_v27, 2  ;;  %v3041_v4 = vsel %vm438_vm0, %v3039_v25, %v3040_v39  ;;  %v2442_v24 = vmul.f32 %v7116_v17, %v6889_v40 }
 0x21d   : > { %v2762_v50 = vsel %vm527_vm1, %v2760_v7, %v2761_v0  ;;  %v2033_v46 = vadd.f32 %v8662_v6, %v1950_v57  ;;  %v8664_v61 = vrot.slane %v8663_v58, 1  ;;  %v8666_v48 = vrot.slane %v8665_v16, 1 }
 0x21e   : > { %v2970_v26 = vsel %vm2919_vm14, %v2892_v32, 0.0  ;;  %v2764_v30 = vsel %vm527_vm1, %v2761_v0, %v2763_v59  ;;  %v2826_v12 = vadd.f32 %v2762_v50, %v2648_v33  ;;  %v8667_v7 = vrot.slane %v6937_v35, 1  ;;  %4720 = vrot.lane.b32.xlu1 %v7551_v2, %s4923_s16  ;;  %4735 = vrot.lane.b32.xlu0 %v7501_v5, %s4924_s17 }
 0x21f   : > { %v2589_v13 = vsel %vm438_vm0, %v8666_v48, %v8664_v61  ;;  %v3042_v25 = vrot.slane %v2970_v26, 1  ;;  %v3130_v28 = vrot.slane %v2970_v26, 2  ;;  %v2827_v27 = vadd.f32 %v2764_v30, %v2649_v14  ;;  %v7652_v26 = vpop.permute.xlu0 %4565 }
 0x220   : > { %v2211_v60 = vadd.f32 %v8667_v7, %v2033_v46  ;;  %v2592_v40 = vrot.slane %v7127_v1, 1  ;;  %v2216_v20 = vadd.f32 %v7159_v9, %v7308_v63  ;;  %v7611_v57 = vmul.f32 %v7132_v56, %v7240_v49  ;;  %v8669_v9 = vld [vmem:[#allocation48_spill] sm:$0xff] }
 0x221   : > { %v2863_v35 = vadd.f32 %v7278_v8, %v2826_v12  ;;  %v3043_v31 = vsel %vm438_vm0, %v3040_v39, %v3042_v25  ;;  %v2864_v55 = vadd.f32 %v7278_v8, %v2827_v27  ;;  %v8668_v1 = vrot.slane %v8655_v54, 2  ;;  %v7662_v12 = vpop.permute.xlu1 %4540 }
 0x222   : > { %v2651_v63 = vadd.f32 %v2589_v13, %v8669_v9  ;;  %v2393_v49 = vadd.f32 %v7144_v34, %v7173_v38  ;;  %v7625_v32 = vpack.i.bf16 %v3043_v31, %v3041_v4  ;;  %v2656_v5 = vadd.f32 %v2595_v42, %v7316_v37  ;;  %4745 = vrot.lane.b32.xlu0 %v7551_v2, %s4914_s22  ;;  %v8670_v37 = vld [vmem:[#allocation43_spill] sm:$0xff]  ;;  %v8672_v4 = vld [vmem:[#allocation41_spill] sm:$0xff] }
 0x223   : > { %v2389_v0 = vadd.f32 %v8668_v1, %v2211_v60  ;;  %v2893_v33 = vmax.f32 %v2863_v35, 0.0  ;;  %v3129_v39 = vsel %vm527_vm1, %v3127_v15, %v3128_v51  ;;  %v3131_v54 = vsel %vm527_vm1, %v3128_v51, %v3130_v28 }
 0x224   : > { %v2394_v50 = vadd.f32 %v7164_v52, %v2216_v20  ;;  %v2593_v34 = vrot.slane %v7312_v22, 1  ;;  %v2693_v38 = vmul.f32 %v7132_v56, %v7273_v29  ;;  %4730 = vrot.lane.b32.xlu1 %v7625_v32, %s4913_s21  ;;  %v8671_v15 = vrot.slane %v8670_v37, 2 }
 0x225   : > { %v2472_v14 = vadd.f32 %v2442_v24, %v2389_v0  ;;  %v8673_v6 = vrot.slane %v8672_v4, 2  ;;  %v2773_v46 = vrot.slane %v7611_v57, 2  ;;  %v7650_v52 = vmax.f32 %v2864_v55, 0.0  ;;  %v7700_v55 = vpop.permute.xlu1 %4550 }
 0x226   : > { %v2447_v56 = vmul.f32 %v7116_v17, %v7273_v29  ;;  %v7656_v30 = vpack.i.bf16 %v3131_v54, %v3129_v39  ;;  %v7660_v2 = vsel %vm2914_vm13, %v2893_v33, 0.0  ;;  %v2476_v58 = vadd.f32 %v7119_v45, %v2393_v49  ;;  %4755 = vrot.lane.b32.xlu0 %v7625_v32, %s4925_s18 }
 0x227   : > { %v2767_v51 = vsel %vm527_vm1, %v8673_v6, %v8671_v15  ;;  %v2650_v22 = vadd.f32 %v2585_v43, %v2472_v14  ;;  %v2770_v61 = vrot.slane %v7135_v3, 2  ;;  %v2834_v16 = vadd.f32 %v2773_v46, %v2656_v5 }
 0x228   : > { %v2829_v24 = vadd.f32 %v2767_v51, %v2651_v63  ;;  %v2477_v48 = vadd.f32 %v2447_v56, %v2394_v50  ;;  %v2594_v13 = vsel %vm438_vm0, %v2592_v40, %v2593_v34  ;;  %v2771_v25 = vrot.slane %v2693_v38, 2  ;;  %4740 = vrot.lane.b32.xlu1 %v7656_v30, %s4924_s17  ;;  %v7685_v40 = vpop.permute.xlu0 %4575 }
 0x229   : > { %v2828_v43 = vadd.f32 %v2763_v59, %v2650_v22  ;;  %v2596_v17 = vsel %vm438_vm0, %v2593_v34, %v2595_v42  ;;  %v7676_v45 = vpack.i.bf16 %v7650_v52, %v7660_v2  ;;  %v3044_v59 = vrot.slane %v7660_v2, 1  ;;  %v7722_v22 = vpop.permute.xlu1 %4560 }
 0x22a   : > { %v2866_v29 = vadd.f32 %v7278_v8, %v2829_v24  ;;  %v3045_v21 = vrot.slane %v7650_v52, 1  ;;  %v3132_v42 = vrot.slane %v7660_v2, 2  ;;  %v3133_v28 = vrot.slane %v7650_v52, 2  ;;  %4765 = vrot.lane.b32.xlu0 %v7656_v30, %s4916_s23 }
 0x22b   : > { %v2865_v3 = vadd.f32 %v7278_v8, %v2828_v43  ;;  %v2654_v27 = vadd.f32 %v2594_v13, %v2476_v58  ;;  %v2871_v7 = vadd.f32 %v7278_v8, %v2834_v16  ;;  %v2772_v20 = vsel %vm527_vm1, %v2770_v61, %v2771_v25 }
 0x22c   : > { %v8674_v57 = vstv %s7008_s14  ;;  %4750 = vrot.lane.b32.xlu1 %v7676_v45, %s4914_s22  ;;  %v2867_v31 = vadd.f32 %v7278_v8, %v7107_v19  ;;  %v2655_v1 = vadd.f32 %v2596_v17, %v2477_v48  ;;  %v2896_v9 = vmax.f32 %v2866_v29, 0.0  ;;  %v7720_v6 = vpop.permute.xlu0 %4585 }
 0x22d   : > { %v2895_v60 = vmax.f32 %v2865_v3, 0.0  ;;  %vm7690_vm7 = vcmp.eq.s32.totalorder %v8674_v57, 1  ;;  %v2898_v63 = vmax.f32 %v7140_v53, 0.0  ;;  %v3046_v49 = vsel %vm438_vm0, %v3044_v59, %v3045_v21 }
 0x22e   : > { %v3134_v5 = vsel %vm527_vm1, %v3132_v42, %v3133_v28  ;;  %v2832_v54 = vadd.f32 %v2772_v20, %v2654_v27  ;;  %v2901_v14 = vmax.f32 %v2871_v7, 0.0  ;;  %vm2931_vm8 = vmand %vm7690_vm7, %vm2919_vm14  ;;  %v2774_v19 = vsel %vm527_vm1, %v2771_v25, %v2773_v46  ;;  %v7751_v27 = vpop.permute.xlu1 %4570 }
 0x22f   : > { %v2973_v0 = vsel %vm2919_vm14, %v2895_v60, 0.0  ;;  %v2897_v53 = vmax.f32 %v2867_v31, 0.0  ;;  %v2974_v15 = vsel %vm2914_vm13, %v2896_v9, 0.0  ;;  %v2976_v4 = vsel %vm2919_vm14, %v2898_v63, 0.0  ;;  %vm2929_vm15 = vmand %vm7690_vm7, %vm2914_vm13 }
 0x230   : > { %v3047_v33 = vrot.slane %v2973_v0, 1  ;;  %v3135_v39 = vrot.slane %v2973_v0, 2  ;;  %v2833_v51 = vadd.f32 %v2774_v19, %v2655_v1  ;;  %v7725_v46 = vadd.f32 %v7278_v8, %v2832_v54 }
 0x231   : > { %v7727_v24 = vsel %vm2931_vm8, %v2901_v14, 0.0  ;;  %v3236_v56 = vrot.slane %v2974_v15, 1  ;;  %v3237_v58 = vrot.slane %v2897_v53, 1  ;;  %v3239_v61 = vrot.slane %v2976_v4, 1 }
 0x232   : > { %v3048_v50 = vsel %vm438_vm0, %v3045_v21, %v3047_v33  ;;  %v3136_v34 = vsel %vm527_vm1, %v3133_v28, %v3135_v39  ;;  %v4538_v41 = vunpack.i.h.bf16 %v7539_v18  ;;  %v4537_v16 = vunpack.i.l.bf16 %v7539_v18  ;;  %v4596_v18 = vpop.permute.xlu0 %4595  ;;  %v8677_v21 = vld [vmem:[#allocation69_spill] sm:$0xff]  ;;  %v7775_v19 = vpop.permute.xlu1 %4580 }
 0x233   : > { %v4759_v38 = vpack.i.bf16 %v3048_v50, %v3046_v49  ;;  %v7714_v37 = vpack.i.bf16 %v3136_v34, %v3134_v5  ;;  %v7735_v43 = vadd.f32 %v7278_v8, %v2833_v51  ;;  %v3396_v48 = vrot.slane %v7727_v24, 1 }
 0x234   : > { %v3289_v13 = vrot.slane %v2974_v15, 2  ;;  %v3290_v25 = vrot.slane %v2897_v53, 2  ;;  %v3449_v17 = vrot.slane %v7727_v24, 2  ;;  %v7743_v3 = vpack.i.bf16 %v2897_v53, %v2974_v15  ;;  %v8685_v24 = vld [vmem:[#allocation10_spill] sm:$0xff] }
 0x235   : > { %4760 = vrot.lane.b32.xlu1 %v4759_v38, %s4925_s18  ;;  %4775 = vrot.lane.b32.xlu0 %v7714_v37, %s4916_s23  ;;  %v4548_v29 = vunpack.i.h.bf16 %v7575_v23  ;;  %v3238_v8 = vsel %vm438_vm0, %v3236_v56, %v3237_v58  ;;  %v3240_v59 = vsel %vm438_vm0, %v3237_v58, %v3239_v61  ;;  %v3501_v42 = vsel %vm3499_vm9, %v8677_v21, %v4538_v41 }
 0x236   : > { %v4547_v28 = vunpack.i.l.bf16 %v7575_v23  ;;  %v4557_v60 = vunpack.i.l.bf16 %v7604_v44  ;;  %v3291_v20 = vsel %vm527_vm1, %v3289_v13, %v3290_v25  ;;  %v4558_v57 = vunpack.i.h.bf16 %v7604_v44 }
 0x237   : > { %v4567_v31 = vunpack.i.l.bf16 %v7652_v26  ;;  %v3517_v23 = vsel %vm930_vm3, %v3501_v42, %v4548_v29  ;;  %v4543_v1 = vunpack.i.h.bf16 %v7662_v12  ;;  %v4568_v0 = vunpack.i.h.bf16 %v7652_v26  ;;  %v4591_v29 = vpop.permute.xlu1 %4590 }
 0x238   : > { %v4577_v9 = vunpack.i.l.bf16 %v7685_v40  ;;  %v4578_v44 = vunpack.i.h.bf16 %v7685_v40  ;;  %v4588_v33 = vunpack.i.h.bf16 %v7720_v6  ;;  %v4587_v5 = vunpack.i.l.bf16 %v7720_v6  ;;  %v4861_v40 = vld [vmem:[%s8176_s6 + $0x10] ss:$0 sps:$4 sm:$0x33]  }
 0x239   : > { %4770 = vrot.lane.b32.xlu1 %v7625_v32, %s4922_s15  ;;  %4785 = vrot.lane.b32.xlu0 %v7656_v30, %s4912_s20  ;;  %v8678_v32 = vld [vmem:[#allocation66_spill] sm:$0xff]  ;;  %v3292_v30 = vrot.slane %v2976_v4, 2  ;;  %v4542_v54 = vunpack.i.l.bf16 %v7662_v12  ;;  %v3534_v26 = vsel %vm3532_vm10, %v3517_v23, %v4558_v57  ;;  %v4598_v12 = vunpack.i.h.bf16 %v4596_v18 }
 0x23a   : > { %v3500_v7 = vsel %vm3499_vm9, %v8678_v32, %v4537_v16  ;;  %v3550_v50 = vsel %vm947_vm4, %v3534_v26, %v4568_v0  ;;  %v4597_v53 = vunpack.i.l.bf16 %v4596_v18  ;;  %vm3686_vm14 = vcmask 1041408   ;;  %v8679_v32 = vld [vmem:[#allocation77_spill] sm:$0xff] }
 0x23b   : > { %v3516_v63 = vsel %vm930_vm3, %v3500_v7, %v4547_v28  ;;  %v3293_v39 = vsel %vm527_vm1, %v3290_v25, %v3292_v30  ;;  %v3567_v15 = vsel %vm3565_vm11, %v3550_v50, %v4578_v44  ;;  %v2899_v58 = vmax.f32 %v7725_v46, 0.0  ;;  %4153 = vmatprep.subr.msk.bf16.mxu1 %vm3686_vm14, %v4861_v40 }
 0x23c   : > { %v3533_v49 = vsel %vm3532_vm10, %v3516_v63, %v4557_v60  ;;  %v3583_v56 = vsel %vm964_vm5, %v3567_v15, %v4588_v33  ;;  %v4553_v13 = vunpack.i.h.bf16 %v7700_v55  ;;  %v4552_v25 = vunpack.i.l.bf16 %v7700_v55  ;;  %v8680_v55 = vld [vmem:[#allocation79_spill] sm:$0xff] }
 0x23d   : > { %4780 = vrot.lane.b32.xlu1 %v4759_v38, %s4922_s15  ;;  %4795 = vrot.lane.b32.xlu0 %v7676_v45, %s4923_s16  ;;  %v4606_v45 = vpop.permute.xlu0 %4605  ;;  %v3549_v14 = vsel %vm947_vm4, %v3533_v49, %v4567_v31  ;;  %v3600_v41 = vsel %vm3598_vm12, %v3583_v56, %v4598_v12  ;;  %v4809_v21 = vpack.i.bf16 %v3240_v59, %v3238_v8  ;;  %v4563_v42 = vunpack.i.h.bf16 %v7722_v22 }
 0x23e   : > { %v3566_v34 = vsel %vm3565_vm11, %v3549_v14, %v4577_v9  ;;  %v4608_v4 = vunpack.i.h.bf16 %v4606_v45  ;;  %v4607_v6 = vunpack.i.l.bf16 %v4606_v45  ;;  %v4562_v28 = vunpack.i.l.bf16 %v7722_v22 }
 0x23f   : > { %v3582_v51 = vsel %vm964_vm5, %v3566_v34, %v4587_v5  ;;  %v3503_v7 = vsel %vm3499_vm9, %v8679_v32, %v4543_v1  ;;  %v2977_v30 = vsel %vm2929_vm15, %v2899_v58, 0.0  ;;  %v4573_v60 = vunpack.i.h.bf16 %v7751_v27  ;;  %v8688_v32 = vld [vmem:[#allocation9_spill] sm:$0xff] }
 0x240   : > { %v3599_v61 = vsel %vm3598_vm12, %v3582_v51, %v4597_v53  ;;  %v3616_v16 = vsel %vm981_vm6, %v3600_v41, %v4608_v4  ;;  %v4572_v57 = vunpack.i.l.bf16 %v7751_v27  ;;  %v3502_v8 = vsel %vm3499_vm9, %v8680_v55, %v4542_v54 }
 0x241   : > { %4790 = vrot.lane.b32.xlu1 %v7714_v37, %s4912_s20  ;;  %4805 = vrot.lane.b32.xlu0 %v4759_v38, %s4913_s21  ;;  %v2900_v38 = vmax.f32 %v7735_v43, 0.0  ;;  %v3615_v46 = vsel %vm981_vm6, %v3599_v61, %v4607_v6  ;;  %v3688_v43 = vsel %vm3686_vm14, %v4861_v40, 0  ;;  %v4583_v59 = vunpack.i.h.bf16 %v7775_v19  ;;  %s8681_s20 = smov 124  }
 0x242   : > { %v3631_v18 = vpack.c.bf16 %v3616_v16, %v3615_v46  ;;  %4135 = vmatpush3.bf16.msra.mxu1 %v3688_v43  ;;  %v3518_v31 = vsel %vm930_vm3, %v3502_v8, %v4552_v25  ;;  %v3519_v27 = vsel %vm930_vm3, %v3503_v7, %v4553_v13  ;;  %v4593_v23 = vunpack.i.h.bf16 %v4591_v29  ;;  %v8683_v43 = vld [vmem:[#allocation5_spill] sm:$0xff]  ;;  %v8689_v7 = vld [vmem:[#allocation14_spill] sm:$0xff] }
 0x243   : > { %v2978_v22 = vsel %vm7690_vm7, %v2900_v38, 0.0  ;;  %v4592_v1 = vunpack.i.l.bf16 %v4591_v29  ;;  %v3393_v0 = vrot.slane %v2977_v30, 1  ;;  %v3536_v9 = vsel %vm3532_vm10, %v3519_v27, %v4563_v42  ;;  %v4601_v33 = vpop.permute.xlu1 %4600  ;;  %v4616_v26 = vpop.permute.xlu0 %4615  ;;  %v8684_v29 = vld [vmem:[#allocation4_spill] sm:$0xff] }
 0x244   : > { %4136 = vmatprep.mubr.msk.bf16.mxu1 %vm3661_vm2, %v3631_v18  ;;  %v4829_v63 = vpack.i.bf16 %v2978_v22, %v2977_v30  ;;  %v3394_v44 = vrot.slane %v2978_v22, 1  ;;  %v3552_v35 = vsel %vm947_vm4, %v3536_v9, %v4573_v60  ;;  %v4602_v54 = vunpack.i.l.bf16 %v4601_v33  ;;  %v8692_v9 = vld [vmem:[#allocation101_spill] sm:$0xff] }
 0x245   : > { %4800 = vrot.lane.b32.xlu1 %v7743_v3, %s4923_s16  ;;  %4815 = vrot.lane.b32.xlu0 %v7714_v37, %s4924_s17  ;;  %v4819_v37 = vpack.i.bf16 %v3293_v39, %v3291_v20  ;;  %v4582_v20 = vunpack.i.l.bf16 %v7775_v19  ;;  %v3569_v45 = vsel %vm3565_vm11, %v3552_v35, %v4583_v59  ;;  %v4603_v39 = vunpack.i.h.bf16 %v4601_v33 }
 0x246   : > { %v3585_v14 = vsel %vm964_vm5, %v3569_v45, %v4593_v23  ;;  %v4618_v40 = vunpack.i.h.bf16 %v4616_v26  ;;  %v4617_v50 = vunpack.i.l.bf16 %v4616_v26  ;;  %v3447_v34 = vrot.slane %v2978_v22, 2 }
 0x247   : > { %v3602_v12 = vsel %vm3598_vm12, %v3585_v14, %v4603_v39  ;;  %v3395_v15 = vsel %vm438_vm0, %v3393_v0, %v3394_v44  ;;  %v3397_v4 = vsel %vm438_vm0, %v3394_v44, %v3396_v48  ;;  %v3446_v58 = vrot.slane %v2977_v30, 2  ;;  %v8682_v48 = vld [vmem:[#allocation3_spill] sm:$0xff]  ;;  %v4626_v46 = vpop.permute.xlu0 %4625  ;;  %v4611_v13 = vpop.permute.xlu1 %4610  ;;  %v8693_v14 = vld [vmem:[#allocation12_spill] sm:$0xff] }
 0x248   : > { %v3618_v6 = vsel %vm981_vm6, %v3602_v12, %v4618_v40  ;;  %v4839_v38 = vpack.i.bf16 %v3397_v4, %v3395_v15  ;;  %v3450_v41 = vsel %vm527_vm1, %v3447_v34, %v3449_v17  ;;  %v8686_v17 = vld [vmem:[#allocation11_spill] sm:$0xff]  ;;  %v4612_v55 = vunpack.i.l.bf16 %v4611_v13 }
 0x249   : > { %4810 = vrot.lane.b32.xlu1 %v4809_v21, %s4913_s21  ;;  %4825 = vrot.lane.b32.xlu0 %v7743_v3, %s4914_s22  ;;  %v3535_v3 = vsel %vm3532_vm10, %v3518_v31, %v4562_v28  ;;  %v3448_v61 = vsel %vm527_vm1, %v3446_v58, %v3447_v34  ;;  %v4628_v8 = vunpack.i.h.bf16 %v4626_v46  ;;  %v4627_v22 = vunpack.i.l.bf16 %v4626_v46  ;;  %v8690_v31 = vld [vmem:[#allocation15_spill] sm:$0xff] }
 0x24a   : > { %v3551_v49 = vsel %vm947_vm4, %v3535_v3, %v4572_v57  ;;  %v4849_v16 = vpack.i.bf16 %v3450_v41, %v3448_v61  ;;  %v4613_v57 = vunpack.i.h.bf16 %v4611_v13  ;;  %v3504_v3 = vsel %vm3499_vm9, %v8692_v9, %v4612_v55 }
 0x24b   : > { %v3568_v5 = vsel %vm3565_vm11, %v3551_v49, %v4582_v20  ;;  %v4636_v25 = vpop.permute.xlu0 %4635  ;;  %v7859_v18 = vpop.permute.xlu1 %4620 }
 0x24c   : > { %v3584_v19 = vsel %vm964_vm5, %v3568_v5, %v4592_v1  ;;  %v4638_v59 = vunpack.i.h.bf16 %v4636_v25  ;;  %v4637_v20 = vunpack.i.l.bf16 %v4636_v25  ;;  %v8691_v1 = vld [vmem:[#allocation100_spill] sm:$0xff]  ;;  %v3520_v5 = vsel %vm930_vm3, %v3504_v3, %v4627_v22 }
 0x24d   : > { %4820 = vrot.lane.b32.xlu1 %v4819_v37, %s4924_s17  ;;  %4835 = vrot.lane.b32.xlu0 %v4809_v21, %s4925_s18  ;;  %v3601_v53 = vsel %vm3598_vm12, %v3584_v19, %v4602_v54  ;;  %v3505_v0 = vsel %vm3499_vm9, %v8691_v1, %v4613_v57  ;;  %v4623_v25 = vunpack.i.h.bf16 %v7859_v18  ;;  %v8695_v57 = vld [vmem:[#allocation16_spill] sm:$0xff]  ;;  %s4033_s17 = sshll.u32 %s8734_s28, 1 }
 0x24e   : > { %v3617_v51 = vsel %vm981_vm6, %v3601_v53, %v4617_v50  ;;  %v3521_v33 = vsel %vm930_vm3, %v3505_v0, %v4628_v8  ;;  %v3537_v54 = vsel %vm3532_vm10, %v3520_v5, %v4637_v20 }
 0x24f   : > { %v3632_v56 = vpack.c.bf16 %v3618_v6, %v3617_v51  ;;  %v4646_v21 = vpop.permute.xlu0 %4645  ;;  %v7863_v42 = vpop.permute.xlu1 %4630  ;;  %v3538_v26 = vsel %vm3532_vm10, %v3521_v33, %v4638_v59 }
 0x250   : > { %v4648_v27 = vunpack.i.h.bf16 %v4646_v21  ;;  %v4647_v23 = vunpack.i.l.bf16 %v4646_v21  ;;  %v4622_v21 = vunpack.i.l.bf16 %v7859_v18  ;;  %v8697_v18 = vld [vmem:[#allocation25_spill] sm:$0xff] }
 0x251   : > { %4830 = vrot.lane.b32.xlu1 %v4829_v63, %s4914_s22  ;;  %4845 = vrot.lane.b32.xlu0 %v4819_v37, %s4916_s23  ;;  %v8687_v37 = vld [vmem:[#allocation8_spill] sm:$0xff] }
 0x252   : > { %4137 = vmatmul.mubr.msk.bf16.vlgmr.msra.gmra.mrb[0].mxu1 %vm3661_vm2, %v3632_v56  ;;  %v3553_v50 = vsel %vm947_vm4, %v3537_v54, %v4647_v23  ;;  %v3554_v34 = vsel %vm947_vm4, %v3538_v26, %v4648_v27  ;;  %v8696_v27 = vld [vmem:[#allocation23_spill] sm:$0xff]  ;;  %v3506_v1 = vsel %vm3499_vm9, %v8697_v18, %v4622_v21 }
 0x253   : > { %v4656_v28 = vpop.permute.xlu0 %4655  ;;  %v3507_v23 = vsel %vm3499_vm9, %v8696_v27, %v4623_v25 }
 0x254   : > { %v4658_v63 = vunpack.i.h.bf16 %v4656_v28  ;;  %v4657_v44 = vunpack.i.l.bf16 %v4656_v28  ;;  %v4633_v28 = vunpack.i.h.bf16 %v7863_v42 }
 0x255   : > { %4840 = vrot.lane.b32.xlu1 %v4839_v38, %s4925_s18  ;;  %1096 = vrot.lane.b32.xlu0 %v8682_v48, %s8681_s20  ;;  %v8694_v38 = vld [vmem:[#allocation13_spill] sm:$0xff]  ;;  %s371_s18 = sadd.s32 %s4033_s17, %s5009_s12 }
 0x256   : > { %v3570_v12 = vsel %vm3565_vm11, %v3553_v50, %v4657_v44  ;;  %v3571_v53 = vsel %vm3565_vm11, %v3554_v34, %v4658_v63  ;;  %v3523_v3 = vsel %vm930_vm3, %v3507_v23, %v4633_v28  ;;  %v8698_v63 = vld [vmem:[#allocation17_spill] sm:$0xff]  ;;  %s4034_s19 = sshll.u32 %s371_s18, 2 }
 0x257   : > { %s373_s13 = scalar_lea.vmem %s8178_s8, %s4034_s19 }
 0x259   : > { %4850 = vrot.lane.b32.xlu1 %v4849_v16, %s4916_s23  ;;  %1100 = vrot.lane.b32.xlu0 %v8683_v43, %s8681_s20 }
 0x25d   : > { %1098 = vrot.lane.b32.xlu1 %v8684_v29, %s8681_s20  ;;  %1102 = vrot.lane.b32.xlu0 %v8685_v24, %s8681_s20 }
 0x261   : > { %1104 = vrot.lane.b32.xlu0 %v8686_v17, %s8681_s20  ;;  %v7869_v30 = vpop.permute.xlu1 %4640  ;;  %v4666_v60 = vpop.permute.xlu0 %4665 }
 0x262   : > { %v4668_v45 = vunpack.i.h.bf16 %v4666_v60  ;;  %v4667_v39 = vunpack.i.l.bf16 %v4666_v60  ;;  %v4632_v60 = vunpack.i.l.bf16 %v7863_v42  ;;  %v4643_v55 = vunpack.i.h.bf16 %v7869_v30 }
 0x263   : > { %v4642_v8 = vunpack.i.l.bf16 %v7869_v30 }
 0x264   : > { %v3586_v4 = vsel %vm964_vm5, %v3570_v12, %v4667_v39  ;;  %v3587_v6 = vsel %vm964_vm5, %v3571_v53, %v4668_v45  ;;  %v3522_v9 = vsel %vm930_vm3, %v3506_v1, %v4632_v60  ;;  %v3540_v30 = vsel %vm3532_vm10, %v3523_v3, %v4643_v55 }
 0x265   : > { %1106 = vrot.lane.b32.xlu0 %v8687_v37, %s8681_s20  ;;  %v3539_v44 = vsel %vm3532_vm10, %v3522_v9, %v4642_v8 }
 0x269   : > { %1108 = vrot.lane.b32.xlu0 %v8688_v32, %s8681_s20 }
 0x26d   : > { %1110 = vrot.lane.b32.xlu0 %v8689_v7, %s8681_s20  ;;  %v4651_v35 = vpop.permute.xlu1 %4650  ;;  %v4676_v49 = vpop.permute.xlu0 %4675 }
 0x26e   : > { %v4678_v19 = vunpack.i.h.bf16 %v4676_v49  ;;  %v4677_v40 = vunpack.i.l.bf16 %v4676_v49  ;;  %v4653_v59 = vunpack.i.h.bf16 %v4651_v35  ;;  %v4652_v20 = vunpack.i.l.bf16 %v4651_v35 }
 0x270   : > { %v3603_v61 = vsel %vm3598_vm12, %v3586_v4, %v4677_v40  ;;  %v3604_v41 = vsel %vm3598_vm12, %v3587_v6, %v4678_v19  ;;  %v3556_v33 = vsel %vm947_vm4, %v3540_v30, %v4653_v59  ;;  %v3555_v5 = vsel %vm947_vm4, %v3539_v44, %v4652_v20 }
 0x271   : > { %1112 = vrot.lane.b32.xlu0 %v8690_v31, %s8681_s20  ;;  %v4661_v51 = vpop.permute.xlu1 %4660 }
 0x272   : > { %v4686_v15 = vpop.permute.xlu0 %4685  ;;  %v4663_v0 = vunpack.i.h.bf16 %v4661_v51  ;;  %v4662_v42 = vunpack.i.l.bf16 %v4661_v51 }
 0x273   : > { %v4688_v56 = vunpack.i.h.bf16 %v4686_v15  ;;  %v4687_v58 = vunpack.i.l.bf16 %v4686_v15 }
 0x274   : > { %v3572_v45 = vsel %vm3565_vm11, %v3555_v5, %v4662_v42  ;;  %v3573_v39 = vsel %vm3565_vm11, %v3556_v33, %v4663_v0  ;;  %v8699_v5 = vld [vmem:[#allocation61_spill] sm:$0xff] }
 0x275   : > { %1114 = vrot.lane.b32.xlu0 %v8693_v14, %s8681_s20  ;;  %v3619_v46 = vsel %vm981_vm6, %v3603_v61, %v4687_v58  ;;  %v3620_v16 = vsel %vm981_vm6, %v3604_v41, %v4688_v56  ;;  %v4671_v22 = vpop.permute.xlu1 %4670 }
 0x276   : > { %v3633_v13 = vpack.c.bf16 %v3620_v16, %v3619_v46  ;;  %v4673_v35 = vunpack.i.h.bf16 %v4671_v22  ;;  %v4672_v49 = vunpack.i.l.bf16 %v4671_v22 }
 0x278   : > { %4140 = vmatprep.mubr.msk.bf16.mxu1 %vm3661_vm2, %v3633_v13  ;;  %v3589_v12 = vsel %vm964_vm5, %v3573_v39, %v4673_v35  ;;  %v3588_v53 = vsel %vm964_vm5, %v3572_v45, %v4672_v49  ;;  %v8700_v39 = vld [vmem:[#allocation64_spill] sm:$0xff] }
 0x279   : > { %1116 = vrot.lane.b32.xlu0 %v8694_v38, %s8681_s20 }
 0x27d   : > { %1118 = vrot.lane.b32.xlu0 %v8695_v57, %s8681_s20 }
 0x280   : > { %v4681_v54 = vpop.permute.xlu1 %4680  ;;  %v4696_v26 = vpop.permute.xlu0 %4695 }
 0x281   : > { %1120 = vrot.lane.b32.xlu0 %v8698_v63, %s8681_s20  ;;  %v4683_v19 = vunpack.i.h.bf16 %v4681_v54  ;;  %v4682_v40 = vunpack.i.l.bf16 %v4681_v54  ;;  %v4698_v50 = vunpack.i.h.bf16 %v4696_v26  ;;  %v4697_v34 = vunpack.i.l.bf16 %v4696_v26 }
 0x283   : > { %v3606_v15 = vsel %vm3598_vm12, %v3589_v12, %v4683_v19  ;;  %v3605_v4 = vsel %vm3598_vm12, %v3588_v53, %v4682_v40 }
 0x284   : > { %v3622_v6 = vsel %vm981_vm6, %v3606_v15, %v4698_v50  ;;  %v3621_v51 = vsel %vm981_vm6, %v3605_v4, %v4697_v34  ;;  %v4691_v56 = vpop.permute.xlu1 %4690  ;;  %v4706_v58 = vpop.permute.xlu0 %4705 }
 0x285   : > { %v3634_v61 = vpack.c.bf16 %v3622_v6, %v3621_v51  ;;  %v4693_v28 = vunpack.i.h.bf16 %v4691_v56  ;;  %v4692_v60 = vunpack.i.l.bf16 %v4691_v56  ;;  %v4708_v55 = vunpack.i.h.bf16 %v4706_v58 }
 0x286   : > { %v4707_v8 = vunpack.i.l.bf16 %v4706_v58 }
 0x287   : > { %4141 = vmatmul.mubr.msk.bf16.gmra.mrb[4].mxu1 %vm3661_vm2, %v3634_v61  ;;  %v3509_v1 = vsel %vm3499_vm9, %v7302_v11, %v4693_v28  ;;  %v3508_v0 = vsel %vm3499_vm9, %v7333_v10, %v4692_v60 }
 0x288   : > { %v4701_v41 = vpop.permute.xlu1 %4700  ;;  %v4716_v46 = vpop.permute.xlu0 %4715  ;;  %v3525_v3 = vsel %vm930_vm3, %v3509_v1, %v4708_v55  ;;  %v3524_v30 = vsel %vm930_vm3, %v3508_v0, %v4707_v8 }
 0x289   : > { %v4703_v20 = vunpack.i.h.bf16 %v4701_v41  ;;  %v4702_v27 = vunpack.i.l.bf16 %v4701_v41  ;;  %v4718_v23 = vunpack.i.h.bf16 %v4716_v46  ;;  %v4717_v18 = vunpack.i.l.bf16 %v4716_v46 }
 0x28b   : > { %v3511_v45 = vsel %vm3499_vm9, %v8699_v5, %v4703_v20  ;;  %v3510_v54 = vsel %vm3499_vm9, %v8700_v39, %v4702_v27  ;;  %v3541_v10 = vsel %vm3532_vm10, %v3524_v30, %v4717_v18  ;;  %v3542_v19 = vsel %vm3532_vm10, %v3525_v3, %v4718_v23 }
 0x28c   : > { %v4711_v16 = vpop.permute.xlu1 %4710  ;;  %v4726_v13 = vpop.permute.xlu0 %4725 }
 0x28d   : > { %v4728_v42 = vunpack.i.h.bf16 %v4726_v13  ;;  %v4727_v9 = vunpack.i.l.bf16 %v4726_v13  ;;  %v4713_v34 = vunpack.i.h.bf16 %v4711_v16  ;;  %v4712_v12 = vunpack.i.l.bf16 %v4711_v16 }
 0x28f   : > { %v3557_v53 = vsel %vm947_vm4, %v3541_v10, %v4727_v9  ;;  %v3558_v15 = vsel %vm947_vm4, %v3542_v19, %v4728_v42  ;;  %v3526_v27 = vsel %vm930_vm3, %v3510_v54, %v4712_v12  ;;  %v3527_v23 = vsel %vm930_vm3, %v3511_v45, %v4713_v34 }
 0x290   : > { %v4721_v25 = vpop.permute.xlu1 %4720  ;;  %v4736_v21 = vpop.permute.xlu0 %4735 }
 0x291   : > { %v4738_v44 = vunpack.i.h.bf16 %v4736_v21  ;;  %v4737_v35 = vunpack.i.l.bf16 %v4736_v21  ;;  %v4723_v4 = vunpack.i.h.bf16 %v4721_v25  ;;  %v4722_v6 = vunpack.i.l.bf16 %v4721_v25 }
 0x293   : > { %v3574_v51 = vsel %vm3565_vm11, %v3557_v53, %v4737_v35  ;;  %v3575_v56 = vsel %vm3565_vm11, %v3558_v15, %v4738_v44  ;;  %v3544_v1 = vsel %vm3532_vm10, %v3527_v23, %v4723_v4  ;;  %v3543_v0 = vsel %vm3532_vm10, %v3526_v27, %v4722_v6 }
 0x294   : > { %v4746_v59 = vpop.permute.xlu0 %4745 }
 0x295   : > { %v4748_v11 = vunpack.i.h.bf16 %v4746_v59  ;;  %v4747_v26 = vunpack.i.l.bf16 %v4746_v59 }
 0x296   : > { %v4731_v22 = vpop.permute.xlu1 %4730 }
 0x297   : > { %v3590_v61 = vsel %vm964_vm5, %v3574_v51, %v4747_v26  ;;  %v3591_v41 = vsel %vm964_vm5, %v3575_v56, %v4748_v11  ;;  %v4733_v28 = vunpack.i.h.bf16 %v4731_v22  ;;  %v4732_v16 = vunpack.i.l.bf16 %v4731_v22 }
 0x298   : > { %v4756_v33 = vpop.permute.xlu0 %4755 }
 0x299   : > { %v4758_v40 = vunpack.i.h.bf16 %v4756_v33  ;;  %v4757_v50 = vunpack.i.l.bf16 %v4756_v33  ;;  %v3560_v9 = vsel %vm947_vm4, %v3544_v1, %v4733_v28  ;;  %v3559_v3 = vsel %vm947_vm4, %v3543_v0, %v4732_v16 }
 0x29a   : > { %v4741_v49 = vpop.permute.xlu1 %4740 }
 0x29b   : > { %v3607_v60 = vsel %vm3598_vm12, %v3590_v61, %v4757_v50  ;;  %v3608_v55 = vsel %vm3598_vm12, %v3591_v41, %v4758_v40  ;;  %v4743_v8 = vunpack.i.h.bf16 %v4741_v49  ;;  %v4742_v25 = vunpack.i.l.bf16 %v4741_v49 }
 0x29c   : > { %v4766_v58 = vpop.permute.xlu0 %4765 }
 0x29d   : > { %v4768_v13 = vunpack.i.h.bf16 %v4766_v58  ;;  %v4767_v21 = vunpack.i.l.bf16 %v4766_v58  ;;  %v3576_v30 = vsel %vm3565_vm11, %v3559_v3, %v4742_v25  ;;  %v3577_v44 = vsel %vm3565_vm11, %v3560_v9, %v4743_v8 }
 0x29e   : > { %v4751_v46 = vpop.permute.xlu1 %4750 }
 0x29f   : > { %v3623_v59 = vsel %vm981_vm6, %v3607_v60, %v4767_v21  ;;  %v3624_v20 = vsel %vm981_vm6, %v3608_v55, %v4768_v13  ;;  %v4753_v22 = vunpack.i.h.bf16 %v4751_v46  ;;  %v4752_v42 = vunpack.i.l.bf16 %v4751_v46 }
 0x2a0   : > { %v3635_v18 = vpack.c.bf16 %v3624_v20, %v3623_v59 }
 0x2a1   : > { %v3593_v54 = vsel %vm964_vm5, %v3577_v44, %v4753_v22  ;;  %v3592_v11 = vsel %vm964_vm5, %v3576_v30, %v4752_v42 }
 0x2a2   : > { %4144 = vmatprep.mubr.msk.bf16.mxu1 %vm3661_vm2, %v3635_v18 }
 0x2a7   : > { %v4761_v35 = vpop.permute.xlu1 %4760  ;;  %v4776_v49 = vpop.permute.xlu0 %4775 }
 0x2a8   : > { %v4763_v33 = vunpack.i.h.bf16 %v4761_v35  ;;  %v4762_v5 = vunpack.i.l.bf16 %v4761_v35  ;;  %v4778_v45 = vunpack.i.h.bf16 %v4776_v49  ;;  %v4777_v39 = vunpack.i.l.bf16 %v4776_v49 }
 0x2aa   : > { %v3610_v26 = vsel %vm3598_vm12, %v3593_v54, %v4763_v33  ;;  %v3609_v10 = vsel %vm3598_vm12, %v3592_v11, %v4762_v5 }
 0x2ab   : > { %v3626_v19 = vsel %vm981_vm6, %v3610_v26, %v4778_v45  ;;  %v3625_v40 = vsel %vm981_vm6, %v3609_v10, %v4777_v39  ;;  %v4771_v50 = vpop.permute.xlu1 %4770  ;;  %v4786_v34 = vpop.permute.xlu0 %4785 }
 0x2ac   : > { %v3636_v12 = vpack.c.bf16 %v3626_v19, %v3625_v40  ;;  %v4773_v58 = vunpack.i.h.bf16 %v4771_v50  ;;  %v4772_v61 = vunpack.i.l.bf16 %v4771_v50  ;;  %v4788_v13 = vunpack.i.h.bf16 %v4786_v34 }
 0x2ad   : > { %v4787_v21 = vunpack.i.l.bf16 %v4786_v34 }
 0x2ae   : > { %4145 = vmatmul.mubr.msk.bf16.gmra.mrb[8].mxu1 %vm3661_vm2, %v3636_v12  ;;  %v3513_v25 = vsel %vm3499_vm9, %v7518_v62, %v4773_v58  ;;  %v3512_v59 = vsel %vm3499_vm9, %v7536_v47, %v4772_v61 }
 0x2af   : > { %v4781_v53 = vpop.permute.xlu1 %4780  ;;  %v4796_v15 = vpop.permute.xlu0 %4795  ;;  %v3529_v1 = vsel %vm930_vm3, %v3513_v25, %v4788_v13  ;;  %v3528_v0 = vsel %vm930_vm3, %v3512_v59, %v4787_v21 }
 0x2b0   : > { %v4798_v28 = vunpack.i.h.bf16 %v4796_v15  ;;  %v4797_v16 = vunpack.i.l.bf16 %v4796_v15  ;;  %v4783_v60 = vunpack.i.h.bf16 %v4781_v53  ;;  %v4782_v47 = vunpack.i.l.bf16 %v4781_v53 }
 0x2b2   : > { %v3545_v9 = vsel %vm3532_vm10, %v3528_v0, %v4797_v16  ;;  %v3546_v3 = vsel %vm3532_vm10, %v3529_v1, %v4798_v28  ;;  %v3515_v62 = vsel %vm3499_vm9, %v7650_v52, %v4783_v60 }
 0x2b3   : > { %v4791_v4 = vpop.permute.xlu1 %4790  ;;  %v4806_v6 = vpop.permute.xlu0 %4805 }
 0x2b4   : > { %v4808_v55 = vunpack.i.h.bf16 %v4806_v6  ;;  %v4807_v8 = vunpack.i.l.bf16 %v4806_v6  ;;  %v4793_v33 = vunpack.i.h.bf16 %v4791_v4  ;;  %v4792_v5 = vunpack.i.l.bf16 %v4791_v4 }
 0x2b6   : > { %v3561_v35 = vsel %vm947_vm4, %v3545_v9, %v4807_v8  ;;  %v3562_v49 = vsel %vm947_vm4, %v3546_v3, %v4808_v55 }
 0x2b7   : > { %v4801_v51 = vpop.permute.xlu1 %4800  ;;  %v4816_v56 = vpop.permute.xlu0 %4815 }
 0x2b8   : > { %v4818_v20 = vunpack.i.h.bf16 %v4816_v56  ;;  %v4817_v27 = vunpack.i.l.bf16 %v4816_v56  ;;  %v4803_v52 = vunpack.i.h.bf16 %v4801_v51  ;;  %v4802_v50 = vunpack.i.l.bf16 %v4801_v51 }
 0x2b9   : > { %v3514_v56 = vsel %vm3499_vm9, %v7660_v2, %v4782_v47  ;;  %v3531_v51 = vsel %vm930_vm3, %v3515_v62, %v4793_v33  ;;  %v1157_v62 = vsub.s32 0, %v5860_v36  ;;  %v1154_v47 = vld [vmem:[%s8173_s3] sm:$0x3]  ;;  %v8702_v33 = vld [vmem:[#allocation19_spill] sm:$0xff] }
 0x2ba   : > { %v3578_v45 = vsel %vm3565_vm11, %v3561_v35, %v4817_v27  ;;  %v3579_v39 = vsel %vm3565_vm11, %v3562_v49, %v4818_v20  ;;  %v3530_v21 = vsel %vm930_vm3, %v3514_v56, %v4792_v5  ;;  %v3548_v60 = vsel %vm3532_vm10, %v3531_v51, %v4803_v52  ;;  %v8701_v49 = vld [vmem:[#allocation7_spill] sm:$0xff] }
 0x2bb   : > { %v4811_v41 = vpop.permute.xlu1 %4810  ;;  %v4826_v46 = vpop.permute.xlu0 %4825  ;;  %v1139_v5 = vadd.f32 %v8702_v33, %v8701_v49  ;;  %v8711_v33 = vld [vmem:[#allocation67_spill] sm:$0xff] }
 0x2bc   : > { %v4828_v22 = vunpack.i.h.bf16 %v4826_v46  ;;  %v4827_v42 = vunpack.i.l.bf16 %v4826_v46  ;;  %v4813_v53 = vunpack.i.h.bf16 %v4811_v41  ;;  %v4812_v15 = vunpack.i.l.bf16 %v4811_v41 }
 0x2bd   : > { %v3547_v41 = vsel %vm3532_vm10, %v3530_v21, %v4802_v50  ;;  %v8019_v50 = vld [vmem:[%s8177_s7] ss:$0 sm:$0xff] }
 0x2be   : > { %v3594_v26 = vsel %vm964_vm5, %v3578_v45, %v4827_v42  ;;  %v3595_v10 = vsel %vm964_vm5, %v3579_v39, %v4828_v22  ;;  %v3564_v2 = vsel %vm947_vm4, %v3548_v60, %v4813_v53  ;;  %v3563_v25 = vsel %vm947_vm4, %v3547_v41, %v4812_v15  ;;  %v8703_v45 = vld [vmem:[#allocation6_spill] sm:$0xff]  ;;  %v8704_v39 = vld [vmem:[#allocation20_spill] sm:$0xff] }
 0x2bf   : > { %v4821_v23 = vpop.permute.xlu1 %4820  ;;  %v4836_v18 = vpop.permute.xlu0 %4835  ;;  %v8710_v21 = vld [vmem:[#allocation46_spill] sm:$0xff] }
 0x2c0   : > { %v4838_v30 = vunpack.i.h.bf16 %v4836_v18  ;;  %v4837_v44 = vunpack.i.l.bf16 %v4836_v18  ;;  %v4823_v58 = vunpack.i.h.bf16 %v4821_v23  ;;  %v4822_v61 = vunpack.i.l.bf16 %v4821_v23 }
 0x2c2   : > { %v3611_v34 = vsel %vm3598_vm12, %v3594_v26, %v4837_v44  ;;  %v3612_v12 = vsel %vm3598_vm12, %v3595_v10, %v4838_v30  ;;  %v3580_v59 = vsel %vm3565_vm11, %v3563_v25, %v4822_v61  ;;  %v3581_v20 = vsel %vm3565_vm11, %v3564_v2, %v4823_v58  ;;  %v8706_v26 = vld [vmem:[#allocation18_spill] sm:$0xff] }
 0x2c3   : > { %v4831_v54 = vpop.permute.xlu1 %4830  ;;  %v4846_v11 = vpop.permute.xlu0 %4845  ;;  %v8708_v58 = vld [vmem:[#allocation42_spill] sm:$0xff] }
 0x2c4   : > { %v4848_v19 = vunpack.i.h.bf16 %v4846_v11  ;;  %v4847_v40 = vunpack.i.l.bf16 %v4846_v11  ;;  %v4833_v28 = vunpack.i.h.bf16 %v4831_v54  ;;  %v4832_v16 = vunpack.i.l.bf16 %v4831_v54  ;;  %v8705_v11 = vld [vmem:[#allocation2_spill] sm:$0xff] }
 0x2c5   : > { %v1138_v54 = vadd.f32 %v8704_v39, %v8703_v45  ;;  %v1140_v10 = vadd.f32 %v8706_v26, %v8705_v11  ;;  %v8712_v45 = vld [vmem:[#allocation60_spill] sm:$0xff]  ;;  %v8714_v11 = vld [vmem:[#allocation29_spill] sm:$0xff] }
 0x2c6   : > { %v3627_v4 = vsel %vm981_vm6, %v3611_v34, %v4847_v40  ;;  %v3628_v6 = vsel %vm981_vm6, %v3612_v12, %v4848_v19  ;;  %v3597_v23 = vsel %vm964_vm5, %v3581_v20, %v4833_v28  ;;  %v3596_v18 = vsel %vm964_vm5, %v3580_v59, %v4832_v16 }
 0x2c7   : > { %v3637_v46 = vpack.c.bf16 %v3628_v6, %v3627_v4  ;;  %v4841_v13 = vpop.permute.xlu1 %4840  ;;  %v1097_v44 = vpop.permute.xlu0 %1096  ;;  %v8012_v19 = vrot.slane %v1154_v47, %v1157_v62  ;;  %v1330_v40 = vsub.s32 1, %v5860_v36  ;;  %v8707_v36 = vld [vmem:[#allocation38_spill] sm:$0xff] }
 0x2c8   : > { %v4843_v55 = vunpack.i.h.bf16 %v4841_v13  ;;  %v4842_v8 = vunpack.i.l.bf16 %v4841_v13  ;;  %v1141_v35 = vadd.f32 %v1097_v44, %v8682_v48 }
 0x2c9   : > { %4148 = vmatprep.mubr.msk.bf16.mxu1 %vm3661_vm2, %v3637_v46  ;;  %v1161_v48 = vmul.f32 %v8012_v19, %v1140_v10  ;;  %v1159_v34 = vmul.f32 %v8012_v19, %v1138_v54  ;;  %v1160_v12 = vmul.f32 %v8012_v19, %v1139_v5  ;;  %v8024_v15 = vrot.slane %v1154_v47, %v1330_v40  ;;  %v8709_v46 = vld [vmem:[#allocation58_spill] sm:$0xff]  ;;  %v8713_v54 = vld [vmem:[#allocation36_spill] sm:$0xff] }
 0x2ca   : > { %v3614_v22 = vsel %vm3598_vm12, %v3597_v23, %v4843_v55  ;;  %v3613_v42 = vsel %vm3598_vm12, %v3596_v18, %v4842_v8  ;;  %v1162_v52 = vmul.f32 %v8012_v19, %v1141_v35 }
 0x2cb   : > { %v4851_v27 = vpop.permute.xlu1 %4850  ;;  %v1274_v56 = vadd.f32 %v8707_v36, %v1161_v48  ;;  %v1266_v61 = vadd.f32 %v8708_v58, %v1159_v34  ;;  %v1269_v13 = vadd.f32 %v8709_v46, %v1160_v12 }
 0x2cc   : > { %v4853_v1 = vunpack.i.h.bf16 %v4851_v27  ;;  %v4852_v0 = vunpack.i.l.bf16 %v4851_v27  ;;  %v1277_v51 = vadd.f32 %v8710_v21, %v1162_v52 }
 0x2cd   : > { %v1334_v8 = vadd.f32 %v8024_v15, %v1274_v56  ;;  %v1332_v2 = vadd.f32 %v8024_v15, %v1266_v61  ;;  %v1333_v25 = vadd.f32 %v8024_v15, %v1269_v13 }
 0x2ce   : > { %v3629_v9 = vsel %vm981_vm6, %v3613_v42, %v4852_v0  ;;  %v3630_v3 = vsel %vm981_vm6, %v3614_v22, %v4853_v1  ;;  %v1335_v59 = vadd.f32 %v8024_v15, %v1277_v51  ;;  %v1101_v1 = vpop.permute.xlu0 %1100 }
 0x2cf   : > { %v3638_v30 = vpack.c.bf16 %v3630_v3, %v3629_v9  ;;  %v1099_v22 = vpop.permute.xlu1 %1098  ;;  %v1143_v44 = vadd.f32 %v1101_v1, %v8683_v43 }
 0x2d0   : > { %v1142_v3 = vadd.f32 %v1099_v22, %v8684_v29 }
 0x2d1   : > { %4149 = vmatmul.mubr.msk.bf16.gmra.mrb[12].mxu1 %vm3661_vm2, %v3638_v30  ;;  %v1164_v49 = vmul.f32 %v8012_v19, %v1143_v44 }
 0x2d2   : > { %v1103_v0 = vpop.permute.xlu0 %1102  ;;  %v1163_v47 = vmul.f32 %v8012_v19, %v1142_v3 }
 0x2d3   : > { %v1144_v9 = vadd.f32 %v1103_v0, %v8685_v24  ;;  %v1285_v29 = vadd.f32 %v8714_v11, %v1164_v49  ;;  %v8716_v0 = vld [vmem:[#allocation37_spill] sm:$0xff] }
 0x2d4   : > { %v1282_v39 = vadd.f32 %v8712_v45, %v1163_v47 }
 0x2d5   : > { %v1165_v62 = vmul.f32 %v8012_v19, %v1144_v9  ;;  %v1337_v56 = vadd.f32 %v8024_v15, %v1285_v29  ;;  %v8718_v9 = vld [vmem:[#allocation35_spill] sm:$0xff] }
 0x2d6   : > { %v1105_v42 = vpop.permute.xlu0 %1104  ;;  %v1336_v48 = vadd.f32 %v8024_v15, %v1282_v39 }
 0x2d7   : > { %v1145_v30 = vadd.f32 %v1105_v42, %v8686_v17  ;;  %v1290_v5 = vadd.f32 %v8711_v33, %v1165_v62  ;;  %v8717_v42 = vld [vmem:[#allocation32_spill] sm:$0xff] }
 0x2d9   : > { %v1166_v35 = vmul.f32 %v8012_v19, %v1145_v30  ;;  %v1338_v10 = vadd.f32 %v8024_v15, %v1290_v5 }
 0x2da   : > { %v1107_v58 = vpop.permute.xlu0 %1106 }
 0x2db   : > { %v1293_v24 = vadd.f32 %v8713_v54, %v1166_v35 }
 0x2de   : > { %v1109_v13 = vpop.permute.xlu0 %1108 }
 0x2e2   : > { %v1111_v21 = vpop.permute.xlu0 %1110 }
 0x2e6   : > { %v1113_v51 = vpop.permute.xlu0 %1112 }
 0x325   : > { %v4138_v53 = vpop.f32.mrb[0].mxu1 }
 0x326   : > { %v3733_v4 = vadd.f32 %v4138_v53, %v8019_v50  ;;  %v3724_v6 = vpop.f32.mrb[1].mxu1 }
 0x327   : > { %v4139_v28 = vpop.f32.mrb[2].mxu1  ;;  %v3725_v60 = vadd.f32 %v8019_v50, %v3724_v6 }
 0x328   : > { %3823 = vrot.lane.b32.xlu1 %v3733_v4, %s8681_s20  ;;  %v3727_v16 = vpop.f32.mrb[3].mxu1  ;;  %v3736_v41 = vadd.f32 %v4139_v28, %v8019_v50  ;;  %v8040_v20 = vmul.f32 %v3733_v4, %v1334_v8  ;;  %v1339_v4 = vadd.f32 %v8024_v15, %v1293_v24  ;;  %v1148_v28 = vadd.f32 %v1111_v21, %v8689_v7  ;;  %v1115_v24 = vpop.permute.xlu0 %1114 }
 0x329   : > { %v3728_v55 = vadd.f32 %v8019_v50, %v3727_v16  ;;  %v8042_v27 = vmul.f32 %v3725_v60, %v1332_v2  ;;  %v1146_v16 = vadd.f32 %v1107_v58, %v8687_v37 }
 0x32a   : > { %v8044_v23 = vmul.f32 %v3736_v41, %v1335_v59  ;;  %v8715_v59 = vld [vmem:[#allocation51_spill] sm:$0xff] }
 0x32b   : > { %v8046_v18 = vmul.f32 %v3728_v55, %v1333_v25  ;;  %v1167_v8 = vmul.f32 %v8012_v19, %v1146_v16 }
 0x32c   : > { %3819 = vrot.lane.b32.xlu1 %v3725_v60, %s8681_s20  ;;  %v1149_v60 = vadd.f32 %v1113_v51, %v8690_v31  ;;  %v8721_v51 = vld [vmem:[#allocation63_spill] sm:$0xff] }
 0x32d   : > { %v1298_v22 = vadd.f32 %v8716_v0, %v1167_v8 }
 0x32e   : > { %v1170_v2 = vmul.f32 %v8012_v19, %v1149_v60 }
 0x32f   : > { %v1340_v47 = vadd.f32 %v8024_v15, %v1298_v22 }
 0x330   : > { %3825 = vrot.lane.b32.xlu1 %v3736_v41, %s8681_s20  ;;  %v1147_v41 = vadd.f32 %v1109_v13, %v8688_v32  ;;  %v1309_v7 = vadd.f32 %v8717_v42, %v1170_v2  ;;  %v8720_v13 = vld [vmem:[#allocation33_spill] sm:$0xff] }
 0x332   : > { %v1168_v25 = vmul.f32 %v8012_v19, %v1147_v41  ;;  %v1343_v5 = vadd.f32 %v8024_v15, %v1309_v7 }
 0x334   : > { %3821 = vrot.lane.b32.xlu1 %v3728_v55, %s8681_s20  ;;  %v1169_v55 = vmul.f32 %v8012_v19, %v1148_v28  ;;  %v1301_v37 = vadd.f32 %v8718_v9, %v1168_v25  ;;  %v8722_v28 = vld [vmem:[#allocation57_spill] sm:$0xff] }
 0x336   : > { %v1306_v1 = vadd.f32 %v8715_v59, %v1169_v55  ;;  %v1341_v54 = vadd.f32 %v8024_v15, %v1301_v37 }
 0x338   : > { %v1342_v30 = vadd.f32 %v8024_v15, %v1306_v1 }
 0x35a   : > { %v4142_v26 = vpop.f32.mrb[4].mxu1 }
 0x35b   : > { %v3749_v17 = vadd.f32 %v4142_v26, %v8019_v50  ;;  %v3740_v43 = vpop.f32.mrb[5].mxu1  ;;  %v1117_v26 = vpop.permute.xlu0 %1116 }
 0x35c   : > { %v3741_v40 = vadd.f32 %v8019_v50, %v3740_v43  ;;  %v4143_v52 = vpop.f32.mrb[6].mxu1 }
 0x35d   : > { %v3752_v34 = vadd.f32 %v4143_v52, %v8019_v50  ;;  %v3743_v12 = vpop.f32.mrb[7].mxu1  ;;  %3831 = vrot.lane.b32.xlu1 %v3749_v17, %s8681_s20  ;;  %v8068_v53 = vmul.f32 %v3749_v17, %v1338_v10 }
 0x35e   : > { %v3744_v6 = vadd.f32 %v8019_v50, %v3743_v12  ;;  %v8072_v36 = vmul.f32 %v3741_v40, %v1336_v48  ;;  %v1151_v48 = vadd.f32 %v1117_v26, %v8694_v38 }
 0x35f   : > { %v8075_v61 = vmul.f32 %v3752_v34, %v1339_v4  ;;  %v1119_v17 = vpop.permute.xlu0 %1118 }
 0x360   : > { %v8077_v46 = vmul.f32 %v3744_v6, %v1337_v56  ;;  %v1152_v10 = vadd.f32 %v1119_v17, %v8695_v57  ;;  %v8719_v56 = vld [vmem:[#allocation40_spill] sm:$0xff] }
 0x361   : > { %3827 = vrot.lane.b32.xlu1 %v3741_v40, %s8681_s20  ;;  %v1150_v40 = vadd.f32 %v1115_v24, %v8693_v14 }
 0x363   : > { %v1121_v43 = vpop.permute.xlu0 %1120  ;;  %v1171_v12 = vmul.f32 %v8012_v19, %v1150_v40 }
 0x364   : > { %v1153_v52 = vadd.f32 %v1121_v43, %v8698_v63 }
 0x365   : > { %3833 = vrot.lane.b32.xlu1 %v3752_v34, %s8681_s20  ;;  %v1173_v34 = vmul.f32 %v8012_v19, %v1152_v10  ;;  %v1314_v21 = vadd.f32 %v8720_v13, %v1171_v12 }
 0x366   : > { %v1174_v4 = vmul.f32 %v8012_v19, %v1153_v52 }
 0x367   : > { %v1322_v58 = vadd.f32 %v8719_v56, %v1173_v34  ;;  %v1344_v8 = vadd.f32 %v8024_v15, %v1314_v21 }
 0x368   : > { %v1325_v57 = vadd.f32 %v8721_v51, %v1174_v4 }
 0x369   : > { %3829 = vrot.lane.b32.xlu1 %v3744_v6, %s8681_s20  ;;  %v1172_v6 = vmul.f32 %v8012_v19, %v1151_v48  ;;  %v1346_v60 = vadd.f32 %v8024_v15, %v1322_v58 }
 0x36a   : > { %v1347_v59 = vadd.f32 %v8024_v15, %v1325_v57 }
 0x36b   : > { %v1317_v14 = vadd.f32 %v8722_v28, %v1172_v6 }
 0x36d   : > { %v1345_v0 = vadd.f32 %v8024_v15, %v1317_v14 }
 0x381   : > { %v4146_v3 = vpop.f32.mrb[8].mxu1 }
 0x382   : > { %v3765_v31 = vadd.f32 %v4146_v3, %v8019_v50  ;;  %v3756_v32 = vpop.f32.mrb[9].mxu1 }
 0x383   : > { %v3757_v44 = vadd.f32 %v8019_v50, %v3756_v32  ;;  %v4147_v62 = vpop.f32.mrb[10].mxu1 }
 0x384   : > { %v3768_v35 = vadd.f32 %v4147_v62, %v8019_v50  ;;  %v3759_v49 = vpop.f32.mrb[11].mxu1  ;;  %3839 = vrot.lane.b32.xlu1 %v3765_v31, %s8681_s20  ;;  %v8100_v33 = vmul.f32 %v3765_v31, %v1342_v30 }
 0x385   : > { %v3760_v45 = vadd.f32 %v8019_v50, %v3759_v49  ;;  %v8104_v39 = vmul.f32 %v3757_v44, %v1340_v47 }
 0x386   : > { %3841 = vrot.lane.b32.xlu0 %v3768_v35, %s8681_s20  ;;  %v8108_v11 = vmul.f32 %v3768_v35, %v1343_v5 }
 0x387   : > { %v8110_v29 = vmul.f32 %v3760_v45, %v1341_v54 }
 0x388   : > { %3835 = vrot.lane.b32.xlu1 %v3757_v44, %s8681_s20 }
 0x38c   : > { %3837 = vrot.lane.b32.xlu1 %v3760_v45, %s8681_s20 }
 0x39a   : > { %v3824_v9 = vpop.permute.xlu1 %3823 }
 0x39b   : > { %v3869_v44 = vadd.f32 %v3824_v9, %v8040_v20 }
 0x39e   : > { %v3820_v37 = vpop.permute.xlu1 %3819 }
 0x39f   : > { %v3867_v32 = vadd.f32 %v3820_v37, %v8042_v27 }
 0x3a2   : > { %v3826_v3 = vpop.permute.xlu1 %3825 }
 0x3a3   : > { %v3870_v47 = vadd.f32 %v3826_v3, %v8044_v23 }
 0x3a4   : > { %v4150_v16 = vpop.f32.mrb[12].mxu1 }
 0x3a5   : > { %v3781_v63 = vadd.f32 %v4150_v16, %v8019_v50  ;;  %v3772_v38 = vpop.f32.mrb[13].mxu1 }
 0x3a6   : > { %v3773_v41 = vadd.f32 %v8019_v50, %v3772_v38  ;;  %v4151_v55 = vpop.f32.mrb[14].mxu1  ;;  %v3822_v31 = vpop.permute.xlu1 %3821 }
 0x3a7   : > { %v3784_v19 = vadd.f32 %v4151_v55, %v8019_v50  ;;  %v3775_v2 = vpop.f32.mrb[15].mxu1  ;;  %3847 = vrot.lane.b32.xlu1 %v3781_v63, %s8681_s20  ;;  %v3801_v25 = vmul.f32 %v3781_v63, %v1346_v60 }
 0x3a8   : > { %v3776_v1 = vadd.f32 %v8019_v50, %v3775_v2  ;;  %v3799_v22 = vmul.f32 %v3773_v41, %v1344_v8  ;;  %v3868_v50 = vadd.f32 %v3822_v31, %v8046_v18 }
 0x3a9   : > { %v3802_v42 = vmul.f32 %v3784_v19, %v1347_v59 }
 0x3aa   : > { %3845 = vrot.lane.b32.xlu0 %v3776_v1, %s8681_s20  ;;  %v3800_v7 = vmul.f32 %v3776_v1, %v1345_v0 }
 0x3ab   : > { %3843 = vrot.lane.b32.xlu1 %v3773_v41, %s8681_s20 }
 0x3ae   : > { %3849 = vrot.lane.b32.xlu0 %v3784_v19, %s8681_s20 }
 0x3cf   : > { %v3832_v30 = vpop.permute.xlu1 %3831 }
 0x3d0   : > { %v3873_v27 = vadd.f32 %v3832_v30, %v8068_v53 }
 0x3d3   : > { %v3828_v15 = vpop.permute.xlu1 %3827 }
 0x3d4   : > { %3883 = vxpose.xlu1.b32.start [1/16] (narrow) %v3867_v32, 8  ;;  %v3871_v49 = vadd.f32 %v3828_v15, %v8072_v36 }
 0x3d7   : > { %v3834_v62 = vpop.permute.xlu1 %3833 }
 0x3d8   : > { %3884 = vxpose.xlu1.b32.cont [2/16] (narrow) %v3868_v50, 8  ;;  %v3874_v18 = vadd.f32 %v3834_v62, %v8075_v61 }
 0x3db   : > { %v3830_v35 = vpop.permute.xlu1 %3829 }
 0x3dc   : > { %3885 = vxpose.xlu1.b32.cont [3/16] (narrow) %v3869_v44, 8  ;;  %v3872_v5 = vadd.f32 %v3830_v35, %v8077_v46 }
 0x3e0   : > { %3886 = vxpose.xlu1.b32.cont [4/16] (narrow) %v3870_v47, 8 }
 0x3e4   : > { %3887 = vxpose.xlu1.b32.cont [5/16] (narrow) %v3871_v49, 8 }
 0x3e8   : > { %3888 = vxpose.xlu1.b32.cont [6/16] (narrow) %v3872_v5, 8 }
 0x3ec   : > { %3889 = vxpose.xlu1.b32.cont [7/16] (narrow) %v3873_v27, 8 }
 0x3f0   : > { %3890 = vxpose.xlu1.b32.cont [8/16] (narrow) %v3874_v18, 8 }
 0x3f6   : > { %v3840_v45 = vpop.permute.xlu1 %3839 }
 0x3f7   : > { %v3877_v36 = vadd.f32 %v3840_v45, %v8100_v33 }
 0x3f8   : > { %v3842_v46 = vpop.permute.xlu0 %3841 }
 0x3f9   : > { %v3878_v53 = vadd.f32 %v3842_v46, %v8108_v11 }
 0x3fa   : > { %v3836_v20 = vpop.permute.xlu1 %3835 }
 0x3fb   : > { %v3875_v54 = vadd.f32 %v3836_v20, %v8104_v39 }
 0x3fd   : > { %3891 = vxpose.xlu1.b32.cont [9/16] (narrow) %v3875_v54, 8 }
 0x3fe   : > { %v3838_v23 = vpop.permute.xlu1 %3837 }
 0x3ff   : > { %v3876_v24 = vadd.f32 %v3838_v23, %v8110_v29 }
 0x401   : > { %3892 = vxpose.xlu1.b32.cont [10/16] (narrow) %v3876_v24, 8 }
 0x405   : > { %3893 = vxpose.xlu1.b32.cont [11/16] (narrow) %v3877_v36, 8 }
 0x409   : > { %3894 = vxpose.xlu1.b32.cont [12/16] (narrow) %v3878_v53, 8 }
 0x419   : > { %v3848_v61 = vpop.permute.xlu1 %3847 }
 0x41a   : > { %v3881_v10 = vadd.f32 %v3848_v61, %v3801_v25 }
 0x41c   : > { %v3846_v43 = vpop.permute.xlu0 %3845 }
 0x41d   : > { %v3844_v26 = vpop.permute.xlu1 %3843  ;;  %v3880_v39 = vadd.f32 %v3846_v43, %v3800_v7 }
 0x41e   : > { %v3879_v17 = vadd.f32 %v3844_v26, %v3799_v22 }
 0x420   : > { %3895 = vxpose.xlu1.b32.cont [13/16] (narrow) %v3879_v17, 8  ;;  %v3850_v40 = vpop.permute.xlu0 %3849 }
 0x421   : > { %v3882_v29 = vadd.f32 %v3850_v40, %v3802_v42 }
 0x424   : > { %3896 = vxpose.xlu1.b32.cont [14/16] (narrow) %v3880_v39, 8 }
 0x428   : > { %3897 = vxpose.xlu1.b32.cont [15/16] (narrow) %v3881_v10, 8 }
 0x42c   : > { %3898 = vxpose.xlu1.b32.end [16/16] (narrow) %v3882_v29, 8 }
 0x470   : > { %v3899_v33 = vpop.trf.xlu1 }
 0x471   : > { %3915 = vst [vmem:[%s373_s13] sm:$0xf] %v3899_v33 }
 0x472 PF: > { %s18_s9 = sadd.s32 1, %s4910_s9   ;;  %s8723_s27 = smov %s4902_s29 }
 0x473   : > { %p15_p8 = scmp.ge.s32.totalorder %s18_s9, 6   ;;  %s8724_s28 = smov %s4906_s30 }
 0x474   : > { %s8725_s29 = smov %s8728_s10  ;;  %s8726_s30 = smov %s8732_s11 }
 0x475   :  { %17 = sbr.rel (!%p15_p8) target bundleno = 3 (0x3), region = 93 }

</bundles_post_ra>
